<compile_context>
chip_gen: v5e
topology: v5e:2x2
jax: 0.10.0
libtpu: 0.0.40
codegen_flags: <defaults>
</compile_context>

<pallas_src>
import functools
import math

import numpy as np

import jax
import jax.numpy as jnp
from jax import lax
from jax.experimental import pallas as pl
from jax.experimental.pallas import tpu as pltpu  # noqa: F401  (TPU backend)


# ---------------------------------------------------------------------------
# Config (mirrors the `configs` object handed to models/NuLin.py, small sizes)
# ---------------------------------------------------------------------------
class Cfg:
    enc_in = 4            # channels
    c_out = 4
    action_size = 2
    enc_len = 8
    pred_len = 4
    label_len = 4
    d_model = 32
    n_heads = 4
    d_ff = 64
    e_layers = 1
    d_layers = 1
    n_time_feat = 4       # 'timeF' temporal features
    moving_avg = 25       # DLinear series_decomp kernel size
    revin = 1
    individual = 0


CFG = Cfg()
CFG.wholeseq = CFG.enc_len + CFG.pred_len        # DLinear seq_len
CFG.dl_channels = CFG.enc_in + CFG.action_size   # DLinear enc_in (chan+action)


# ---------------------------------------------------------------------------
# Host-side packing helpers (numpy, run once at parameter-prep time)
# ---------------------------------------------------------------------------
class _SlabPacker:
    """Packs many small 2-D params into one (rows, width) f32 slab.

    Each param starts on an 8-row (sublane) aligned offset; the layout dict
    maps name -> (row_offset, rows, cols) and is closed over by the kernel.
    """

    def __init__(self, width=128, row_align=8):
        self.width = width
        self.align = row_align
        self.blocks = []
        self.layout = {}
        self.n = 0

    def add(self, name, arr):
        a = np.asarray(arr, np.float32)
        if a.ndim == 1:
            a = a.reshape(1, -1)
        assert a.ndim == 2 and a.shape[1] <= self.width, (name, a.shape)
        r, c = a.shape
        buf = np.zeros((r, self.width), np.float32)
        buf[:, :c] = a
        self.layout[name] = (self.n, r, c)
        self.blocks.append(buf)
        self.n += r
        pad = (-self.n) % self.align
        if pad:
            self.blocks.append(np.zeros((pad, self.width), np.float32))
            self.n += pad

    def finalize(self):
        return np.concatenate(self.blocks, axis=0), self.layout


def _block_diag(mat, batch):
    r, c = mat.shape
    out = np.zeros((batch * r, batch * c), np.float32)
    for b in range(batch):
        out[b * r:(b + 1) * r, b * c:(b + 1) * c] = mat
    return out


def _circ_shift(L, shift):
    """(P @ x)[t] = x[(t + shift) mod L]."""
    P = np.zeros((L, L), np.float32)
    for t in range(L):
        P[t, (t + shift) % L] = 1.0
    return P


def _avgpool_matrix(L, k):
    """series_decomp moving-average operator: trend = A @ x (time-first).

    Front/end replication padding of (k-1)//2 steps + AvgPool1d(k, stride=1),
    exact for any odd k (no closed-form pad>=L-1 assumption any more).
    """
    pad = (k - 1) // 2
    A = np.zeros((L, L), np.float32)
    for t in range(L):
        for p in range(t, t + k):
            s = min(max(p - pad, 0), L - 1)
            A[t, s] += 1.0 / k
    return A


def _batch_mask(batch, Lq, Lk, causal):
    """Additive score mask: 0 inside each batch's block, -1e9 elsewhere."""
    NEG = -1e9
    m = np.full((batch * Lq, batch * Lk), NEG, np.float32)
    for b in range(batch):
        if causal:
            blk = np.where(np.arange(Lk)[None, :] <= np.arange(Lq)[:, None],
                           0.0, NEG).astype(np.float32)
        else:
            blk = np.zeros((Lq, Lk), np.float32)
        m[b * Lq:(b + 1) * Lq, b * Lk:(b + 1) * Lk] = blk
    return m


def _positional_embedding(L, d_model):
    pos = np.arange(L, dtype=np.float32)[:, None]
    div = np.exp(np.arange(0, d_model, 2, dtype=np.float32)
                 * (-math.log(10000.0) / d_model))
    pe = np.zeros((L, d_model), np.float32)
    pe[:, 0::2] = np.sin(pos * div)
    pe[:, 1::2] = np.cos(pos * div)
    return pe


# ---------------------------------------------------------------------------
# In-kernel helpers
# ---------------------------------------------------------------------------
def _ln(x, g, b, eps=1e-5):
    mu = jnp.mean(x, axis=-1, keepdims=True)
    xc = x - mu
    var = jnp.mean(xc * xc, axis=-1, keepdims=True)
    return xc * lax.rsqrt(var + eps) * g + b


def _gelu(x):
    # TODO(synk): PyTorch F.gelu default is the exact erf form; the tanh
    # approximation is used to stay on guaranteed-supported elementwise ops.
    c = math.sqrt(2.0 / math.pi)
    return 0.5 * x * (1.0 + jnp.tanh(c * (x + 0.044715 * (x * x * x))))


# ---------------------------------------------------------------------------
# The single fused kernel: whole NuLin forward, everything VMEM-resident.
# Refs: data_ref (batch-stacked inputs), slab_ref (all params), out_ref.
# ---------------------------------------------------------------------------
def _nulin_kernel(data_ref, slab_ref, out_ref, *, cfg, B, P, DATA):
    D, H = cfg.d_model, cfg.n_heads
    dh = D // H
    Le = cfg.pred_len                       # encoder length (= DLinear output)
    Ld = cfg.label_len + cfg.pred_len       # decoder length

    def rd(name):                           # load a param slice (static offsets)
        off, r, c = P[name]
        return slab_ref[off:off + r, 0:c]

    def dd(name):                           # load a data slice
        off, r, c = DATA[name]
        return data_ref[off:off + r, 0:c]

    x = dd("x")            # (B*wholeseq, c_out)  channel-sliced DLinear input
    ymk_e = dd("y")        # (B*Le, n_time_feat)
    x_dec = dd("x_dec")    # (B*Ld, c_out)
    ymk_d = dd("y_dec")    # (B*Ld, n_time_feat)

    # ---- DLinear encoder: series_decomp + seasonal/trend Linears == ONE
    #      batch-fused block-diagonal matmul (operator baked at prep time) ----
    enc_tok = (jnp.dot(rd("dl_w"), x, preferred_element_type=jnp.float32)
               + rd("dl_b"))                                  # (B*Le, c_out)

    # ---- DataEmbedding: circular token conv (baked perms + im2col) +
    #      temporal linear + (tiled positional + temporal bias) ----
    def embed(tokens, ymark, pre):
        xp = jnp.dot(rd(pre + "_pprev"), tokens,
                     preferred_element_type=jnp.float32)
        xn = jnp.dot(rd(pre + "_pnext"), tokens,
                     preferred_element_type=jnp.float32)
        cat = jnp.concatenate([xp, tokens, xn], axis=-1)      # (rows, 3C)
        return (jnp.dot(cat, rd(pre + "_wtok"),
                        preferred_element_type=jnp.float32)
                + jnp.dot(ymark, rd(pre + "_wtemp"),
                          preferred_element_type=jnp.float32)
                + rd(pre + "_addemb"))

    # ---- Multi-head attention: full DxD projections, per-head lane slices.
    #      1/sqrt(dh) already folded into Wq/bq; masks baked as additive. ----
    def attention(xq, xkv, mask, pre):
        q = (jnp.dot(xq, rd(pre + "_wq"), preferred_element_type=jnp.float32)
             + rd(pre + "_bq"))
        k = (jnp.dot(xkv, rd(pre + "_wk"), preferred_element_type=jnp.float32)
             + rd(pre + "_bk"))
        v = (jnp.dot(xkv, rd(pre + "_wv"), preferred_element_type=jnp.float32)
             + rd(pre + "_bv"))
        ctx = []
        for h in range(H):                  # static head loop (H=4)
            sl = slice(h * dh, (h + 1) * dh)
            s = lax.dot_general(q[:, sl], k[:, sl],
                                (((1,), (1,)), ((), ())),
                                preferred_element_type=jnp.float32) + mask
            m = jnp.max(s, axis=-1, keepdims=True)
            ex = jnp.exp(s - m)
            # NOTE: plain (Lq,1) divide kept instead of pl.reciprocal(approx=True)
            # for interpret-mode portability; negligible in this tiny kernel.
            p_ = ex * (1.0 / jnp.sum(ex, axis=-1, keepdims=True))
            ctx.append(jnp.dot(p_, v[:, sl],
                               preferred_element_type=jnp.float32))
        ctx = jnp.concatenate(ctx, axis=-1)                    # (Lq_tot, D)
        return (jnp.dot(ctx, rd(pre + "_wo"),
                        preferred_element_type=jnp.float32) + rd(pre + "_bo"))

    def ffn(xx, pre):
        y = _gelu(jnp.dot(xx, rd(pre + "_ff1_w"),
                          preferred_element_type=jnp.float32)
                  + rd(pre + "_ff1_b"))
        return (jnp.dot(y, rd(pre + "_ff2_w"),
                        preferred_element_type=jnp.float32) + rd(pre + "_ff2_b"))

    # ---- Informer encoder -------------------------------------------------
    e = embed(enc_tok, ymk_e, "enc")
    enc_mask = rd("enc_mask")               # batch-separation mask (hoisted)
    for l in range(cfg.e_layers):
        a = attention(e, e, enc_mask, f"e{l}")
        xx = _ln(e + a, rd(f"e{l}_ln1_g"), rd(f"e{l}_ln1_b"))
        e = _ln(xx + ffn(xx, f"e{l}"), rd(f"e{l}_ln2_g"), rd(f"e{l}_ln2_b"))
    e = _ln(e, rd("enc_n_g"), rd("enc_n_b"))

    # ---- Informer decoder ---------------------------------------------------
    d = embed(x_dec, ymk_d, "dec")
    self_mask = rd("dec_self_mask")         # causal + batch-separation
    cross_mask = rd("dec_cross_mask")       # batch-separation
    for l in range(cfg.d_layers):
        a = attention(d, d, self_mask, f"d{l}s")
        xx = _ln(d + a, rd(f"d{l}_ln1_g"), rd(f"d{l}_ln1_b"))
        a = attention(xx, e, cross_mask, f"d{l}c")
        xx = _ln(xx + a, rd(f"d{l}_ln2_g"), rd(f"d{l}_ln2_b"))
        d = _ln(xx + ffn(xx, f"d{l}"), rd(f"d{l}_ln3_g"), rd(f"d{l}_ln3_b"))
    d = _ln(d, rd("dec_n_g"), rd("dec_n_b"))

    # ---- Slice the last pred_len rows per batch BEFORE the projection ------
    sel = jnp.concatenate(
        [d[b * Ld + cfg.label_len:(b + 1) * Ld, :] for b in range(B)], axis=0)
    out_ref[...] = (jnp.dot(sel, rd("proj_w"),
                            preferred_element_type=jnp.float32)
                    + rd("proj_b"))


# ---------------------------------------------------------------------------
# Parameter init (deterministic, synthetic)
# ---------------------------------------------------------------------------
def init_params(key, cfg):
    keys = iter(jax.random.split(key, 64))

    def dense(d_in, d_out, scale=0.02):
        return {"W": jax.random.normal(next(keys), (d_in, d_out),
                                       jnp.float32) * scale,
                "b": jnp.zeros((d_out,), jnp.float32)}

    def ln():
        return {"g": jnp.ones((cfg.d_model,), jnp.float32),
                "b": jnp.zeros((cfg.d_model,), jnp.float32)}

    D, F = cfg.d_model, cfg.d_ff
    p = {}
    p["dl_seasonal"] = dense(cfg.wholeseq, cfg.pred_len)
    p["dl_trend"] = dense(cfg.wholeseq, cfg.pred_len)
    # Token conv (k=3 circular) weights, bias-free as in Informer.
    p["enc_tok"] = dense(3 * cfg.c_out, D)
    p["enc_temp"] = dense(cfg.n_time_feat, D)
    p["dec_tok"] = dense(3 * cfg.c_out, D)
    p["dec_temp"] = dense(cfg.n_time_feat, D)

    def attn():
        return {"q": dense(D, D), "k": dense(D, D),
                "v": dense(D, D), "o": dense(D, D)}

    p["enc_layers"] = [{"attn": attn(), "ln1": ln(), "ln2": ln(),
                        "ff1": dense(D, F), "ff2": dense(F, D)}
                       for _ in range(cfg.e_layers)]
    p["enc_norm"] = ln()
    p["dec_layers"] = [{"self_attn": attn(), "cross_attn": attn(),
                        "ln1": ln(), "ln2": ln(), "ln3": ln(),
                        "ff1": dense(D, F), "ff2": dense(F, D)}
                       for _ in range(cfg.d_layers)]
    p["dec_norm"] = ln()
    p["proj"] = dense(D, cfg.c_out)
    return p


# ---------------------------------------------------------------------------
# One-time packing of ALL params (plus baked masks / perms / operators) into
# a single lane-dense slab.
# ---------------------------------------------------------------------------
def prepare_params(p, cfg, batch):
    D, H, F = cfg.d_model, cfg.n_heads, cfg.d_ff
    dh = D // H
    q_scale = 1.0 / math.sqrt(dh)            # FullAttention 1/sqrt(E), into Q
    Le = cfg.pred_len
    Ld = cfg.label_len + cfg.pred_len
    L = cfg.wholeseq

    pk = _SlabPacker(width=128, row_align=8)
    npf = lambda a: np.asarray(a, np.float32)  # noqa: E731

    # --- DLinear: fold series_decomp + both time-axis Linears into ONE
    #     batch-block-diagonal matrix (exact for any moving_avg size) ---
    A = _avgpool_matrix(L, cfg.moving_avg)
    Ws = npf(p["dl_seasonal"]["W"]).T          # (pred_len, L)
    Wt = npf(p["dl_trend"]["W"]).T
    W_dl = Ws + (Wt - Ws) @ A
    b_dl = (npf(p["dl_seasonal"]["b"]) + npf(p["dl_trend"]["b"])).reshape(-1, 1)
    pk.add("dl_w", _block_diag(W_dl, batch))
    pk.add("dl_b", np.tile(b_dl, (batch, 1)))

    # --- Embeddings (circular-shift perms + im2col conv W + pos/temporal) ---
    def add_embed(prefix, tok, temp, Lseq):
        pk.add(prefix + "_pprev", _block_diag(_circ_shift(Lseq, -1), batch))
        pk.add(prefix + "_pnext", _block_diag(_circ_shift(Lseq, +1), batch))
        pk.add(prefix + "_wtok", npf(tok["W"]))                 # (3*C, D)
        pk.add(prefix + "_wtemp", npf(temp["W"]))               # (ntf, D)
        pos = _positional_embedding(Lseq, D)
        pk.add(prefix + "_addemb",
               np.tile(pos, (batch, 1)) + npf(temp["b"]).reshape(1, D))

    def add_attn(prefix, a):
        pk.add(prefix + "_wq", npf(a["q"]["W"]) * q_scale)
        pk.add(prefix + "_bq", npf(a["q"]["b"]).reshape(1, D) * q_scale)
        pk.add(prefix + "_wk", npf(a["k"]["W"]))
        pk.add(prefix + "_bk", npf(a["k"]["b"]).reshape(1, D))
        pk.add(prefix + "_wv", npf(a["v"]["W"]))
        pk.add(prefix + "_bv", npf(a["v"]["b"]).reshape(1, D))
        pk.add(prefix + "_wo", npf(a["o"]["W"]))
        pk.add(prefix + "_bo", npf(a["o"]["b"]).reshape(1, D))

    def add_ln(name, lnp):
        pk.add(name + "_g", npf(lnp["g"]).reshape(1, D))
        pk.add(name + "_b", npf(lnp["b"]).reshape(1, D))

    def add_ffn(prefix, lp):
        pk.add(prefix + "_ff1_w", npf(lp["ff1"]["W"]))
        pk.add(prefix + "_ff1_b", npf(lp["ff1"]["b"]).reshape(1, F))
        pk.add(prefix + "_ff2_w", npf(lp["ff2"]["W"]))
        pk.add(prefix + "_ff2_b", npf(lp["ff2"]["b"]).reshape(1, D))

    add_embed("enc", p["enc_tok"], p["enc_temp"], Le)
    for l, lp in enumerate(p["enc_layers"]):
        add_attn(f"e{l}", lp["attn"])
        add_ln(f"e{l}_ln1", lp["ln1"])
        add_ffn(f"e{l}", lp)
        add_ln(f"e{l}_ln2", lp["ln2"])
    add_ln("enc_n", p["enc_norm"])
    pk.add("enc_mask", _batch_mask(batch, Le, Le, causal=False))

    add_embed("dec", p["dec_tok"], p["dec_temp"], Ld)
    for l, lp in enumerate(p["dec_layers"]):
        add_attn(f"d{l}s", lp["self_attn"])
        add_ln(f"d{l}_ln1", lp["ln1"])
        add_attn(f"d{l}c", lp["cross_attn"])
        add_ln(f"d{l}_ln2", lp["ln2"])
        add_ffn(f"d{l}", lp)
        add_ln(f"d{l}_ln3", lp["ln3"])
    add_ln("dec_n", p["dec_norm"])
    pk.add("dec_self_mask", _batch_mask(batch, Ld, Ld, causal=True))
    pk.add("dec_cross_mask", _batch_mask(batch, Ld, Le, causal=False))

    pk.add("proj_w", npf(p["proj"]["W"]))
    pk.add("proj_b", npf(p["proj"]["b"]).reshape(1, cfg.c_out))

    slab, layout = pk.finalize()
    return jnp.asarray(slab), layout


# ---------------------------------------------------------------------------
# Forward wrapper: two operands (data slab + param slab), one pallas_call.
# ---------------------------------------------------------------------------
def _pad_cols(a, w):
    if a.shape[1] == w:
        return a
    return jnp.pad(a, ((0, 0), (0, w - a.shape[1])))


def nulin_forward(slab, x, y, x_dec, y_dec, *, cfg, playout):
    # TODO(synk): revin==0 path (decoder(x_dec, y, enc_out, y_dec)) not wired;
    # the reference config uses revin=1.
    assert cfg.revin == 1
    B = x.shape[0]
    Le = cfg.pred_len
    Ld = cfg.label_len + cfg.pred_len
    ntf = cfg.n_time_feat
    # Param slab was packed (block-diag / masks / pos) for this batch size.
    assert playout["dl_w"][1] == B * cfg.pred_len, "slab packed for another B"

    # individual=0 DLinear never mixes channels, so slicing its input to the
    # last c_out channels equals slicing its output (what NuLin does).
    x_sl = x[:, :, -cfg.c_out:].astype(jnp.float32).reshape(
        B * cfg.wholeseq, cfg.c_out)
    y_e = y.astype(jnp.float32).reshape(B * Le, ntf)
    xd = x_dec.astype(jnp.float32).reshape(B * Ld, cfg.c_out)
    yd = y_dec.astype(jnp.float32).reshape(B * Ld, ntf)

    width = max(cfg.c_out, ntf)
    dlayout, parts, off = {}, [], 0
    for name, a in (("x", x_sl), ("y", y_e), ("x_dec", xd), ("y_dec", yd)):
        r, c = a.shape
        dlayout[name] = (off, r, c)
        parts.append(_pad_cols(a, width))
        off += r
        pad = (-off) % 8
        if pad:
            parts.append(jnp.zeros((pad, width), jnp.float32))
            off += pad
    data = jnp.concatenate(parts, axis=0)

    out = pl.pallas_call(
        functools.partial(_nulin_kernel, cfg=cfg, B=B, P=playout, DATA=dlayout),
        out_shape=jax.ShapeDtypeStruct((B * cfg.pred_len, cfg.c_out),
                                       jnp.float32),
    )(data, slab)
    return out.reshape(B, cfg.pred_len, cfg.c_out)


# ---------------------------------------------------------------------------
if __name__ == "__main__":
    cfg = CFG
    B = 2
    kx, ky, kxd, kyd = jax.random.split(jax.random.PRNGKey(0), 4)
    x = jax.random.normal(kx, (B, cfg.wholeseq, cfg.dl_channels), jnp.float32)
    y = jax.random.normal(ky, (B, cfg.pred_len, cfg.n_time_feat), jnp.float32)
    x_dec = jax.random.normal(kxd, (B, cfg.label_len + cfg.pred_len, cfg.c_out),
                              jnp.float32)
    y_dec = jax.random.normal(kyd, (B, cfg.label_len + cfg.pred_len,
                                    cfg.n_time_feat), jnp.float32)

    params = init_params(jax.random.PRNGKey(42), cfg)
    slab, playout = prepare_params(params, cfg, B)

    fwd = jax.jit(functools.partial(nulin_forward, cfg=cfg, playout=playout))
    out = jax.block_until_ready(fwd(slab, x, y, x_dec, y_dec))
    assert out.shape == (B, cfg.pred_len, cfg.c_out), out.shape
    assert bool(jnp.all(jnp.isfinite(out)))
    print("KERNEL_OK")
</pallas_src>

<mosaic_0001>
module attributes {stable_mosaic.version = 11 : i64} {
  func.func @_nulin_kernel(%arg0: memref<64x4xf32, #tpu.memory_space<vmem>>, %arg1: memref<1032x128xf32, #tpu.memory_space<vmem>>, %arg2: memref<8x4xf32, #tpu.memory_space<vmem>>) attributes {dimension_semantics = [], scalar_prefetch = 0 : i64, scratch_operands = 0 : i64, tpu.core_type = #tpu.core_type<tc>} {
    %c0 = arith.constant 0 : index
    %c0_0 = arith.constant 0 : index
    %0 = vector.load %arg0[%c0, %c0_0] : memref<64x4xf32, #tpu.memory_space<vmem>>, vector<24x4xf32>
    %c24 = arith.constant 24 : index
    %c0_1 = arith.constant 0 : index
    %1 = vector.load %arg0[%c24, %c0_1] : memref<64x4xf32, #tpu.memory_space<vmem>>, vector<8x4xf32>
    %c32 = arith.constant 32 : index
    %c0_2 = arith.constant 0 : index
    %2 = vector.load %arg0[%c32, %c0_2] : memref<64x4xf32, #tpu.memory_space<vmem>>, vector<16x4xf32>
    %c48 = arith.constant 48 : index
    %c0_3 = arith.constant 0 : index
    %3 = vector.load %arg0[%c48, %c0_3] : memref<64x4xf32, #tpu.memory_space<vmem>>, vector<16x4xf32>
    %c0_4 = arith.constant 0 : index
    %c0_5 = arith.constant 0 : index
    %4 = vector.load %arg1[%c0_4, %c0_5] : memref<1032x128xf32, #tpu.memory_space<vmem>>, vector<8x24xf32>
    %cst = arith.constant dense<0.000000e+00> : vector<8x4xf32>
    %5 = tpu.matmul %4, %0, %cst {dimension_numbers = #tpu.dot_dimension_numbers<[1], [0], [0], [1], [0, 0, 1, 1], [], []>} : vector<8x24xf32>, vector<24x4xf32>, vector<8x4xf32> -> vector<8x4xf32>
    %c8 = arith.constant 8 : index
    %c0_6 = arith.constant 0 : index
    %6 = vector.load %arg1[%c8, %c0_6] : memref<1032x128xf32, #tpu.memory_space<vmem>>, vector<8x1xf32>
    %7 = vector.broadcast %6 : vector<8x1xf32> to vector<8x4xf32>
    %8 = arith.addf %5, %7 : vector<8x4xf32>
    %c16 = arith.constant 16 : index
    %c0_7 = arith.constant 0 : index
    %9 = vector.load %arg1[%c16, %c0_7] : memref<1032x128xf32, #tpu.memory_space<vmem>>, vector<8x8xf32>
    %cst_8 = arith.constant dense<0.000000e+00> : vector<8x4xf32>
    %10 = tpu.matmul %9, %8, %cst_8 {dimension_numbers = #tpu.dot_dimension_numbers<[1], [0], [0], [1], [0, 0, 1, 1], [], []>} : vector<8x8xf32>, vector<8x4xf32>, vector<8x4xf32> -> vector<8x4xf32>
    %c24_9 = arith.constant 24 : index
    %c0_10 = arith.constant 0 : index
    %11 = vector.load %arg1[%c24_9, %c0_10] : memref<1032x128xf32, #tpu.memory_space<vmem>>, vector<8x8xf32>
    %cst_11 = arith.constant dense<0.000000e+00> : vector<8x4xf32>
    %12 = tpu.matmul %11, %8, %cst_11 {dimension_numbers = #tpu.dot_dimension_numbers<[1], [0], [0], [1], [0, 0, 1, 1], [], []>} : vector<8x8xf32>, vector<8x4xf32>, vector<8x4xf32> -> vector<8x4xf32>
    %13 = tpu.concatenate %10, %8, %12 in 1 : vector<8x4xf32>, vector<8x4xf32>, vector<8x4xf32> -> vector<8x12xf32>
    %c32_12 = arith.constant 32 : index
    %c0_13 = arith.constant 0 : index
    %14 = vector.load %arg1[%c32_12, %c0_13] : memref<1032x128xf32, #tpu.memory_space<vmem>>, vector<12x32xf32>
    %cst_14 = arith.constant dense<0.000000e+00> : vector<8x32xf32>
    %15 = tpu.matmul %13, %14, %cst_14 {dimension_numbers = #tpu.dot_dimension_numbers<[1], [0], [0], [1], [0, 0, 1, 1], [], []>} : vector<8x12xf32>, vector<12x32xf32>, vector<8x32xf32> -> vector<8x32xf32>
    %c48_15 = arith.constant 48 : index
    %c0_16 = arith.constant 0 : index
    %16 = vector.load %arg1[%c48_15, %c0_16] : memref<1032x128xf32, #tpu.memory_space<vmem>>, vector<4x32xf32>
    %cst_17 = arith.constant dense<0.000000e+00> : vector<8x32xf32>
    %17 = tpu.matmul %1, %16, %cst_17 {dimension_numbers = #tpu.dot_dimension_numbers<[1], [0], [0], [1], [0, 0, 1, 1], [], []>} : vector<8x4xf32>, vector<4x32xf32>, vector<8x32xf32> -> vector<8x32xf32>
    %18 = arith.addf %15, %17 : vector<8x32xf32>
    %c56 = arith.constant 56 : index
    %c0_18 = arith.constant 0 : index
    %19 = vector.load %arg1[%c56, %c0_18] : memref<1032x128xf32, #tpu.memory_space<vmem>>, vector<8x32xf32>
    %20 = arith.addf %18, %19 : vector<8x32xf32>
    %c384 = arith.constant 384 : index
    %c0_19 = arith.constant 0 : index
    %21 = vector.load %arg1[%c384, %c0_19] : memref<1032x128xf32, #tpu.memory_space<vmem>>, vector<8x8xf32>
    %c64 = arith.constant 64 : index
    %c0_20 = arith.constant 0 : index
    %22 = vector.load %arg1[%c64, %c0_20] : memref<1032x128xf32, #tpu.memory_space<vmem>>, vector<32x32xf32>
    %cst_21 = arith.constant dense<0.000000e+00> : vector<8x32xf32>
    %23 = tpu.matmul %20, %22, %cst_21 {dimension_numbers = #tpu.dot_dimension_numbers<[1], [0], [0], [1], [0, 0, 1, 1], [], []>} : vector<8x32xf32>, vector<32x32xf32>, vector<8x32xf32> -> vector<8x32xf32>
    %c96 = arith.constant 96 : index
    %c0_22 = arith.constant 0 : index
    %24 = vector.load %arg1[%c96, %c0_22] : memref<1032x128xf32, #tpu.memory_space<vmem>>, vector<1x32xf32>
    %25 = vector.broadcast %24 : vector<1x32xf32> to vector<8x32xf32>
    %26 = arith.addf %23, %25 : vector<8x32xf32>
    %c104 = arith.constant 104 : index
    %c0_23 = arith.constant 0 : index
    %27 = vector.load %arg1[%c104, %c0_23] : memref<1032x128xf32, #tpu.memory_space<vmem>>, vector<32x32xf32>
    %cst_24 = arith.constant dense<0.000000e+00> : vector<8x32xf32>
    %28 = tpu.matmul %20, %27, %cst_24 {dimension_numbers = #tpu.dot_dimension_numbers<[1], [0], [0], [1], [0, 0, 1, 1], [], []>} : vector<8x32xf32>, vector<32x32xf32>, vector<8x32xf32> -> vector<8x32xf32>
    %c136 = arith.constant 136 : index
    %c0_25 = arith.constant 0 : index
    %29 = vector.load %arg1[%c136, %c0_25] : memref<1032x128xf32, #tpu.memory_space<vmem>>, vector<1x32xf32>
    %30 = vector.broadcast %29 : vector<1x32xf32> to vector<8x32xf32>
    %31 = arith.addf %28, %30 : vector<8x32xf32>
    %c144 = arith.constant 144 : index
    %c0_26 = arith.constant 0 : index
    %32 = vector.load %arg1[%c144, %c0_26] : memref<1032x128xf32, #tpu.memory_space<vmem>>, vector<32x32xf32>
    %cst_27 = arith.constant dense<0.000000e+00> : vector<8x32xf32>
    %33 = tpu.matmul %20, %32, %cst_27 {dimension_numbers = #tpu.dot_dimension_numbers<[1], [0], [0], [1], [0, 0, 1, 1], [], []>} : vector<8x32xf32>, vector<32x32xf32>, vector<8x32xf32> -> vector<8x32xf32>
    %c176 = arith.constant 176 : index
    %c0_28 = arith.constant 0 : index
    %34 = vector.load %arg1[%c176, %c0_28] : memref<1032x128xf32, #tpu.memory_space<vmem>>, vector<1x32xf32>
    %35 = vector.broadcast %34 : vector<1x32xf32> to vector<8x32xf32>
    %36 = arith.addf %33, %35 : vector<8x32xf32>
    %37 = vector.extract_strided_slice %26 {offsets = [0, 0], sizes = [8, 8], strides = [1, 1]} : vector<8x32xf32> to vector<8x8xf32>
    %38 = vector.extract_strided_slice %31 {offsets = [0, 0], sizes = [8, 8], strides = [1, 1]} : vector<8x32xf32> to vector<8x8xf32>
    %cst_29 = arith.constant dense<0.000000e+00> : vector<8x8xf32>
    %39 = tpu.matmul %37, %38, %cst_29 {dimension_numbers = #tpu.dot_dimension_numbers<[1], [1], [0], [0], [0, 0, 1, 0], [], []>} : vector<8x8xf32>, vector<8x8xf32>, vector<8x8xf32> -> vector<8x8xf32>
    %40 = arith.addf %39, %21 : vector<8x8xf32>
    %cst_30 = arith.constant dense<0xFF800000> : vector<8xf32>
    %41 = vector.multi_reduction <maximumf>, %40, %cst_30 [1] : vector<8x8xf32> to vector<8xf32>
    %42 = vector.shape_cast %41 : vector<8xf32> to vector<8x1xf32>
    %43 = vector.broadcast %42 : vector<8x1xf32> to vector<8x8xf32>
    %44 = arith.subf %40, %43 : vector<8x8xf32>
    %45 = math.exp %44 : vector<8x8xf32>
    %cst_31 = arith.constant dense<0.000000e+00> : vector<8xf32>
    %46 = vector.multi_reduction <add>, %45, %cst_31 [1] : vector<8x8xf32> to vector<8xf32>
    %47 = vector.shape_cast %46 : vector<8xf32> to vector<8x1xf32>
    %cst_32 = arith.constant 1.000000e+00 : f32
    %48 = vector.broadcast %cst_32 : f32 to vector<8x1xf32>
    %49 = arith.divf %48, %47 : vector<8x1xf32>
    %50 = vector.broadcast %49 : vector<8x1xf32> to vector<8x8xf32>
    %51 = arith.mulf %45, %50 : vector<8x8xf32>
    %52 = vector.extract_strided_slice %36 {offsets = [0, 0], sizes = [8, 8], strides = [1, 1]} : vector<8x32xf32> to vector<8x8xf32>
    %cst_33 = arith.constant dense<0.000000e+00> : vector<8x8xf32>
    %53 = tpu.matmul %51, %52, %cst_33 {dimension_numbers = #tpu.dot_dimension_numbers<[1], [0], [0], [1], [0, 0, 1, 1], [], []>} : vector<8x8xf32>, vector<8x8xf32>, vector<8x8xf32> -> vector<8x8xf32>
    %54 = vector.extract_strided_slice %26 {offsets = [0, 8], sizes = [8, 8], strides = [1, 1]} : vector<8x32xf32> to vector<8x8xf32>
    %55 = vector.extract_strided_slice %31 {offsets = [0, 8], sizes = [8, 8], strides = [1, 1]} : vector<8x32xf32> to vector<8x8xf32>
    %cst_34 = arith.constant dense<0.000000e+00> : vector<8x8xf32>
    %56 = tpu.matmul %54, %55, %cst_34 {dimension_numbers = #tpu.dot_dimension_numbers<[1], [1], [0], [0], [0, 0, 1, 0], [], []>} : vector<8x8xf32>, vector<8x8xf32>, vector<8x8xf32> -> vector<8x8xf32>
    %57 = arith.addf %56, %21 : vector<8x8xf32>
    %cst_35 = arith.constant dense<0xFF800000> : vector<8xf32>
    %58 = vector.multi_reduction <maximumf>, %57, %cst_35 [1] : vector<8x8xf32> to vector<8xf32>
    %59 = vector.shape_cast %58 : vector<8xf32> to vector<8x1xf32>
    %60 = vector.broadcast %59 : vector<8x1xf32> to vector<8x8xf32>
    %61 = arith.subf %57, %60 : vector<8x8xf32>
    %62 = math.exp %61 : vector<8x8xf32>
    %cst_36 = arith.constant dense<0.000000e+00> : vector<8xf32>
    %63 = vector.multi_reduction <add>, %62, %cst_36 [1] : vector<8x8xf32> to vector<8xf32>
    %64 = vector.shape_cast %63 : vector<8xf32> to vector<8x1xf32>
    %cst_37 = arith.constant 1.000000e+00 : f32
    %65 = vector.broadcast %cst_37 : f32 to vector<8x1xf32>
    %66 = arith.divf %65, %64 : vector<8x1xf32>
    %67 = vector.broadcast %66 : vector<8x1xf32> to vector<8x8xf32>
    %68 = arith.mulf %62, %67 : vector<8x8xf32>
    %69 = vector.extract_strided_slice %36 {offsets = [0, 8], sizes = [8, 8], strides = [1, 1]} : vector<8x32xf32> to vector<8x8xf32>
    %cst_38 = arith.constant dense<0.000000e+00> : vector<8x8xf32>
    %70 = tpu.matmul %68, %69, %cst_38 {dimension_numbers = #tpu.dot_dimension_numbers<[1], [0], [0], [1], [0, 0, 1, 1], [], []>} : vector<8x8xf32>, vector<8x8xf32>, vector<8x8xf32> -> vector<8x8xf32>
    %71 = vector.extract_strided_slice %26 {offsets = [0, 16], sizes = [8, 8], strides = [1, 1]} : vector<8x32xf32> to vector<8x8xf32>
    %72 = vector.extract_strided_slice %31 {offsets = [0, 16], sizes = [8, 8], strides = [1, 1]} : vector<8x32xf32> to vector<8x8xf32>
    %cst_39 = arith.constant dense<0.000000e+00> : vector<8x8xf32>
    %73 = tpu.matmul %71, %72, %cst_39 {dimension_numbers = #tpu.dot_dimension_numbers<[1], [1], [0], [0], [0, 0, 1, 0], [], []>} : vector<8x8xf32>, vector<8x8xf32>, vector<8x8xf32> -> vector<8x8xf32>
    %74 = arith.addf %73, %21 : vector<8x8xf32>
    %cst_40 = arith.constant dense<0xFF800000> : vector<8xf32>
    %75 = vector.multi_reduction <maximumf>, %74, %cst_40 [1] : vector<8x8xf32> to vector<8xf32>
    %76 = vector.shape_cast %75 : vector<8xf32> to vector<8x1xf32>
    %77 = vector.broadcast %76 : vector<8x1xf32> to vector<8x8xf32>
    %78 = arith.subf %74, %77 : vector<8x8xf32>
    %79 = math.exp %78 : vector<8x8xf32>
    %cst_41 = arith.constant dense<0.000000e+00> : vector<8xf32>
    %80 = vector.multi_reduction <add>, %79, %cst_41 [1] : vector<8x8xf32> to vector<8xf32>
    %81 = vector.shape_cast %80 : vector<8xf32> to vector<8x1xf32>
    %cst_42 = arith.constant 1.000000e+00 : f32
    %82 = vector.broadcast %cst_42 : f32 to vector<8x1xf32>
    %83 = arith.divf %82, %81 : vector<8x1xf32>
    %84 = vector.broadcast %83 : vector<8x1xf32> to vector<8x8xf32>
    %85 = arith.mulf %79, %84 : vector<8x8xf32>
    %86 = vector.extract_strided_slice %36 {offsets = [0, 16], sizes = [8, 8], strides = [1, 1]} : vector<8x32xf32> to vector<8x8xf32>
    %cst_43 = arith.constant dense<0.000000e+00> : vector<8x8xf32>
    %87 = tpu.matmul %85, %86, %cst_43 {dimension_numbers = #tpu.dot_dimension_numbers<[1], [0], [0], [1], [0, 0, 1, 1], [], []>} : vector<8x8xf32>, vector<8x8xf32>, vector<8x8xf32> -> vector<8x8xf32>
    %88 = vector.extract_strided_slice %26 {offsets = [0, 24], sizes = [8, 8], strides = [1, 1]} : vector<8x32xf32> to vector<8x8xf32>
    %89 = vector.extract_strided_slice %31 {offsets = [0, 24], sizes = [8, 8], strides = [1, 1]} : vector<8x32xf32> to vector<8x8xf32>
    %cst_44 = arith.constant dense<0.000000e+00> : vector<8x8xf32>
    %90 = tpu.matmul %88, %89, %cst_44 {dimension_numbers = #tpu.dot_dimension_numbers<[1], [1], [0], [0], [0, 0, 1, 0], [], []>} : vector<8x8xf32>, vector<8x8xf32>, vector<8x8xf32> -> vector<8x8xf32>
    %91 = arith.addf %90, %21 : vector<8x8xf32>
    %cst_45 = arith.constant dense<0xFF800000> : vector<8xf32>
    %92 = vector.multi_reduction <maximumf>, %91, %cst_45 [1] : vector<8x8xf32> to vector<8xf32>
    %93 = vector.shape_cast %92 : vector<8xf32> to vector<8x1xf32>
    %94 = vector.broadcast %93 : vector<8x1xf32> to vector<8x8xf32>
    %95 = arith.subf %91, %94 : vector<8x8xf32>
    %96 = math.exp %95 : vector<8x8xf32>
    %cst_46 = arith.constant dense<0.000000e+00> : vector<8xf32>
    %97 = vector.multi_reduction <add>, %96, %cst_46 [1] : vector<8x8xf32> to vector<8xf32>
    %98 = vector.shape_cast %97 : vector<8xf32> to vector<8x1xf32>
    %cst_47 = arith.constant 1.000000e+00 : f32
    %99 = vector.broadcast %cst_47 : f32 to vector<8x1xf32>
    %100 = arith.divf %99, %98 : vector<8x1xf32>
    %101 = vector.broadcast %100 : vector<8x1xf32> to vector<8x8xf32>
    %102 = arith.mulf %96, %101 : vector<8x8xf32>
    %103 = vector.extract_strided_slice %36 {offsets = [0, 24], sizes = [8, 8], strides = [1, 1]} : vector<8x32xf32> to vector<8x8xf32>
    %cst_48 = arith.constant dense<0.000000e+00> : vector<8x8xf32>
    %104 = tpu.matmul %102, %103, %cst_48 {dimension_numbers = #tpu.dot_dimension_numbers<[1], [0], [0], [1], [0, 0, 1, 1], [], []>} : vector<8x8xf32>, vector<8x8xf32>, vector<8x8xf32> -> vector<8x8xf32>
    %105 = tpu.concatenate %53, %70, %87, %104 in 1 : vector<8x8xf32>, vector<8x8xf32>, vector<8x8xf32>, vector<8x8xf32> -> vector<8x32xf32>
    %c184 = arith.constant 184 : index
    %c0_49 = arith.constant 0 : index
    %106 = vector.load %arg1[%c184, %c0_49] : memref<1032x128xf32, #tpu.memory_space<vmem>>, vector<32x32xf32>
    %cst_50 = arith.constant dense<0.000000e+00> : vector<8x32xf32>
    %107 = tpu.matmul %105, %106, %cst_50 {dimension_numbers = #tpu.dot_dimension_numbers<[1], [0], [0], [1], [0, 0, 1, 1], [], []>} : vector<8x32xf32>, vector<32x32xf32>, vector<8x32xf32> -> vector<8x32xf32>
    %c216 = arith.constant 216 : index
    %c0_51 = arith.constant 0 : index
    %108 = vector.load %arg1[%c216, %c0_51] : memref<1032x128xf32, #tpu.memory_space<vmem>>, vector<1x32xf32>
    %109 = vector.broadcast %108 : vector<1x32xf32> to vector<8x32xf32>
    %110 = arith.addf %107, %109 : vector<8x32xf32>
    %111 = arith.addf %20, %110 : vector<8x32xf32>
    %c224 = arith.constant 224 : index
    %c0_52 = arith.constant 0 : index
    %112 = vector.load %arg1[%c224, %c0_52] : memref<1032x128xf32, #tpu.memory_space<vmem>>, vector<1x32xf32>
    %c232 = arith.constant 232 : index
    %c0_53 = arith.constant 0 : index
    %113 = vector.load %arg1[%c232, %c0_53] : memref<1032x128xf32, #tpu.memory_space<vmem>>, vector<1x32xf32>
    %cst_54 = arith.constant dense<0.000000e+00> : vector<8xf32>
    %114 = vector.multi_reduction <add>, %111, %cst_54 [1] : vector<8x32xf32> to vector<8xf32>
    %115 = vector.shape_cast %114 : vector<8xf32> to vector<8x1xf32>
    %cst_55 = arith.constant 3.200000e+01 : f32
    %116 = vector.broadcast %cst_55 : f32 to vector<8x1xf32>
    %117 = arith.divf %115, %116 : vector<8x1xf32>
    %118 = vector.broadcast %117 : vector<8x1xf32> to vector<8x32xf32>
    %119 = arith.subf %111, %118 : vector<8x32xf32>
    %120 = arith.mulf %119, %119 : vector<8x32xf32>
    %cst_56 = arith.constant dense<0.000000e+00> : vector<8xf32>
    %121 = vector.multi_reduction <add>, %120, %cst_56 [1] : vector<8x32xf32> to vector<8xf32>
    %122 = vector.shape_cast %121 : vector<8xf32> to vector<8x1xf32>
    %cst_57 = arith.constant 3.200000e+01 : f32
    %123 = vector.broadcast %cst_57 : f32 to vector<8x1xf32>
    %124 = arith.divf %122, %123 : vector<8x1xf32>
    %cst_58 = arith.constant 9.99999974E-6 : f32
    %125 = vector.broadcast %cst_58 : f32 to vector<8x1xf32>
    %126 = arith.addf %124, %125 : vector<8x1xf32>
    %127 = math.rsqrt %126 : vector<8x1xf32>
    %128 = vector.broadcast %127 : vector<8x1xf32> to vector<8x32xf32>
    %129 = arith.mulf %119, %128 : vector<8x32xf32>
    %130 = vector.broadcast %112 : vector<1x32xf32> to vector<8x32xf32>
    %131 = arith.mulf %129, %130 : vector<8x32xf32>
    %132 = vector.broadcast %113 : vector<1x32xf32> to vector<8x32xf32>
    %133 = arith.addf %131, %132 : vector<8x32xf32>
    %c240 = arith.constant 240 : index
    %c0_59 = arith.constant 0 : index
    %134 = vector.load %arg1[%c240, %c0_59] : memref<1032x128xf32, #tpu.memory_space<vmem>>, vector<32x64xf32>
    %cst_60 = arith.constant dense<0.000000e+00> : vector<8x64xf32>
    %135 = tpu.matmul %133, %134, %cst_60 {dimension_numbers = #tpu.dot_dimension_numbers<[1], [0], [0], [1], [0, 0, 1, 1], [], []>} : vector<8x32xf32>, vector<32x64xf32>, vector<8x64xf32> -> vector<8x64xf32>
    %c272 = arith.constant 272 : index
    %c0_61 = arith.constant 0 : index
    %136 = vector.load %arg1[%c272, %c0_61] : memref<1032x128xf32, #tpu.memory_space<vmem>>, vector<1x64xf32>
    %137 = vector.broadcast %136 : vector<1x64xf32> to vector<8x64xf32>
    %138 = arith.addf %135, %137 : vector<8x64xf32>
    %cst_62 = arith.constant 5.000000e-01 : f32
    %139 = vector.broadcast %cst_62 : f32 to vector<8x64xf32>
    %140 = arith.mulf %139, %138 : vector<8x64xf32>
    %141 = arith.mulf %138, %138 : vector<8x64xf32>
    %142 = arith.mulf %141, %138 : vector<8x64xf32>
    %cst_63 = arith.constant 4.471500e-02 : f32
    %143 = vector.broadcast %cst_63 : f32 to vector<8x64xf32>
    %144 = arith.mulf %143, %142 : vector<8x64xf32>
    %145 = arith.addf %138, %144 : vector<8x64xf32>
    %cst_64 = arith.constant 0.797884583 : f32
    %146 = vector.broadcast %cst_64 : f32 to vector<8x64xf32>
    %147 = arith.mulf %146, %145 : vector<8x64xf32>
    %148 = math.tanh %147 : vector<8x64xf32>
    %cst_65 = arith.constant 1.000000e+00 : f32
    %149 = vector.broadcast %cst_65 : f32 to vector<8x64xf32>
    %150 = arith.addf %149, %148 : vector<8x64xf32>
    %151 = arith.mulf %140, %150 : vector<8x64xf32>
    %c280 = arith.constant 280 : index
    %c0_66 = arith.constant 0 : index
    %152 = vector.load %arg1[%c280, %c0_66] : memref<1032x128xf32, #tpu.memory_space<vmem>>, vector<64x32xf32>
    %cst_67 = arith.constant dense<0.000000e+00> : vector<8x32xf32>
    %153 = tpu.matmul %151, %152, %cst_67 {dimension_numbers = #tpu.dot_dimension_numbers<[1], [0], [0], [1], [0, 0, 1, 1], [], []>} : vector<8x64xf32>, vector<64x32xf32>, vector<8x32xf32> -> vector<8x32xf32>
    %c344 = arith.constant 344 : index
    %c0_68 = arith.constant 0 : index
    %154 = vector.load %arg1[%c344, %c0_68] : memref<1032x128xf32, #tpu.memory_space<vmem>>, vector<1x32xf32>
    %155 = vector.broadcast %154 : vector<1x32xf32> to vector<8x32xf32>
    %156 = arith.addf %153, %155 : vector<8x32xf32>
    %157 = arith.addf %133, %156 : vector<8x32xf32>
    %c352 = arith.constant 352 : index
    %c0_69 = arith.constant 0 : index
    %158 = vector.load %arg1[%c352, %c0_69] : memref<1032x128xf32, #tpu.memory_space<vmem>>, vector<1x32xf32>
    %c360 = arith.constant 360 : index
    %c0_70 = arith.constant 0 : index
    %159 = vector.load %arg1[%c360, %c0_70] : memref<1032x128xf32, #tpu.memory_space<vmem>>, vector<1x32xf32>
    %cst_71 = arith.constant dense<0.000000e+00> : vector<8xf32>
    %160 = vector.multi_reduction <add>, %157, %cst_71 [1] : vector<8x32xf32> to vector<8xf32>
    %161 = vector.shape_cast %160 : vector<8xf32> to vector<8x1xf32>
    %cst_72 = arith.constant 3.200000e+01 : f32
    %162 = vector.broadcast %cst_72 : f32 to vector<8x1xf32>
    %163 = arith.divf %161, %162 : vector<8x1xf32>
    %164 = vector.broadcast %163 : vector<8x1xf32> to vector<8x32xf32>
    %165 = arith.subf %157, %164 : vector<8x32xf32>
    %166 = arith.mulf %165, %165 : vector<8x32xf32>
    %cst_73 = arith.constant dense<0.000000e+00> : vector<8xf32>
    %167 = vector.multi_reduction <add>, %166, %cst_73 [1] : vector<8x32xf32> to vector<8xf32>
    %168 = vector.shape_cast %167 : vector<8xf32> to vector<8x1xf32>
    %cst_74 = arith.constant 3.200000e+01 : f32
    %169 = vector.broadcast %cst_74 : f32 to vector<8x1xf32>
    %170 = arith.divf %168, %169 : vector<8x1xf32>
    %cst_75 = arith.constant 9.99999974E-6 : f32
    %171 = vector.broadcast %cst_75 : f32 to vector<8x1xf32>
    %172 = arith.addf %170, %171 : vector<8x1xf32>
    %173 = math.rsqrt %172 : vector<8x1xf32>
    %174 = vector.broadcast %173 : vector<8x1xf32> to vector<8x32xf32>
    %175 = arith.mulf %165, %174 : vector<8x32xf32>
    %176 = vector.broadcast %158 : vector<1x32xf32> to vector<8x32xf32>
    %177 = arith.mulf %175, %176 : vector<8x32xf32>
    %178 = vector.broadcast %159 : vector<1x32xf32> to vector<8x32xf32>
    %179 = arith.addf %177, %178 : vector<8x32xf32>
    %c368 = arith.constant 368 : index
    %c0_76 = arith.constant 0 : index
    %180 = vector.load %arg1[%c368, %c0_76] : memref<1032x128xf32, #tpu.memory_space<vmem>>, vector<1x32xf32>
    %c376 = arith.constant 376 : index
    %c0_77 = arith.constant 0 : index
    %181 = vector.load %arg1[%c376, %c0_77] : memref<1032x128xf32, #tpu.memory_space<vmem>>, vector<1x32xf32>
    %cst_78 = arith.constant dense<0.000000e+00> : vector<8xf32>
    %182 = vector.multi_reduction <add>, %179, %cst_78 [1] : vector<8x32xf32> to vector<8xf32>
    %183 = vector.shape_cast %182 : vector<8xf32> to vector<8x1xf32>
    %cst_79 = arith.constant 3.200000e+01 : f32
    %184 = vector.broadcast %cst_79 : f32 to vector<8x1xf32>
    %185 = arith.divf %183, %184 : vector<8x1xf32>
    %186 = vector.broadcast %185 : vector<8x1xf32> to vector<8x32xf32>
    %187 = arith.subf %179, %186 : vector<8x32xf32>
    %188 = arith.mulf %187, %187 : vector<8x32xf32>
    %cst_80 = arith.constant dense<0.000000e+00> : vector<8xf32>
    %189 = vector.multi_reduction <add>, %188, %cst_80 [1] : vector<8x32xf32> to vector<8xf32>
    %190 = vector.shape_cast %189 : vector<8xf32> to vector<8x1xf32>
    %cst_81 = arith.constant 3.200000e+01 : f32
    %191 = vector.broadcast %cst_81 : f32 to vector<8x1xf32>
    %192 = arith.divf %190, %191 : vector<8x1xf32>
    %cst_82 = arith.constant 9.99999974E-6 : f32
    %193 = vector.broadcast %cst_82 : f32 to vector<8x1xf32>
    %194 = arith.addf %192, %193 : vector<8x1xf32>
    %195 = math.rsqrt %194 : vector<8x1xf32>
    %196 = vector.broadcast %195 : vector<8x1xf32> to vector<8x32xf32>
    %197 = arith.mulf %187, %196 : vector<8x32xf32>
    %198 = vector.broadcast %180 : vector<1x32xf32> to vector<8x32xf32>
    %199 = arith.mulf %197, %198 : vector<8x32xf32>
    %200 = vector.broadcast %181 : vector<1x32xf32> to vector<8x32xf32>
    %201 = arith.addf %199, %200 : vector<8x32xf32>
    %c392 = arith.constant 392 : index
    %c0_83 = arith.constant 0 : index
    %202 = vector.load %arg1[%c392, %c0_83] : memref<1032x128xf32, #tpu.memory_space<vmem>>, vector<16x16xf32>
    %cst_84 = arith.constant dense<0.000000e+00> : vector<16x4xf32>
    %203 = tpu.matmul %202, %2, %cst_84 {dimension_numbers = #tpu.dot_dimension_numbers<[1], [0], [0], [1], [0, 0, 1, 1], [], []>} : vector<16x16xf32>, vector<16x4xf32>, vector<16x4xf32> -> vector<16x4xf32>
    %c408 = arith.constant 408 : index
    %c0_85 = arith.constant 0 : index
    %204 = vector.load %arg1[%c408, %c0_85] : memref<1032x128xf32, #tpu.memory_space<vmem>>, vector<16x16xf32>
    %cst_86 = arith.constant dense<0.000000e+00> : vector<16x4xf32>
    %205 = tpu.matmul %204, %2, %cst_86 {dimension_numbers = #tpu.dot_dimension_numbers<[1], [0], [0], [1], [0, 0, 1, 1], [], []>} : vector<16x16xf32>, vector<16x4xf32>, vector<16x4xf32> -> vector<16x4xf32>
    %206 = tpu.concatenate %203, %2, %205 in 1 : vector<16x4xf32>, vector<16x4xf32>, vector<16x4xf32> -> vector<16x12xf32>
    %c424 = arith.constant 424 : index
    %c0_87 = arith.constant 0 : index
    %207 = vector.load %arg1[%c424, %c0_87] : memref<1032x128xf32, #tpu.memory_space<vmem>>, vector<12x32xf32>
    %cst_88 = arith.constant dense<0.000000e+00> : vector<16x32xf32>
    %208 = tpu.matmul %206, %207, %cst_88 {dimension_numbers = #tpu.dot_dimension_numbers<[1], [0], [0], [1], [0, 0, 1, 1], [], []>} : vector<16x12xf32>, vector<12x32xf32>, vector<16x32xf32> -> vector<16x32xf32>
    %c440 = arith.constant 440 : index
    %c0_89 = arith.constant 0 : index
    %209 = vector.load %arg1[%c440, %c0_89] : memref<1032x128xf32, #tpu.memory_space<vmem>>, vector<4x32xf32>
    %cst_90 = arith.constant dense<0.000000e+00> : vector<16x32xf32>
    %210 = tpu.matmul %3, %209, %cst_90 {dimension_numbers = #tpu.dot_dimension_numbers<[1], [0], [0], [1], [0, 0, 1, 1], [], []>} : vector<16x4xf32>, vector<4x32xf32>, vector<16x32xf32> -> vector<16x32xf32>
    %211 = arith.addf %208, %210 : vector<16x32xf32>
    %c448 = arith.constant 448 : index
    %c0_91 = arith.constant 0 : index
    %212 = vector.load %arg1[%c448, %c0_91] : memref<1032x128xf32, #tpu.memory_space<vmem>>, vector<16x32xf32>
    %213 = arith.addf %211, %212 : vector<16x32xf32>
    %c960 = arith.constant 960 : index
    %c0_92 = arith.constant 0 : index
    %214 = vector.load %arg1[%c960, %c0_92] : memref<1032x128xf32, #tpu.memory_space<vmem>>, vector<16x16xf32>
    %c976 = arith.constant 976 : index
    %c0_93 = arith.constant 0 : index
    %215 = vector.load %arg1[%c976, %c0_93] : memref<1032x128xf32, #tpu.memory_space<vmem>>, vector<16x8xf32>
    %c464 = arith.constant 464 : index
    %c0_94 = arith.constant 0 : index
    %216 = vector.load %arg1[%c464, %c0_94] : memref<1032x128xf32, #tpu.memory_space<vmem>>, vector<32x32xf32>
    %cst_95 = arith.constant dense<0.000000e+00> : vector<16x32xf32>
    %217 = tpu.matmul %213, %216, %cst_95 {dimension_numbers = #tpu.dot_dimension_numbers<[1], [0], [0], [1], [0, 0, 1, 1], [], []>} : vector<16x32xf32>, vector<32x32xf32>, vector<16x32xf32> -> vector<16x32xf32>
    %c496 = arith.constant 496 : index
    %c0_96 = arith.constant 0 : index
    %218 = vector.load %arg1[%c496, %c0_96] : memref<1032x128xf32, #tpu.memory_space<vmem>>, vector<1x32xf32>
    %219 = vector.broadcast %218 : vector<1x32xf32> to vector<16x32xf32>
    %220 = arith.addf %217, %219 : vector<16x32xf32>
    %c504 = arith.constant 504 : index
    %c0_97 = arith.constant 0 : index
    %221 = vector.load %arg1[%c504, %c0_97] : memref<1032x128xf32, #tpu.memory_space<vmem>>, vector<32x32xf32>
    %cst_98 = arith.constant dense<0.000000e+00> : vector<16x32xf32>
    %222 = tpu.matmul %213, %221, %cst_98 {dimension_numbers = #tpu.dot_dimension_numbers<[1], [0], [0], [1], [0, 0, 1, 1], [], []>} : vector<16x32xf32>, vector<32x32xf32>, vector<16x32xf32> -> vector<16x32xf32>
    %c536 = arith.constant 536 : index
    %c0_99 = arith.constant 0 : index
    %223 = vector.load %arg1[%c536, %c0_99] : memref<1032x128xf32, #tpu.memory_space<vmem>>, vector<1x32xf32>
    %224 = vector.broadcast %223 : vector<1x32xf32> to vector<16x32xf32>
    %225 = arith.addf %222, %224 : vector<16x32xf32>
    %c544 = arith.constant 544 : index
    %c0_100 = arith.constant 0 : index
    %226 = vector.load %arg1[%c544, %c0_100] : memref<1032x128xf32, #tpu.memory_space<vmem>>, vector<32x32xf32>
    %cst_101 = arith.constant dense<0.000000e+00> : vector<16x32xf32>
    %227 = tpu.matmul %213, %226, %cst_101 {dimension_numbers = #tpu.dot_dimension_numbers<[1], [0], [0], [1], [0, 0, 1, 1], [], []>} : vector<16x32xf32>, vector<32x32xf32>, vector<16x32xf32> -> vector<16x32xf32>
    %c576 = arith.constant 576 : index
    %c0_102 = arith.constant 0 : index
    %228 = vector.load %arg1[%c576, %c0_102] : memref<1032x128xf32, #tpu.memory_space<vmem>>, vector<1x32xf32>
    %229 = vector.broadcast %228 : vector<1x32xf32> to vector<16x32xf32>
    %230 = arith.addf %227, %229 : vector<16x32xf32>
    %231 = vector.extract_strided_slice %220 {offsets = [0, 0], sizes = [16, 8], strides = [1, 1]} : vector<16x32xf32> to vector<16x8xf32>
    %232 = vector.extract_strided_slice %225 {offsets = [0, 0], sizes = [16, 8], strides = [1, 1]} : vector<16x32xf32> to vector<16x8xf32>
    %cst_103 = arith.constant dense<0.000000e+00> : vector<16x16xf32>
    %233 = tpu.matmul %231, %232, %cst_103 {dimension_numbers = #tpu.dot_dimension_numbers<[1], [1], [0], [0], [0, 0, 1, 0], [], []>} : vector<16x8xf32>, vector<16x8xf32>, vector<16x16xf32> -> vector<16x16xf32>
    %234 = arith.addf %233, %214 : vector<16x16xf32>
    %cst_104 = arith.constant dense<0xFF800000> : vector<16xf32>
    %235 = vector.multi_reduction <maximumf>, %234, %cst_104 [1] : vector<16x16xf32> to vector<16xf32>
    %236 = vector.shape_cast %235 : vector<16xf32> to vector<16x1xf32>
    %237 = vector.broadcast %236 : vector<16x1xf32> to vector<16x16xf32>
    %238 = arith.subf %234, %237 : vector<16x16xf32>
    %239 = math.exp %238 : vector<16x16xf32>
    %cst_105 = arith.constant dense<0.000000e+00> : vector<16xf32>
    %240 = vector.multi_reduction <add>, %239, %cst_105 [1] : vector<16x16xf32> to vector<16xf32>
    %241 = vector.shape_cast %240 : vector<16xf32> to vector<16x1xf32>
    %cst_106 = arith.constant 1.000000e+00 : f32
    %242 = vector.broadcast %cst_106 : f32 to vector<16x1xf32>
    %243 = arith.divf %242, %241 : vector<16x1xf32>
    %244 = vector.broadcast %243 : vector<16x1xf32> to vector<16x16xf32>
    %245 = arith.mulf %239, %244 : vector<16x16xf32>
    %246 = vector.extract_strided_slice %230 {offsets = [0, 0], sizes = [16, 8], strides = [1, 1]} : vector<16x32xf32> to vector<16x8xf32>
    %cst_107 = arith.constant dense<0.000000e+00> : vector<16x8xf32>
    %247 = tpu.matmul %245, %246, %cst_107 {dimension_numbers = #tpu.dot_dimension_numbers<[1], [0], [0], [1], [0, 0, 1, 1], [], []>} : vector<16x16xf32>, vector<16x8xf32>, vector<16x8xf32> -> vector<16x8xf32>
    %248 = vector.extract_strided_slice %220 {offsets = [0, 8], sizes = [16, 8], strides = [1, 1]} : vector<16x32xf32> to vector<16x8xf32>
    %249 = vector.extract_strided_slice %225 {offsets = [0, 8], sizes = [16, 8], strides = [1, 1]} : vector<16x32xf32> to vector<16x8xf32>
    %cst_108 = arith.constant dense<0.000000e+00> : vector<16x16xf32>
    %250 = tpu.matmul %248, %249, %cst_108 {dimension_numbers = #tpu.dot_dimension_numbers<[1], [1], [0], [0], [0, 0, 1, 0], [], []>} : vector<16x8xf32>, vector<16x8xf32>, vector<16x16xf32> -> vector<16x16xf32>
    %251 = arith.addf %250, %214 : vector<16x16xf32>
    %cst_109 = arith.constant dense<0xFF800000> : vector<16xf32>
    %252 = vector.multi_reduction <maximumf>, %251, %cst_109 [1] : vector<16x16xf32> to vector<16xf32>
    %253 = vector.shape_cast %252 : vector<16xf32> to vector<16x1xf32>
    %254 = vector.broadcast %253 : vector<16x1xf32> to vector<16x16xf32>
    %255 = arith.subf %251, %254 : vector<16x16xf32>
    %256 = math.exp %255 : vector<16x16xf32>
    %cst_110 = arith.constant dense<0.000000e+00> : vector<16xf32>
    %257 = vector.multi_reduction <add>, %256, %cst_110 [1] : vector<16x16xf32> to vector<16xf32>
    %258 = vector.shape_cast %257 : vector<16xf32> to vector<16x1xf32>
    %cst_111 = arith.constant 1.000000e+00 : f32
    %259 = vector.broadcast %cst_111 : f32 to vector<16x1xf32>
    %260 = arith.divf %259, %258 : vector<16x1xf32>
    %261 = vector.broadcast %260 : vector<16x1xf32> to vector<16x16xf32>
    %262 = arith.mulf %256, %261 : vector<16x16xf32>
    %263 = vector.extract_strided_slice %230 {offsets = [0, 8], sizes = [16, 8], strides = [1, 1]} : vector<16x32xf32> to vector<16x8xf32>
    %cst_112 = arith.constant dense<0.000000e+00> : vector<16x8xf32>
    %264 = tpu.matmul %262, %263, %cst_112 {dimension_numbers = #tpu.dot_dimension_numbers<[1], [0], [0], [1], [0, 0, 1, 1], [], []>} : vector<16x16xf32>, vector<16x8xf32>, vector<16x8xf32> -> vector<16x8xf32>
    %265 = vector.extract_strided_slice %220 {offsets = [0, 16], sizes = [16, 8], strides = [1, 1]} : vector<16x32xf32> to vector<16x8xf32>
    %266 = vector.extract_strided_slice %225 {offsets = [0, 16], sizes = [16, 8], strides = [1, 1]} : vector<16x32xf32> to vector<16x8xf32>
    %cst_113 = arith.constant dense<0.000000e+00> : vector<16x16xf32>
    %267 = tpu.matmul %265, %266, %cst_113 {dimension_numbers = #tpu.dot_dimension_numbers<[1], [1], [0], [0], [0, 0, 1, 0], [], []>} : vector<16x8xf32>, vector<16x8xf32>, vector<16x16xf32> -> vector<16x16xf32>
    %268 = arith.addf %267, %214 : vector<16x16xf32>
    %cst_114 = arith.constant dense<0xFF800000> : vector<16xf32>
    %269 = vector.multi_reduction <maximumf>, %268, %cst_114 [1] : vector<16x16xf32> to vector<16xf32>
    %270 = vector.shape_cast %269 : vector<16xf32> to vector<16x1xf32>
    %271 = vector.broadcast %270 : vector<16x1xf32> to vector<16x16xf32>
    %272 = arith.subf %268, %271 : vector<16x16xf32>
    %273 = math.exp %272 : vector<16x16xf32>
    %cst_115 = arith.constant dense<0.000000e+00> : vector<16xf32>
    %274 = vector.multi_reduction <add>, %273, %cst_115 [1] : vector<16x16xf32> to vector<16xf32>
    %275 = vector.shape_cast %274 : vector<16xf32> to vector<16x1xf32>
    %cst_116 = arith.constant 1.000000e+00 : f32
    %276 = vector.broadcast %cst_116 : f32 to vector<16x1xf32>
    %277 = arith.divf %276, %275 : vector<16x1xf32>
    %278 = vector.broadcast %277 : vector<16x1xf32> to vector<16x16xf32>
    %279 = arith.mulf %273, %278 : vector<16x16xf32>
    %280 = vector.extract_strided_slice %230 {offsets = [0, 16], sizes = [16, 8], strides = [1, 1]} : vector<16x32xf32> to vector<16x8xf32>
    %cst_117 = arith.constant dense<0.000000e+00> : vector<16x8xf32>
    %281 = tpu.matmul %279, %280, %cst_117 {dimension_numbers = #tpu.dot_dimension_numbers<[1], [0], [0], [1], [0, 0, 1, 1], [], []>} : vector<16x16xf32>, vector<16x8xf32>, vector<16x8xf32> -> vector<16x8xf32>
    %282 = vector.extract_strided_slice %220 {offsets = [0, 24], sizes = [16, 8], strides = [1, 1]} : vector<16x32xf32> to vector<16x8xf32>
    %283 = vector.extract_strided_slice %225 {offsets = [0, 24], sizes = [16, 8], strides = [1, 1]} : vector<16x32xf32> to vector<16x8xf32>
    %cst_118 = arith.constant dense<0.000000e+00> : vector<16x16xf32>
    %284 = tpu.matmul %282, %283, %cst_118 {dimension_numbers = #tpu.dot_dimension_numbers<[1], [1], [0], [0], [0, 0, 1, 0], [], []>} : vector<16x8xf32>, vector<16x8xf32>, vector<16x16xf32> -> vector<16x16xf32>
    %285 = arith.addf %284, %214 : vector<16x16xf32>
    %cst_119 = arith.constant dense<0xFF800000> : vector<16xf32>
    %286 = vector.multi_reduction <maximumf>, %285, %cst_119 [1] : vector<16x16xf32> to vector<16xf32>
    %287 = vector.shape_cast %286 : vector<16xf32> to vector<16x1xf32>
    %288 = vector.broadcast %287 : vector<16x1xf32> to vector<16x16xf32>
    %289 = arith.subf %285, %288 : vector<16x16xf32>
    %290 = math.exp %289 : vector<16x16xf32>
    %cst_120 = arith.constant dense<0.000000e+00> : vector<16xf32>
    %291 = vector.multi_reduction <add>, %290, %cst_120 [1] : vector<16x16xf32> to vector<16xf32>
    %292 = vector.shape_cast %291 : vector<16xf32> to vector<16x1xf32>
    %cst_121 = arith.constant 1.000000e+00 : f32
    %293 = vector.broadcast %cst_121 : f32 to vector<16x1xf32>
    %294 = arith.divf %293, %292 : vector<16x1xf32>
    %295 = vector.broadcast %294 : vector<16x1xf32> to vector<16x16xf32>
    %296 = arith.mulf %290, %295 : vector<16x16xf32>
    %297 = vector.extract_strided_slice %230 {offsets = [0, 24], sizes = [16, 8], strides = [1, 1]} : vector<16x32xf32> to vector<16x8xf32>
    %cst_122 = arith.constant dense<0.000000e+00> : vector<16x8xf32>
    %298 = tpu.matmul %296, %297, %cst_122 {dimension_numbers = #tpu.dot_dimension_numbers<[1], [0], [0], [1], [0, 0, 1, 1], [], []>} : vector<16x16xf32>, vector<16x8xf32>, vector<16x8xf32> -> vector<16x8xf32>
    %299 = tpu.concatenate %247, %264, %281, %298 in 1 : vector<16x8xf32>, vector<16x8xf32>, vector<16x8xf32>, vector<16x8xf32> -> vector<16x32xf32>
    %c584 = arith.constant 584 : index
    %c0_123 = arith.constant 0 : index
    %300 = vector.load %arg1[%c584, %c0_123] : memref<1032x128xf32, #tpu.memory_space<vmem>>, vector<32x32xf32>
    %cst_124 = arith.constant dense<0.000000e+00> : vector<16x32xf32>
    %301 = tpu.matmul %299, %300, %cst_124 {dimension_numbers = #tpu.dot_dimension_numbers<[1], [0], [0], [1], [0, 0, 1, 1], [], []>} : vector<16x32xf32>, vector<32x32xf32>, vector<16x32xf32> -> vector<16x32xf32>
    %c616 = arith.constant 616 : index
    %c0_125 = arith.constant 0 : index
    %302 = vector.load %arg1[%c616, %c0_125] : memref<1032x128xf32, #tpu.memory_space<vmem>>, vector<1x32xf32>
    %303 = vector.broadcast %302 : vector<1x32xf32> to vector<16x32xf32>
    %304 = arith.addf %301, %303 : vector<16x32xf32>
    %305 = arith.addf %213, %304 : vector<16x32xf32>
    %c624 = arith.constant 624 : index
    %c0_126 = arith.constant 0 : index
    %306 = vector.load %arg1[%c624, %c0_126] : memref<1032x128xf32, #tpu.memory_space<vmem>>, vector<1x32xf32>
    %c632 = arith.constant 632 : index
    %c0_127 = arith.constant 0 : index
    %307 = vector.load %arg1[%c632, %c0_127] : memref<1032x128xf32, #tpu.memory_space<vmem>>, vector<1x32xf32>
    %cst_128 = arith.constant dense<0.000000e+00> : vector<16xf32>
    %308 = vector.multi_reduction <add>, %305, %cst_128 [1] : vector<16x32xf32> to vector<16xf32>
    %309 = vector.shape_cast %308 : vector<16xf32> to vector<16x1xf32>
    %cst_129 = arith.constant 3.200000e+01 : f32
    %310 = vector.broadcast %cst_129 : f32 to vector<16x1xf32>
    %311 = arith.divf %309, %310 : vector<16x1xf32>
    %312 = vector.broadcast %311 : vector<16x1xf32> to vector<16x32xf32>
    %313 = arith.subf %305, %312 : vector<16x32xf32>
    %314 = arith.mulf %313, %313 : vector<16x32xf32>
    %cst_130 = arith.constant dense<0.000000e+00> : vector<16xf32>
    %315 = vector.multi_reduction <add>, %314, %cst_130 [1] : vector<16x32xf32> to vector<16xf32>
    %316 = vector.shape_cast %315 : vector<16xf32> to vector<16x1xf32>
    %cst_131 = arith.constant 3.200000e+01 : f32
    %317 = vector.broadcast %cst_131 : f32 to vector<16x1xf32>
    %318 = arith.divf %316, %317 : vector<16x1xf32>
    %cst_132 = arith.constant 9.99999974E-6 : f32
    %319 = vector.broadcast %cst_132 : f32 to vector<16x1xf32>
    %320 = arith.addf %318, %319 : vector<16x1xf32>
    %321 = math.rsqrt %320 : vector<16x1xf32>
    %322 = vector.broadcast %321 : vector<16x1xf32> to vector<16x32xf32>
    %323 = arith.mulf %313, %322 : vector<16x32xf32>
    %324 = vector.broadcast %306 : vector<1x32xf32> to vector<16x32xf32>
    %325 = arith.mulf %323, %324 : vector<16x32xf32>
    %326 = vector.broadcast %307 : vector<1x32xf32> to vector<16x32xf32>
    %327 = arith.addf %325, %326 : vector<16x32xf32>
    %c640 = arith.constant 640 : index
    %c0_133 = arith.constant 0 : index
    %328 = vector.load %arg1[%c640, %c0_133] : memref<1032x128xf32, #tpu.memory_space<vmem>>, vector<32x32xf32>
    %cst_134 = arith.constant dense<0.000000e+00> : vector<16x32xf32>
    %329 = tpu.matmul %327, %328, %cst_134 {dimension_numbers = #tpu.dot_dimension_numbers<[1], [0], [0], [1], [0, 0, 1, 1], [], []>} : vector<16x32xf32>, vector<32x32xf32>, vector<16x32xf32> -> vector<16x32xf32>
    %c672 = arith.constant 672 : index
    %c0_135 = arith.constant 0 : index
    %330 = vector.load %arg1[%c672, %c0_135] : memref<1032x128xf32, #tpu.memory_space<vmem>>, vector<1x32xf32>
    %331 = vector.broadcast %330 : vector<1x32xf32> to vector<16x32xf32>
    %332 = arith.addf %329, %331 : vector<16x32xf32>
    %c680 = arith.constant 680 : index
    %c0_136 = arith.constant 0 : index
    %333 = vector.load %arg1[%c680, %c0_136] : memref<1032x128xf32, #tpu.memory_space<vmem>>, vector<32x32xf32>
    %cst_137 = arith.constant dense<0.000000e+00> : vector<8x32xf32>
    %334 = tpu.matmul %201, %333, %cst_137 {dimension_numbers = #tpu.dot_dimension_numbers<[1], [0], [0], [1], [0, 0, 1, 1], [], []>} : vector<8x32xf32>, vector<32x32xf32>, vector<8x32xf32> -> vector<8x32xf32>
    %c712 = arith.constant 712 : index
    %c0_138 = arith.constant 0 : index
    %335 = vector.load %arg1[%c712, %c0_138] : memref<1032x128xf32, #tpu.memory_space<vmem>>, vector<1x32xf32>
    %336 = vector.broadcast %335 : vector<1x32xf32> to vector<8x32xf32>
    %337 = arith.addf %334, %336 : vector<8x32xf32>
    %c720 = arith.constant 720 : index
    %c0_139 = arith.constant 0 : index
    %338 = vector.load %arg1[%c720, %c0_139] : memref<1032x128xf32, #tpu.memory_space<vmem>>, vector<32x32xf32>
    %cst_140 = arith.constant dense<0.000000e+00> : vector<8x32xf32>
    %339 = tpu.matmul %201, %338, %cst_140 {dimension_numbers = #tpu.dot_dimension_numbers<[1], [0], [0], [1], [0, 0, 1, 1], [], []>} : vector<8x32xf32>, vector<32x32xf32>, vector<8x32xf32> -> vector<8x32xf32>
    %c752 = arith.constant 752 : index
    %c0_141 = arith.constant 0 : index
    %340 = vector.load %arg1[%c752, %c0_141] : memref<1032x128xf32, #tpu.memory_space<vmem>>, vector<1x32xf32>
    %341 = vector.broadcast %340 : vector<1x32xf32> to vector<8x32xf32>
    %342 = arith.addf %339, %341 : vector<8x32xf32>
    %343 = vector.extract_strided_slice %332 {offsets = [0, 0], sizes = [16, 8], strides = [1, 1]} : vector<16x32xf32> to vector<16x8xf32>
    %344 = vector.extract_strided_slice %337 {offsets = [0, 0], sizes = [8, 8], strides = [1, 1]} : vector<8x32xf32> to vector<8x8xf32>
    %cst_142 = arith.constant dense<0.000000e+00> : vector<16x8xf32>
    %345 = tpu.matmul %343, %344, %cst_142 {dimension_numbers = #tpu.dot_dimension_numbers<[1], [1], [0], [0], [0, 0, 1, 0], [], []>} : vector<16x8xf32>, vector<8x8xf32>, vector<16x8xf32> -> vector<16x8xf32>
    %346 = arith.addf %345, %215 : vector<16x8xf32>
    %cst_143 = arith.constant dense<0xFF800000> : vector<16xf32>
    %347 = vector.multi_reduction <maximumf>, %346, %cst_143 [1] : vector<16x8xf32> to vector<16xf32>
    %348 = vector.shape_cast %347 : vector<16xf32> to vector<16x1xf32>
    %349 = vector.broadcast %348 : vector<16x1xf32> to vector<16x8xf32>
    %350 = arith.subf %346, %349 : vector<16x8xf32>
    %351 = math.exp %350 : vector<16x8xf32>
    %cst_144 = arith.constant dense<0.000000e+00> : vector<16xf32>
    %352 = vector.multi_reduction <add>, %351, %cst_144 [1] : vector<16x8xf32> to vector<16xf32>
    %353 = vector.shape_cast %352 : vector<16xf32> to vector<16x1xf32>
    %cst_145 = arith.constant 1.000000e+00 : f32
    %354 = vector.broadcast %cst_145 : f32 to vector<16x1xf32>
    %355 = arith.divf %354, %353 : vector<16x1xf32>
    %356 = vector.broadcast %355 : vector<16x1xf32> to vector<16x8xf32>
    %357 = arith.mulf %351, %356 : vector<16x8xf32>
    %358 = vector.extract_strided_slice %342 {offsets = [0, 0], sizes = [8, 8], strides = [1, 1]} : vector<8x32xf32> to vector<8x8xf32>
    %cst_146 = arith.constant dense<0.000000e+00> : vector<16x8xf32>
    %359 = tpu.matmul %357, %358, %cst_146 {dimension_numbers = #tpu.dot_dimension_numbers<[1], [0], [0], [1], [0, 0, 1, 1], [], []>} : vector<16x8xf32>, vector<8x8xf32>, vector<16x8xf32> -> vector<16x8xf32>
    %360 = vector.extract_strided_slice %332 {offsets = [0, 8], sizes = [16, 8], strides = [1, 1]} : vector<16x32xf32> to vector<16x8xf32>
    %361 = vector.extract_strided_slice %337 {offsets = [0, 8], sizes = [8, 8], strides = [1, 1]} : vector<8x32xf32> to vector<8x8xf32>
    %cst_147 = arith.constant dense<0.000000e+00> : vector<16x8xf32>
    %362 = tpu.matmul %360, %361, %cst_147 {dimension_numbers = #tpu.dot_dimension_numbers<[1], [1], [0], [0], [0, 0, 1, 0], [], []>} : vector<16x8xf32>, vector<8x8xf32>, vector<16x8xf32> -> vector<16x8xf32>
    %363 = arith.addf %362, %215 : vector<16x8xf32>
    %cst_148 = arith.constant dense<0xFF800000> : vector<16xf32>
    %364 = vector.multi_reduction <maximumf>, %363, %cst_148 [1] : vector<16x8xf32> to vector<16xf32>
    %365 = vector.shape_cast %364 : vector<16xf32> to vector<16x1xf32>
    %366 = vector.broadcast %365 : vector<16x1xf32> to vector<16x8xf32>
    %367 = arith.subf %363, %366 : vector<16x8xf32>
    %368 = math.exp %367 : vector<16x8xf32>
    %cst_149 = arith.constant dense<0.000000e+00> : vector<16xf32>
    %369 = vector.multi_reduction <add>, %368, %cst_149 [1] : vector<16x8xf32> to vector<16xf32>
    %370 = vector.shape_cast %369 : vector<16xf32> to vector<16x1xf32>
    %cst_150 = arith.constant 1.000000e+00 : f32
    %371 = vector.broadcast %cst_150 : f32 to vector<16x1xf32>
    %372 = arith.divf %371, %370 : vector<16x1xf32>
    %373 = vector.broadcast %372 : vector<16x1xf32> to vector<16x8xf32>
    %374 = arith.mulf %368, %373 : vector<16x8xf32>
    %375 = vector.extract_strided_slice %342 {offsets = [0, 8], sizes = [8, 8], strides = [1, 1]} : vector<8x32xf32> to vector<8x8xf32>
    %cst_151 = arith.constant dense<0.000000e+00> : vector<16x8xf32>
    %376 = tpu.matmul %374, %375, %cst_151 {dimension_numbers = #tpu.dot_dimension_numbers<[1], [0], [0], [1], [0, 0, 1, 1], [], []>} : vector<16x8xf32>, vector<8x8xf32>, vector<16x8xf32> -> vector<16x8xf32>
    %377 = vector.extract_strided_slice %332 {offsets = [0, 16], sizes = [16, 8], strides = [1, 1]} : vector<16x32xf32> to vector<16x8xf32>
    %378 = vector.extract_strided_slice %337 {offsets = [0, 16], sizes = [8, 8], strides = [1, 1]} : vector<8x32xf32> to vector<8x8xf32>
    %cst_152 = arith.constant dense<0.000000e+00> : vector<16x8xf32>
    %379 = tpu.matmul %377, %378, %cst_152 {dimension_numbers = #tpu.dot_dimension_numbers<[1], [1], [0], [0], [0, 0, 1, 0], [], []>} : vector<16x8xf32>, vector<8x8xf32>, vector<16x8xf32> -> vector<16x8xf32>
    %380 = arith.addf %379, %215 : vector<16x8xf32>
    %cst_153 = arith.constant dense<0xFF800000> : vector<16xf32>
    %381 = vector.multi_reduction <maximumf>, %380, %cst_153 [1] : vector<16x8xf32> to vector<16xf32>
    %382 = vector.shape_cast %381 : vector<16xf32> to vector<16x1xf32>
    %383 = vector.broadcast %382 : vector<16x1xf32> to vector<16x8xf32>
    %384 = arith.subf %380, %383 : vector<16x8xf32>
    %385 = math.exp %384 : vector<16x8xf32>
    %cst_154 = arith.constant dense<0.000000e+00> : vector<16xf32>
    %386 = vector.multi_reduction <add>, %385, %cst_154 [1] : vector<16x8xf32> to vector<16xf32>
    %387 = vector.shape_cast %386 : vector<16xf32> to vector<16x1xf32>
    %cst_155 = arith.constant 1.000000e+00 : f32
    %388 = vector.broadcast %cst_155 : f32 to vector<16x1xf32>
    %389 = arith.divf %388, %387 : vector<16x1xf32>
    %390 = vector.broadcast %389 : vector<16x1xf32> to vector<16x8xf32>
    %391 = arith.mulf %385, %390 : vector<16x8xf32>
    %392 = vector.extract_strided_slice %342 {offsets = [0, 16], sizes = [8, 8], strides = [1, 1]} : vector<8x32xf32> to vector<8x8xf32>
    %cst_156 = arith.constant dense<0.000000e+00> : vector<16x8xf32>
    %393 = tpu.matmul %391, %392, %cst_156 {dimension_numbers = #tpu.dot_dimension_numbers<[1], [0], [0], [1], [0, 0, 1, 1], [], []>} : vector<16x8xf32>, vector<8x8xf32>, vector<16x8xf32> -> vector<16x8xf32>
    %394 = vector.extract_strided_slice %332 {offsets = [0, 24], sizes = [16, 8], strides = [1, 1]} : vector<16x32xf32> to vector<16x8xf32>
    %395 = vector.extract_strided_slice %337 {offsets = [0, 24], sizes = [8, 8], strides = [1, 1]} : vector<8x32xf32> to vector<8x8xf32>
    %cst_157 = arith.constant dense<0.000000e+00> : vector<16x8xf32>
    %396 = tpu.matmul %394, %395, %cst_157 {dimension_numbers = #tpu.dot_dimension_numbers<[1], [1], [0], [0], [0, 0, 1, 0], [], []>} : vector<16x8xf32>, vector<8x8xf32>, vector<16x8xf32> -> vector<16x8xf32>
    %397 = arith.addf %396, %215 : vector<16x8xf32>
    %cst_158 = arith.constant dense<0xFF800000> : vector<16xf32>
    %398 = vector.multi_reduction <maximumf>, %397, %cst_158 [1] : vector<16x8xf32> to vector<16xf32>
    %399 = vector.shape_cast %398 : vector<16xf32> to vector<16x1xf32>
    %400 = vector.broadcast %399 : vector<16x1xf32> to vector<16x8xf32>
    %401 = arith.subf %397, %400 : vector<16x8xf32>
    %402 = math.exp %401 : vector<16x8xf32>
    %cst_159 = arith.constant dense<0.000000e+00> : vector<16xf32>
    %403 = vector.multi_reduction <add>, %402, %cst_159 [1] : vector<16x8xf32> to vector<16xf32>
    %404 = vector.shape_cast %403 : vector<16xf32> to vector<16x1xf32>
    %cst_160 = arith.constant 1.000000e+00 : f32
    %405 = vector.broadcast %cst_160 : f32 to vector<16x1xf32>
    %406 = arith.divf %405, %404 : vector<16x1xf32>
    %407 = vector.broadcast %406 : vector<16x1xf32> to vector<16x8xf32>
    %408 = arith.mulf %402, %407 : vector<16x8xf32>
    %409 = vector.extract_strided_slice %342 {offsets = [0, 24], sizes = [8, 8], strides = [1, 1]} : vector<8x32xf32> to vector<8x8xf32>
    %cst_161 = arith.constant dense<0.000000e+00> : vector<16x8xf32>
    %410 = tpu.matmul %408, %409, %cst_161 {dimension_numbers = #tpu.dot_dimension_numbers<[1], [0], [0], [1], [0, 0, 1, 1], [], []>} : vector<16x8xf32>, vector<8x8xf32>, vector<16x8xf32> -> vector<16x8xf32>
    %411 = tpu.concatenate %359, %376, %393, %410 in 1 : vector<16x8xf32>, vector<16x8xf32>, vector<16x8xf32>, vector<16x8xf32> -> vector<16x32xf32>
    %c760 = arith.constant 760 : index
    %c0_162 = arith.constant 0 : index
    %412 = vector.load %arg1[%c760, %c0_162] : memref<1032x128xf32, #tpu.memory_space<vmem>>, vector<32x32xf32>
    %cst_163 = arith.constant dense<0.000000e+00> : vector<16x32xf32>
    %413 = tpu.matmul %411, %412, %cst_163 {dimension_numbers = #tpu.dot_dimension_numbers<[1], [0], [0], [1], [0, 0, 1, 1], [], []>} : vector<16x32xf32>, vector<32x32xf32>, vector<16x32xf32> -> vector<16x32xf32>
    %c792 = arith.constant 792 : index
    %c0_164 = arith.constant 0 : index
    %414 = vector.load %arg1[%c792, %c0_164] : memref<1032x128xf32, #tpu.memory_space<vmem>>, vector<1x32xf32>
    %415 = vector.broadcast %414 : vector<1x32xf32> to vector<16x32xf32>
    %416 = arith.addf %413, %415 : vector<16x32xf32>
    %417 = arith.addf %327, %416 : vector<16x32xf32>
    %c800 = arith.constant 800 : index
    %c0_165 = arith.constant 0 : index
    %418 = vector.load %arg1[%c800, %c0_165] : memref<1032x128xf32, #tpu.memory_space<vmem>>, vector<1x32xf32>
    %c808 = arith.constant 808 : index
    %c0_166 = arith.constant 0 : index
    %419 = vector.load %arg1[%c808, %c0_166] : memref<1032x128xf32, #tpu.memory_space<vmem>>, vector<1x32xf32>
    %cst_167 = arith.constant dense<0.000000e+00> : vector<16xf32>
    %420 = vector.multi_reduction <add>, %417, %cst_167 [1] : vector<16x32xf32> to vector<16xf32>
    %421 = vector.shape_cast %420 : vector<16xf32> to vector<16x1xf32>
    %cst_168 = arith.constant 3.200000e+01 : f32
    %422 = vector.broadcast %cst_168 : f32 to vector<16x1xf32>
    %423 = arith.divf %421, %422 : vector<16x1xf32>
    %424 = vector.broadcast %423 : vector<16x1xf32> to vector<16x32xf32>
    %425 = arith.subf %417, %424 : vector<16x32xf32>
    %426 = arith.mulf %425, %425 : vector<16x32xf32>
    %cst_169 = arith.constant dense<0.000000e+00> : vector<16xf32>
    %427 = vector.multi_reduction <add>, %426, %cst_169 [1] : vector<16x32xf32> to vector<16xf32>
    %428 = vector.shape_cast %427 : vector<16xf32> to vector<16x1xf32>
    %cst_170 = arith.constant 3.200000e+01 : f32
    %429 = vector.broadcast %cst_170 : f32 to vector<16x1xf32>
    %430 = arith.divf %428, %429 : vector<16x1xf32>
    %cst_171 = arith.constant 9.99999974E-6 : f32
    %431 = vector.broadcast %cst_171 : f32 to vector<16x1xf32>
    %432 = arith.addf %430, %431 : vector<16x1xf32>
    %433 = math.rsqrt %432 : vector<16x1xf32>
    %434 = vector.broadcast %433 : vector<16x1xf32> to vector<16x32xf32>
    %435 = arith.mulf %425, %434 : vector<16x32xf32>
    %436 = vector.broadcast %418 : vector<1x32xf32> to vector<16x32xf32>
    %437 = arith.mulf %435, %436 : vector<16x32xf32>
    %438 = vector.broadcast %419 : vector<1x32xf32> to vector<16x32xf32>
    %439 = arith.addf %437, %438 : vector<16x32xf32>
    %c816 = arith.constant 816 : index
    %c0_172 = arith.constant 0 : index
    %440 = vector.load %arg1[%c816, %c0_172] : memref<1032x128xf32, #tpu.memory_space<vmem>>, vector<32x64xf32>
    %cst_173 = arith.constant dense<0.000000e+00> : vector<16x64xf32>
    %441 = tpu.matmul %439, %440, %cst_173 {dimension_numbers = #tpu.dot_dimension_numbers<[1], [0], [0], [1], [0, 0, 1, 1], [], []>} : vector<16x32xf32>, vector<32x64xf32>, vector<16x64xf32> -> vector<16x64xf32>
    %c848 = arith.constant 848 : index
    %c0_174 = arith.constant 0 : index
    %442 = vector.load %arg1[%c848, %c0_174] : memref<1032x128xf32, #tpu.memory_space<vmem>>, vector<1x64xf32>
    %443 = vector.broadcast %442 : vector<1x64xf32> to vector<16x64xf32>
    %444 = arith.addf %441, %443 : vector<16x64xf32>
    %cst_175 = arith.constant 5.000000e-01 : f32
    %445 = vector.broadcast %cst_175 : f32 to vector<16x64xf32>
    %446 = arith.mulf %445, %444 : vector<16x64xf32>
    %447 = arith.mulf %444, %444 : vector<16x64xf32>
    %448 = arith.mulf %447, %444 : vector<16x64xf32>
    %cst_176 = arith.constant 4.471500e-02 : f32
    %449 = vector.broadcast %cst_176 : f32 to vector<16x64xf32>
    %450 = arith.mulf %449, %448 : vector<16x64xf32>
    %451 = arith.addf %444, %450 : vector<16x64xf32>
    %cst_177 = arith.constant 0.797884583 : f32
    %452 = vector.broadcast %cst_177 : f32 to vector<16x64xf32>
    %453 = arith.mulf %452, %451 : vector<16x64xf32>
    %454 = math.tanh %453 : vector<16x64xf32>
    %cst_178 = arith.constant 1.000000e+00 : f32
    %455 = vector.broadcast %cst_178 : f32 to vector<16x64xf32>
    %456 = arith.addf %455, %454 : vector<16x64xf32>
    %457 = arith.mulf %446, %456 : vector<16x64xf32>
    %c856 = arith.constant 856 : index
    %c0_179 = arith.constant 0 : index
    %458 = vector.load %arg1[%c856, %c0_179] : memref<1032x128xf32, #tpu.memory_space<vmem>>, vector<64x32xf32>
    %cst_180 = arith.constant dense<0.000000e+00> : vector<16x32xf32>
    %459 = tpu.matmul %457, %458, %cst_180 {dimension_numbers = #tpu.dot_dimension_numbers<[1], [0], [0], [1], [0, 0, 1, 1], [], []>} : vector<16x64xf32>, vector<64x32xf32>, vector<16x32xf32> -> vector<16x32xf32>
    %c920 = arith.constant 920 : index
    %c0_181 = arith.constant 0 : index
    %460 = vector.load %arg1[%c920, %c0_181] : memref<1032x128xf32, #tpu.memory_space<vmem>>, vector<1x32xf32>
    %461 = vector.broadcast %460 : vector<1x32xf32> to vector<16x32xf32>
    %462 = arith.addf %459, %461 : vector<16x32xf32>
    %463 = arith.addf %439, %462 : vector<16x32xf32>
    %c928 = arith.constant 928 : index
    %c0_182 = arith.constant 0 : index
    %464 = vector.load %arg1[%c928, %c0_182] : memref<1032x128xf32, #tpu.memory_space<vmem>>, vector<1x32xf32>
    %c936 = arith.constant 936 : index
    %c0_183 = arith.constant 0 : index
    %465 = vector.load %arg1[%c936, %c0_183] : memref<1032x128xf32, #tpu.memory_space<vmem>>, vector<1x32xf32>
    %cst_184 = arith.constant dense<0.000000e+00> : vector<16xf32>
    %466 = vector.multi_reduction <add>, %463, %cst_184 [1] : vector<16x32xf32> to vector<16xf32>
    %467 = vector.shape_cast %466 : vector<16xf32> to vector<16x1xf32>
    %cst_185 = arith.constant 3.200000e+01 : f32
    %468 = vector.broadcast %cst_185 : f32 to vector<16x1xf32>
    %469 = arith.divf %467, %468 : vector<16x1xf32>
    %470 = vector.broadcast %469 : vector<16x1xf32> to vector<16x32xf32>
    %471 = arith.subf %463, %470 : vector<16x32xf32>
    %472 = arith.mulf %471, %471 : vector<16x32xf32>
    %cst_186 = arith.constant dense<0.000000e+00> : vector<16xf32>
    %473 = vector.multi_reduction <add>, %472, %cst_186 [1] : vector<16x32xf32> to vector<16xf32>
    %474 = vector.shape_cast %473 : vector<16xf32> to vector<16x1xf32>
    %cst_187 = arith.constant 3.200000e+01 : f32
    %475 = vector.broadcast %cst_187 : f32 to vector<16x1xf32>
    %476 = arith.divf %474, %475 : vector<16x1xf32>
    %cst_188 = arith.constant 9.99999974E-6 : f32
    %477 = vector.broadcast %cst_188 : f32 to vector<16x1xf32>
    %478 = arith.addf %476, %477 : vector<16x1xf32>
    %479 = math.rsqrt %478 : vector<16x1xf32>
    %480 = vector.broadcast %479 : vector<16x1xf32> to vector<16x32xf32>
    %481 = arith.mulf %471, %480 : vector<16x32xf32>
    %482 = vector.broadcast %464 : vector<1x32xf32> to vector<16x32xf32>
    %483 = arith.mulf %481, %482 : vector<16x32xf32>
    %484 = vector.broadcast %465 : vector<1x32xf32> to vector<16x32xf32>
    %485 = arith.addf %483, %484 : vector<16x32xf32>
    %c944 = arith.constant 944 : index
    %c0_189 = arith.constant 0 : index
    %486 = vector.load %arg1[%c944, %c0_189] : memref<1032x128xf32, #tpu.memory_space<vmem>>, vector<1x32xf32>
    %c952 = arith.constant 952 : index
    %c0_190 = arith.constant 0 : index
    %487 = vector.load %arg1[%c952, %c0_190] : memref<1032x128xf32, #tpu.memory_space<vmem>>, vector<1x32xf32>
    %cst_191 = arith.constant dense<0.000000e+00> : vector<16xf32>
    %488 = vector.multi_reduction <add>, %485, %cst_191 [1] : vector<16x32xf32> to vector<16xf32>
    %489 = vector.shape_cast %488 : vector<16xf32> to vector<16x1xf32>
    %cst_192 = arith.constant 3.200000e+01 : f32
    %490 = vector.broadcast %cst_192 : f32 to vector<16x1xf32>
    %491 = arith.divf %489, %490 : vector<16x1xf32>
    %492 = vector.broadcast %491 : vector<16x1xf32> to vector<16x32xf32>
    %493 = arith.subf %485, %492 : vector<16x32xf32>
    %494 = arith.mulf %493, %493 : vector<16x32xf32>
    %cst_193 = arith.constant dense<0.000000e+00> : vector<16xf32>
    %495 = vector.multi_reduction <add>, %494, %cst_193 [1] : vector<16x32xf32> to vector<16xf32>
    %496 = vector.shape_cast %495 : vector<16xf32> to vector<16x1xf32>
    %cst_194 = arith.constant 3.200000e+01 : f32
    %497 = vector.broadcast %cst_194 : f32 to vector<16x1xf32>
    %498 = arith.divf %496, %497 : vector<16x1xf32>
    %cst_195 = arith.constant 9.99999974E-6 : f32
    %499 = vector.broadcast %cst_195 : f32 to vector<16x1xf32>
    %500 = arith.addf %498, %499 : vector<16x1xf32>
    %501 = math.rsqrt %500 : vector<16x1xf32>
    %502 = vector.broadcast %501 : vector<16x1xf32> to vector<16x32xf32>
    %503 = arith.mulf %493, %502 : vector<16x32xf32>
    %504 = vector.broadcast %486 : vector<1x32xf32> to vector<16x32xf32>
    %505 = arith.mulf %503, %504 : vector<16x32xf32>
    %506 = vector.broadcast %487 : vector<1x32xf32> to vector<16x32xf32>
    %507 = arith.addf %505, %506 : vector<16x32xf32>
    %508 = vector.extract_strided_slice %507 {offsets = [4, 0], sizes = [4, 32], strides = [1, 1]} : vector<16x32xf32> to vector<4x32xf32>
    %509 = vector.extract_strided_slice %507 {offsets = [12, 0], sizes = [4, 32], strides = [1, 1]} : vector<16x32xf32> to vector<4x32xf32>
    %510 = tpu.concatenate %508, %509 in 0 : vector<4x32xf32>, vector<4x32xf32> -> vector<8x32xf32>
    %c992 = arith.constant 992 : index
    %c0_196 = arith.constant 0 : index
    %511 = vector.load %arg1[%c992, %c0_196] : memref<1032x128xf32, #tpu.memory_space<vmem>>, vector<32x4xf32>
    %cst_197 = arith.constant dense<0.000000e+00> : vector<8x4xf32>
    %512 = tpu.matmul %510, %511, %cst_197 {dimension_numbers = #tpu.dot_dimension_numbers<[1], [0], [0], [1], [0, 0, 1, 1], [], []>} : vector<8x32xf32>, vector<32x4xf32>, vector<8x4xf32> -> vector<8x4xf32>
    %c1024 = arith.constant 1024 : index
    %c0_198 = arith.constant 0 : index
    %513 = vector.load %arg1[%c1024, %c0_198] : memref<1032x128xf32, #tpu.memory_space<vmem>>, vector<1x4xf32>
    %514 = vector.broadcast %513 : vector<1x4xf32> to vector<8x4xf32>
    %515 = arith.addf %512, %514 : vector<8x4xf32>
    %c0_199 = arith.constant 0 : index
    %c0_200 = arith.constant 0 : index
    %516 = vector.load %arg2[%c0_199, %c0_200] : memref<8x4xf32, #tpu.memory_space<vmem>>, vector<8x4xf32>
    tpu.vector_store %arg2[%c0_199, %c0_200], %515 {strides = array<i32>} : memref<8x4xf32, #tpu.memory_space<vmem>>, vector<8x4xf32>,
    return
  }
}

</mosaic_0001>

<bundles_post_ra>
// kernel: nulin_forward.1
= control target key start
LH: loop header
LB: loop body
LE: loop exit
PB: predicated region body
PF: predicated region fallthrough
CT: control target
= control target key end

     0   :  { %7 = vsyncpa [#allocation3], 0  ;;  %s3445_s0 = inlined_call_operand.vmem [shape: f32[64,4], index: 0, kind: input, shape index: {}]   ;;  %s3446_s1 = inlined_call_operand.hbm [shape: f32[1032,128], index: 1, kind: input, shape index: {}]   ;;  %s3447_s2 = inlined_call_operand.hbm [shape: f32[8,4], index: 2, kind: output, shape index: {}]  }
   0x1   :  { %8 = vsyncpa [#allocation4], 0  ;;  %s15_s11 = sshll.u32 %s3446_s1, 4  ;;  %s2888_s12 = smov [#allocation2]   ;;  %s16_s11 = int_to_ptr.hbm [resolvable:$true] %s15_s11 }
   0x2   :  { %s17_s13 = sshll.u32 %s2888_s12, 4  ;;  %s2889_s14 = smov 128   ;;  %s18_s13 = int_to_ptr.vmem [resolvable:$true] %s17_s13 }
   0x3   :  { %s2890_s15 = smov 8  }
   0x4   :  { %23 = dma.hbm_to_vmem [thread:$0]  %s16_s11, 16512, %s18_s13, [#allocation3], %s2889_s14, %s2889_s14, %s2890_s15  }
   0x5   :  { %2884 = dma.done.wait [#allocation3], 16512  }
   0x6   :  { %2885 = vsyncadd [#allocation3], 4294950784  ;;  %v2891_v0 = vmov 0   ;;  %v30_v1 = vld [vmem:[%s3445_s0 + $0x10] sm:$0xff]  ;;  %v29_v2 = vld [vmem:[%s3445_s0 + $0x8] sm:$0xff]  ;;  %vm43_vm0 = vcmask 195584  }
   0x7   :  { %2679 = vset.pattern.permute.xlu0 %v2891_v0  ;;  %v28_v3 = vld [vmem:[%s3445_s0] sm:$0xff]  ;;  %60 = vmatpush.msra.mxu0 %v30_v1  ;;  %v37_v5 = vld [vmem:[#allocation2 + $0x8] sm:$0xff]  ;;  %v67_v9 = vld [vmem:[#allocation2 + $0x10] sm:$0xff]  ;;  %vm68_vm1 = vcmask 64512   ;;  %s2892_s21 = smov 4   ;;  %vm133_vm2 = vcmask 1043456  }
   0x8   :  { %v36_v4 = vld [vmem:[#allocation2] sm:$0xff]  ;;  %40 = vperm.xlu0 %2679, %v37_v5   ;;  %v92_v10 = vld [vmem:[#allocation2 + $0x18] sm:$0xff]  ;;  %v129_v11 = vld [vmem:[#allocation2 + $0x30] sm:$0xf]  ;;  %vm124_vm3 = vcmask 31744   ;;  %vm157_vm4 = vcmask 97280  }
   0x9   :  { %61 = vmatpush.msra.mxu0 %v29_v2  ;;  %v31_v12 = vld [vmem:[%s3445_s0 + $0x18] sm:$0xff]  ;;  %v128_v13 = vld [vmem:[#allocation2 + $0x28] sm:$0xf]  ;;  %2572 = vmatpush.msk.msra.mxu3 %vm133_vm2, %v129_v11  ;;  %v127_v15 = vld [vmem:[#allocation2 + $0x20] sm:$0xff]  ;;  %vm193_vm5 = vcmask 261120   ;;  %s2893_s24 = smov 104  }
   0xa   :  { %2573 = vmatmul.msk.f32.vlgmr.msra.gmra.mxu3 %vm124_vm3, %v31_v12  ;;  %v190_v16 = vld [vmem:[#allocation2 + $0x58] sm:$0xff]  ;;  %v220_v17 = vld [vmem:[#allocation2 + $0x80] sm:$0xff]  ;;  %v246_v18 = vld [vmem:[#allocation2 + $0xa8] sm:$0xff]  ;;  %s2894_s25 = smov 120   ;;  %s2895_s26 = smov 112  }
   0xb   :  { %62 = vmatpush.msra.mxu0 %v28_v3  ;;  %235 = vmatpush.msrb.mxu3 %v220_v17  ;;  %v189_v24 = vld [vmem:[#allocation2 + $0x50] sm:$0xff]  ;;  %v219_v25 = vld [vmem:[#allocation2 + $0x78] sm:$0xff]  ;;  %v245_v26 = vld [vmem:[#allocation2 + $0xa0] sm:$0xff]  ;;  %s2896_s27 = smov 16   ;;  %s2897_s28 = smov 24  }
   0xc   :  { %2569 = vmatmul.msk.f32.vlgmr.msra.gmra.mxu0 %vm43_vm0, %v36_v4  ;;  %v188_v27 = vld [vmem:[#allocation2 + $0x48] sm:$0xff]  ;;  %v218_v28 = vld [vmem:[#allocation2 + $0x70] sm:$0xff]  ;;  %v244_v29 = vld [vmem:[#allocation2 + $0x98] sm:$0xff]  ;;  %s2559_s12 = sshll.u32 %s3447_s2, 4  ;;  %s2560_s12 = int_to_ptr.hbm [resolvable:$true] %s2559_s12 }
   0xd   :  { %261 = vmatpush.msrb.mxu0 %v246_v18  ;;  %236 = vmatpush.msrb.mxu3 %v219_v25  ;;  %v187_v30 = vld [vmem:[#allocation2 + $0x40] sm:$0xff]  ;;  %v217_v31 = vld [vmem:[#allocation2 + $0x68] sm:$0xff]  ;;  %v243_v32 = vld [vmem:[#allocation2 + $0x90] sm:$0xff] }
   0xe   :  { %v184_v35 = vld [vmem:[#allocation2 + $0x38] sm:$0xff]  ;;  %v2695_v38 = vld [vmem:[#allocation2 + $0xb0] ss:$0 sm:$0xff]  ;;  %v2696_v41 = vld [vmem:[#allocation2 + $0x60] ss:$0 sm:$0xff] }
   0xf   :  { %262 = vmatpush.msrb.mxu0 %v245_v26  ;;  %237 = vmatpush.msrb.mxu3 %v218_v28  ;;  %v2697_v42 = vld [vmem:[#allocation2 + $0x88] ss:$0 sm:$0xff]  ;;  %v186_v53 = vld [vmem:[#allocation2 + $0x180] sm:$0xff] }
  0x11   :  { %263 = vmatpush.msrb.mxu0 %v244_v29  ;;  %238 = vmatpush.msrb.mxu3 %v217_v31 }
  0x13   :  { %264 = vmatpush.msrb.mxu0 %v243_v32 }
  0x7a   :  { %v41_v6 = vpop.permute.xlu0 %40 }
  0x89   :  { %v64_v7 = vpop.f32.mrf.mxu0 }
  0x8a   :  { %v65_v8 = vadd.f32 %v64_v7, %v41_v6 }
  0x8c   :  { %117 = vrot.lane.b32.xlu0 %v65_v8, %s2892_s21  ;;  %87 = vmatpush.msra.mxu1 %v65_v8 }
  0x8d   :  { %111 = vmatpush.msra.mxu2 %v65_v8  ;;  %2570 = vmatmul.msk.f32.vlgmr.msra.gmra.mxu1 %vm68_vm1, %v67_v9  ;;  %v154_v33 = vpop.f32.mrf.mxu3 }
  0x8e   :  { %2571 = vmatmul.msk.f32.vlgmr.msra.gmra.mxu2 %vm68_vm1, %v92_v10  ;;  %2574 = vmatpush.msk.msrb.mxu1 %vm133_vm2, %v128_v13 }
  0x8f   :  { %209 = vmatpush.msrb.mxu2 %v190_v16 }
  0x90   :  { %179 = vmatpush.msrb.mxu1 %v127_v15 }
  0x91   :  { %210 = vmatpush.msrb.mxu2 %v189_v24 }
  0x93   :  { %211 = vmatpush.msrb.mxu2 %v188_v27 }
  0x95   :  { %212 = vmatpush.msrb.mxu2 %v187_v30 }
  0xfe   :  { %v118_v20 = vpop.permute.xlu0 %117 }
 0x10a   :  { %v89_v19 = vpop.f32.mrf.mxu1 }
 0x10b   :  { %v125_v21 = vsel %vm124_vm3, %v89_v19, %v118_v20 }
 0x111   :  { %v113_v14 = vpop.f32.mrf.mxu2 }
 0x112   :  { %121 = vrot.lane.b32.xlu1 %v113_v14, %s2890_s15 }
 0x184   :  { %v122_v22 = vpop.permute.xlu1 %121 }
 0x185   :  { %v126_v23 = vsel %vm68_vm1, %v125_v21, %v122_v22 }
 0x186   :  { %2575 = vmatmul.msk.f32.vlgmr.msrb.gmra.mxu1 %vm157_vm4, %v126_v23 }
 0x203   :  { %v181_v34 = vpop.f32.mrf.mxu1 }
 0x204   :  { %v182_v36 = vadd.f32 %v181_v34, %v154_v33 }
 0x206   :  { %v2942_v37 = vadd.f32 %v184_v35, %v182_v36 }
 0x208   :  { %2576 = vmatmul.msk.f32.vlgmr.msrb.gmra.mxu2 %vm193_vm5, %v2942_v37  ;;  %2577 = vmatmul.msk.f32.vlgmr.msrb.gmra.mxu3 %vm193_vm5, %v2942_v37 }
 0x209   :  { %2578 = vmatmul.msk.f32.vlgmr.msrb.gmra.mxu0 %vm193_vm5, %v2942_v37 }
 0x286   :  { %v266_v39 = vpop.f32.mrf.mxu0 }
 0x287   :  { %v2950_v40 = vadd.f32 %v2695_v38, %v266_v39 }
 0x289   :  { %338 = vmatpush.msra.mxu2 %v2950_v40 }
 0x28b   :  { %v214_v43 = vpop.f32.mrf.mxu2  ;;  %v240_v44 = vpop.f32.mrf.mxu3 }
 0x28c   :  { %v215_v45 = vadd.f32 %v2696_v41, %v214_v43  ;;  %v241_v46 = vadd.f32 %v2697_v42, %v240_v44 }
 0x28e   :  { %504 = vrot.lane.b32.xlu0 %v241_v46, %s2893_s24  ;;  %345 = vrot.lane.b32.xlu1 %v241_v46, %s2894_s25 }
 0x28f   :  { %2579 = vmatpush.xpose.msk.msra.mxu1 %vm68_vm1, %v241_v46  ;;  %343 = vrot.lane.b32.xlu2 %v215_v45, %s2894_s25 }
 0x292   :  { %2580 = vmatmul.msk.f32.vlgmr.msra.gmra.mxu1 %vm68_vm1, %v215_v45 }
 0x296   :  { %423 = vrot.lane.b32.xlu1 %v215_v45, %s2895_s26 }
 0x297   :  { %425 = vrot.lane.b32.xlu2 %v241_v46, %s2895_s26 }
 0x29f   :  { %502 = vrot.lane.b32.xlu2 %v215_v45, %s2893_s24 }
 0x2e9   :  { %v344_v47 = vpop.permute.xlu2 %343 }
 0x2f1   :  { %v426_v48 = vpop.permute.xlu2 %425 }
 0x2f2   :  { %2585 = vmatpush.xpose.msk.msrb.mxu1 %vm68_vm1, %v426_v48 }
 0x2f9   :  { %v503_v52 = vpop.permute.xlu2 %502 }
 0x300   :  { %v505_v49 = vpop.permute.xlu0 %504  ;;  %v346_v50 = vpop.permute.xlu1 %345 }
 0x301   :  { %2582 = vmatpush.xpose.msk.msra.mxu3 %vm68_vm1, %v346_v50 }
 0x304   :  { %2583 = vmatmul.msk.f32.vlgmr.msra.gmra.mxu3 %vm68_vm1, %v344_v47 }
 0x305   :  { %2588 = vmatpush.xpose.msk.msrb.mxu3 %vm68_vm1, %v505_v49 }
 0x308   :  { %v424_v51 = vpop.permute.xlu1 %423 }
 0x309   :  { %2586 = vmatmul.msk.f32.vlgmr.msrb.gmra.mxu1 %vm68_vm1, %v424_v51 }
 0x30c   :  { %2589 = vmatmul.msk.f32.vlgmr.msrb.gmra.mxu3 %vm68_vm1, %v503_v52 }
 0x30f   :  { %v292_v54 = vpop.f32.mrf.mxu1 }
 0x310   :  { %v293_v55 = vadd.f32 %v292_v54, %v186_v53 }
 0x312   :  { %v295_v56 = vsel %vm68_vm1, %v293_v55, -inf }
 0x313   :  { %296 = vmax.xlane.f32.xlu0 %v295_v56 }
 0x386   :  { %v297_v57 = vpop.xlane.xlu0 %296  ;;  %v448_v58 = vpop.f32.mrf.mxu1 }
 0x387   :  { %v298_v59 = vsub.f32 %v293_v55, %v297_v57  ;;  %v449_v60 = vadd.f32 %v448_v58, %v186_v53  ;;  %v368_v61 = vpop.f32.mrf.mxu3 }
 0x388   :  { %v369_v62 = vadd.f32 %v368_v61, %v186_v53 }
 0x389   :  { %v299_v63 = vmul.f32 1.442695, %v298_v59  ;;  %v451_v0 = vsel %vm68_vm1, %v449_v60, -inf }
 0x38a   :  { %452 = vmax.xlane.f32.xlu2 %v451_v0  ;;  %v371_v1 = vsel %vm68_vm1, %v369_v62, -inf }
 0x38b   :  { %2726 = vpow2.f32 %v299_v63  ;;  %372 = vmax.xlane.f32.xlu1 %v371_v1 }
 0x38f   :  { %v527_v2 = vpop.f32.mrf.mxu3 }
 0x390   :  { %v528_v3 = vadd.f32 %v527_v2, %v186_v53 }
 0x391   :  { %v2727_v4 = vpop.eup %2726 }
 0x392   :  { %v301_v5 = vsel %vm68_vm1, %v2727_v4, 0.0  ;;  %v530_v6 = vsel %vm68_vm1, %v528_v3, -inf }
 0x393   :  { %302 = vadd.xlane.f32.xlu0 %v301_v5  ;;  %531 = vmax.xlane.f32.xlu2 %v530_v6 }
 0x3fd   :  { %v453_v7 = vpop.xlane.xlu2 %452 }
 0x3fe   :  { %v454_v8 = vsub.f32 %v449_v60, %v453_v7  ;;  %v373_v9 = vpop.xlane.xlu1 %372 }
 0x3ff   :  { %v374_v10 = vsub.f32 %v369_v62, %v373_v9 }
 0x400   :  { %v455_v11 = vmul.f32 1.442695, %v454_v8 }
 0x401   :  { %v375_v12 = vmul.f32 1.442695, %v374_v10 }
 0x402   :  { %2728 = vpow2.f32 %v455_v11 }
 0x403   :  { %2730 = vpow2.f32 %v375_v12 }
 0x406   :  { %v303_v13 = vpop.xlane.xlu0 %302  ;;  %v532_v14 = vpop.xlane.xlu2 %531 }
 0x407   :  { %2732 = vrcp.f32 %v303_v13  ;;  %v533_v16 = vsub.f32 %v528_v3, %v532_v14  ;;  %v315_v24 = vand.u32 2147483648, %v303_v13  ;;  %v313_v27 = vand.u32 2147483647, %v303_v13  ;;  %v600_v14 = vld [vmem:[#allocation2 + $0xd0] sm:$0xff] }
 0x408   :  { %v2972_v15 = vpop.eup %2728  ;;  %vm309_vm7 = vweird.f32 %v303_v13  ;;  %618 = vmatpush.msra.mxu1 %v600_v14  ;;  %v873_v14 = vld [vmem:[#allocation2 + $0x1a8] sm:$0xff] }
 0x409   :  { %v2974_v17 = vpop.eup %2730  ;;  %v457_v18 = vsel %vm68_vm1, %v2972_v15, 0.0  ;;  %v534_v19 = vmul.f32 1.442695, %v533_v16  ;;  %v316_v30 = vor.u32 1.1754944e-38, %v315_v24  ;;  %vm314_vm9 = vcmp.eq.f32.partialorder %v313_v27, 8.507059e+37  ;;  %v598_v16 = vld [vmem:[#allocation2 + $0xc0] sm:$0xff] }
 0x40a   :  { %458 = vadd.xlane.f32.xlu2 %v457_v18  ;;  %v377_v20 = vsel %vm68_vm1, %v2974_v17, 0.0  ;;  %v2698_v24 = vld [vmem:[#allocation2 + $0xd8] ss:$0 sm:$0xff] }
 0x40b   :  { %378 = vadd.xlane.f32.xlu1 %v377_v20  ;;  %2734 = vpow2.f32 %v534_v19 }
 0x40d   :  { %v2733_v21 = vpop.eup %2732 }
 0x40e   :  { %v305_v22 = vmul.f32 %v2733_v21, %v303_v13  ;;  %vm310_vm6 = vweird.f32 %v2733_v21 }
 0x40f   :  { %vm311_vm8 = vmor %vm309_vm7, %vm310_vm6 }
 0x410   :  { %v306_v23 = vsub.f32 1.0, %v305_v22 }
 0x411   :  { %v2980_v25 = vpop.eup %2734 }
 0x412   :  { %v307_v26 = vmul.f32 %v2733_v21, %v306_v23  ;;  %v536_v28 = vsel %vm68_vm1, %v2980_v25, 0.0 }
 0x413   :  { %537 = vadd.xlane.f32.xlu0 %v536_v28 }
 0x414   :  { %v308_v29 = vadd.f32 %v2733_v21, %v307_v26 }
 0x416   :  { %v312_v31 = vsel %vm311_vm8, %v2733_v21, %v308_v29  ;;  %v2898_v29 = vmov 32.0  }
 0x417   :  { %v317_v32 = vsel %vm314_vm9, %v316_v30, %v312_v31  ;;  %v33_v30 = vld [vmem:[%s3445_s0 + $0x28] sm:$0xff]  ;;  %v32_v31 = vld [vmem:[%s3445_s0 + $0x20] sm:$0xff] }
 0x418   :  { %v319_v33 = vmul.f32 %v2727_v4, %v317_v32  ;;  %v822_v32 = vld [vmem:[#allocation2 + $0x198] sm:$0xff] }
 0x41a   :  { %2581 = vmatmul.msk.f32.vlgmr.msra.gmra.mxu2 %vm68_vm1, %v319_v33 }
 0x422   :  { %476 = vrot.lane.b32.xlu2 %v2950_v40, %s2895_s26 }
 0x424   :  { %397 = vrot.lane.b32.xlu1 %v2950_v40, %s2894_s25 }
 0x427   :  { %555 = vrot.lane.b32.xlu0 %v2950_v40, %s2893_s24 }
 0x47d   :  { %v459_v34 = vpop.xlane.xlu2 %458 }
 0x47e   :  { %2736 = vrcp.f32 %v459_v34  ;;  %v379_v35 = vpop.xlane.xlu1 %378  ;;  %v471_v45 = vand.u32 2147483648, %v459_v34  ;;  %v469_v48 = vand.u32 2147483647, %v459_v34  ;;  %vm465_vm11 = vweird.f32 %v459_v34 }
 0x47f   :  { %2738 = vrcp.f32 %v379_v35  ;;  %v391_v53 = vand.u32 2147483648, %v379_v35  ;;  %vm385_vm15 = vweird.f32 %v379_v35  ;;  %v389_v56 = vand.u32 2147483647, %v379_v35 }
 0x480   :  { %v472_v50 = vor.u32 1.1754944e-38, %v471_v45  ;;  %vm470_vm14 = vcmp.eq.f32.partialorder %v469_v48, 8.507059e+37  ;;  %v663_v48 = vld [vmem:[#allocation2 + $0xf8] sm:$0xff] }
 0x481   :  { %v392_v60 = vor.u32 1.1754944e-38, %v391_v53  ;;  %vm390_vm7 = vcmp.eq.f32.partialorder %v389_v56, 8.507059e+37 }
 0x484   :  { %v2737_v36 = vpop.eup %2736 }
 0x485   :  { %v2739_v38 = vpop.eup %2738  ;;  %v461_v39 = vmul.f32 %v2737_v36, %v459_v34  ;;  %v477_v41 = vpop.permute.xlu2 %476  ;;  %vm466_vm10 = vweird.f32 %v2737_v36  ;;  %v823_v34 = vld [vmem:[#allocation2 + $0x1a0] sm:$0xff] }
 0x486   :  { %v381_v42 = vmul.f32 %v2739_v38, %v379_v35  ;;  %497 = vmatpush.msrb.mxu2 %v477_v41  ;;  %v538_v44 = vpop.xlane.xlu0 %537  ;;  %vm467_vm12 = vmor %vm465_vm11, %vm466_vm10  ;;  %vm386_vm13 = vweird.f32 %v2739_v38 }
 0x487   :  { %v462_v43 = vsub.f32 1.0, %v461_v39  ;;  %2740 = vrcp.f32 %v538_v44  ;;  %vm387_vm6 = vmor %vm385_vm15, %vm386_vm13  ;;  %v550_v1 = vand.u32 2147483648, %v538_v44  ;;  %vm544_vm9 = vweird.f32 %v538_v44 }
 0x488   :  { %v382_v46 = vsub.f32 1.0, %v381_v42  ;;  %v548_v2 = vand.u32 2147483647, %v538_v44  ;;  %2742 = vrcp.f32 %v2898_v29 }
 0x489   :  { %v463_v47 = vmul.f32 %v2737_v36, %v462_v43  ;;  %v551_v6 = vor.u32 1.1754944e-38, %v550_v1  ;;  %v2700_v1 = vld [vmem:[#allocation2 + $0xe8] ss:$0 sm:$0xff] }
 0x48a   :  { %v383_v49 = vmul.f32 %v2739_v38, %v382_v46  ;;  %vm549_vm11 = vcmp.eq.f32.partialorder %v548_v2, 8.507059e+37  ;;  %v665_v46 = vld [vmem:[#allocation2 + $0x108] sm:$0xff] }
 0x48b   :  { %v464_v40 = vadd.f32 %v2737_v36, %v463_v47  ;;  %683 = vmatpush.msra.mxu2 %v665_v46  ;;  %v664_v47 = vld [vmem:[#allocation2 + $0x100] sm:$0xff]  ;;  %v1014_v46 = vld [vmem:[#allocation2 + $0x230] sm:$0xff] }
 0x48c   :  { %v384_v51 = vadd.f32 %v2739_v38, %v383_v49  ;;  %v662_v49 = vld [vmem:[#allocation2 + $0xf0] sm:$0xff] }
 0x48d   :  { %v468_v52 = vsel %vm467_vm12, %v2737_v36, %v464_v40  ;;  %v2741_v54 = vpop.eup %2740  ;;  %vm594_vm12 = vcmask 130048   ;;  %684 = vmatpush.msra.mxu2 %v664_v47  ;;  %v791_v40 = vld [vmem:[#allocation2 + $0x188] sm:$0xff]  ;;  %v949_v47 = vld [vmem:[#allocation2 + $0x1d8] sm:$0xff] }
 0x48e   :  { %v473_v55 = vsel %vm470_vm14, %v472_v50, %v468_v52  ;;  %v540_v57 = vmul.f32 %v2741_v54, %v538_v44  ;;  %v388_v59 = vsel %vm387_vm6, %v2739_v38, %v384_v51  ;;  %vm545_vm8 = vweird.f32 %v2741_v54  ;;  %v2743_v33 = vpop.eup %2742 }
 0x48f   :  { %v475_v58 = vmul.f32 %v2972_v15, %v473_v55  ;;  %v393_v62 = vsel %vm390_vm7, %v392_v60, %v388_v59  ;;  %vm546_vm10 = vmor %vm544_vm9, %vm545_vm8  ;;  %v599_v15 = vld [vmem:[#allocation2 + $0xc8] sm:$0xff]  ;;  %vm637_vm13 = vweird.f32 %v2743_v33  ;;  %685 = vmatpush.msra.mxu2 %v663_v48  ;;  %vm710_vm7 = vcmask 523264   ;;  %v984_v48 = vld [vmem:[#allocation2 + $0x200] sm:$0xff] }
 0x490   :  { %v541_v61 = vsub.f32 1.0, %v540_v57  ;;  %v395_v4 = vmul.f32 %v2974_v17, %v393_v62  ;;  %619 = vmatpush.msra.mxu1 %v599_v15  ;;  %v597_v17 = vld [vmem:[#allocation2 + $0xb8] sm:$0xff]  ;;  %v2699_v62 = vld [vmem:[#allocation2 + $0xe0] ss:$0 sm:$0xff]  ;;  %v34_v15 = vld [vmem:[%s3445_s0 + $0x30] sm:$0xff] }
 0x491   :  { %2587 = vmatmul.msk.f32.vlgmr.msrb.gmra.mxu2 %vm68_vm1, %v475_v58 }
 0x492   :  { %v542_v63 = vmul.f32 %v2741_v54, %v541_v61  ;;  %620 = vmatpush.msra.mxu1 %v598_v16  ;;  %686 = vmatpush.msra.mxu2 %v662_v49  ;;  %v2701_v16 = vld [vmem:[#allocation2 + $0x110] ss:$0 sm:$0xff]  ;;  %v1013_v49 = vld [vmem:[#allocation2 + $0x228] sm:$0xff] }
 0x494   :  { %v543_v0 = vadd.f32 %v2741_v54, %v542_v63  ;;  %621 = vmatpush.msra.mxu1 %v597_v17 }
 0x496   :  { %v398_v3 = vpop.permute.xlu1 %397  ;;  %v547_v5 = vsel %vm546_vm10, %v2741_v54, %v543_v0  ;;  %844 = vmatpush.msrb.mxu1 %v33_v30  ;;  %v792_v54 = vld [vmem:[#allocation2 + $0x190] sm:$0xff] }
 0x497   :  { %418 = vmatpush.msra.mxu0 %v398_v3  ;;  %v552_v8 = vsel %vm549_vm11, %v551_v6, %v547_v5  ;;  %v706_v5 = vld [vmem:[#allocation2 + $0x148] sm:$0xff]  ;;  %v705_v6 = vld [vmem:[#allocation2 + $0x140] sm:$0xff] }
 0x498   :  { %2584 = vmatmul.msk.f32.vlgmr.msra.gmra.mxu0 %vm68_vm1, %v395_v4  ;;  %v554_v9 = vmul.f32 %v2980_v25, %v552_v8  ;;  %845 = vmatpush.msrb.mxu1 %v32_v31  ;;  %v707_v4 = vld [vmem:[#allocation2 + $0x150] sm:$0xff] }
 0x499   :  { %v556_v7 = vpop.permute.xlu0 %555  ;;  %722 = vmatpush.msra.mxu3 %v707_v4  ;;  %v703_v8 = vld [vmem:[#allocation2 + $0x130] sm:$0xff] }
 0x49a   :  { %576 = vmatpush.msrb.mxu0 %v556_v7  ;;  %v704_v7 = vld [vmem:[#allocation2 + $0x138] sm:$0xff] }
 0x49b   :  { %723 = vmatpush.msra.mxu3 %v706_v5 }
 0x49c   :  { %813 = vmatpush.msra.mxu0 %v33_v30 }
 0x49d   :  { %v340_v10 = vpop.f32.mrf.mxu2  ;;  %724 = vmatpush.msra.mxu3 %v705_v6 }
 0x49e   :  { %814 = vmatpush.msra.mxu0 %v32_v31 }
 0x49f   :  { %725 = vmatpush.msra.mxu3 %v704_v7 }
 0x4a0   :  { %2590 = vmatmul.msk.f32.vlgmr.msrb.gmra.mxu0 %vm68_vm1, %v554_v9  ;;  %v702_v9 = vld [vmem:[#allocation2 + $0x128] sm:$0xff] }
 0x4a1   :  { %726 = vmatpush.msra.mxu3 %v703_v8 }
 0x4a3   :  { %727 = vmatpush.msra.mxu3 %v702_v9  ;;  %v2705_v9 = vld [vmem:[#allocation2 + $0x240] ss:$0 sm:$0xff] }
 0x4a8   :  { %2594 = vmatmul.msk.f32.vlgmr.msra.gmra.mxu0 %vm594_vm12, %v791_v40  ;;  %v948_v40 = vld [vmem:[#allocation2 + $0x1d0] sm:$0xff] }
 0x4b0   :  { %2595 = vmatmul.msk.f32.gmra.mxu0 %vm594_vm12, %v792_v54 }
 0x514   :  { %v499_v11 = vpop.f32.mrf.mxu2 }
 0x515   :  { %v420_v12 = vpop.f32.mrf.mxu0  ;;  %586 = vrot.lane.b32.xlu0 %v499_v11, %s2896_s27  ;;  %v700_v11 = vld [vmem:[#allocation2 + $0x118] sm:$0xff] }
 0x516   :  { %582 = vrot.lane.b32.xlu1 %v420_v12, %s2890_s15  ;;  %v874_v12 = vld [vmem:[#allocation2 + $0x1b0] sm:$0xf] }
 0x51d   :  { %v578_v13 = vpop.f32.mrf.mxu0 }
 0x51e   :  { %590 = vrot.lane.b32.xlu2 %v578_v13, %s2897_s28  ;;  %v875_v13 = vld [vmem:[#allocation2 + $0x1b8] sm:$0xf] }
 0x51f   :  { %2598 = vmatpush.msk.msrb.mxu2 %vm133_vm2, %v875_v13 }
 0x526   :  { %855 = vrot.lane.b32.xlu2 %v32_v31, %s2892_s21  ;;  %v816_v31 = vpop.f32.mrf.mxu0 }
 0x578   :  { %v591_v21 = vpop.permute.xlu2 %590 }
 0x587   :  { %v587_v19 = vpop.permute.xlu0 %586 }
 0x588   :  { %v583_v18 = vpop.permute.xlu1 %582 }
 0x589   :  { %v593_v20 = vsel %vm68_vm1, %v340_v10, %v583_v18  ;;  %v701_v10 = vld [vmem:[#allocation2 + $0x120] sm:$0xff]  ;;  %v35_v18 = vld [vmem:[%s3445_s0 + $0x38] sm:$0xff]  ;;  %s2899_s0 = smov [#allocation5]  }
 0x58a   :  { %v595_v22 = vsel %vm594_vm12, %v593_v20, %v587_v19  ;;  %728 = vmatpush.msra.mxu3 %v701_v10  ;;  %s2557_s9 = sshll.u32 %s2899_s0, 4  ;;  %s2558_s9 = int_to_ptr.vmem [resolvable:$true] %s2557_s9 }
 0x58b   :  { %v596_v23 = vsel %vm43_vm0, %v595_v22, %v591_v21  ;;  %v856_v21 = vpop.permute.xlu2 %855 }
 0x58c   :  { %2591 = vmatmul.msk.f32.vlgmr.msra.gmra.mxu1 %vm193_vm5, %v596_v23  ;;  %729 = vmatpush.msra.mxu3 %v700_v11 }
 0x58e   :  { %2601 = vmatpush.msk.msrb.mxu3 %vm133_vm2, %v874_v12 }
 0x590   :  { %932 = vmatpush.msrb.mxu3 %v873_v14 }
 0x594   :  { %2596 = vmatmul.msk.f32.vlgmr.msrb.gmra.mxu1 %vm594_vm12, %v822_v32 }
 0x59c   :  { %2597 = vmatmul.msk.f32.gmra.mxu1 %vm594_vm12, %v823_v34  ;;  %v819_v34 = vpop.f32.mrf.mxu0 }
 0x609   :  { %v623_v25 = vpop.f32.mrf.mxu1 }
 0x60a   :  { %v624_v26 = vadd.f32 %v2698_v24, %v623_v25 }
 0x60c   :  { %v626_v27 = vadd.f32 %v624_v26, %v2942_v37  ;;  %v633_v37 = vmul.f32 32.0, %v2743_v33 }
 0x60e   :  { %v629_v28 = vsel %vm193_vm5, %v626_v27, 0.0  ;;  %v634_v35 = vsub.f32 1.0, %v633_v37 }
 0x60f   :  { %630 = vadd.xlane.f32.xlu1 %v629_v28 }
 0x610   :  { %v635_v36 = vmul.f32 %v2743_v33, %v634_v35 }
 0x611   :  { %v847_v50 = vpop.f32.mrf.mxu1 }
 0x612   :  { %v636_v38 = vadd.f32 %v2743_v33, %v635_v36  ;;  %863 = vrot.lane.b32.xlu2 %v847_v50, %s2890_s15  ;;  %v983_v50 = vld [vmem:[#allocation2 + $0x1f8] sm:$0xff] }
 0x614   :  { %v3015_v39 = vsel %vm637_vm13, %v2743_v33, %v636_v38  ;;  %v869_v33 = vsel %vm124_vm3, %v816_v31, %v856_v21 }
 0x619   :  { %v850_v57 = vpop.f32.mrf.mxu1 }
 0x61a   :  { %857 = vrot.lane.b32.xlu2 %v33_v30, %s2892_s21 }
 0x622   :  { %865 = vrot.lane.b32.xlu2 %v850_v57, %s2890_s15 }
 0x66c   :  { %v864_v26 = vpop.permute.xlu2 %863 }
 0x66d   :  { %v871_v37 = vsel %vm68_vm1, %v869_v33, %v864_v26 }
 0x674   :  { %v858_v32 = vpop.permute.xlu2 %857 }
 0x675   :  { %v870_v35 = vsel %vm124_vm3, %v819_v34, %v858_v32  ;;  %v945_v34 = vld [vmem:[#allocation2 + $0x3c8] sm:$0xff] }
 0x67c   :  { %v866_v36 = vpop.permute.xlu2 %865 }
 0x67d   :  { %v872_v38 = vsel %vm68_vm1, %v870_v35, %v866_v36 }
 0x682   :  { %v631_v41 = vpop.xlane.xlu1 %630 }
 0x683   :  { %v639_v42 = vmul.f32 %v3015_v39, %v631_v41  ;;  %v951_v41 = vld [vmem:[#allocation2 + $0x1e8] sm:$0xff] }
 0x684   :  { %972 = vmatpush.msrb.mxu0 %v951_v41 }
 0x685   :  { %v640_v43 = vsub.f32 %v626_v27, %v639_v42  ;;  %v986_v42 = vld [vmem:[#allocation2 + $0x210] sm:$0xff] }
 0x686   :  { %1001 = vmatpush.msra.mxu1 %v986_v42 }
 0x687   :  { %v641_v44 = vmul.f32 %v640_v43, %v640_v43 }
 0x689   :  { %v642_v45 = vsel %vm193_vm5, %v641_v44, 0.0  ;;  %v950_v44 = vld [vmem:[#allocation2 + $0x1e0] sm:$0xff] }
 0x68a   :  { %643 = vadd.xlane.f32.xlu0 %v642_v45  ;;  %v985_v45 = vld [vmem:[#allocation2 + $0x208] sm:$0xff]  ;;  %973 = vmatpush.msrb.mxu0 %v950_v44 }
 0x68b   :  { %1002 = vmatpush.msra.mxu1 %v985_v45 }
 0x68c   :  { %974 = vmatpush.msrb.mxu0 %v949_v47 }
 0x68d   :  { %1003 = vmatpush.msra.mxu1 %v984_v48 }
 0x68e   :  { %975 = vmatpush.msrb.mxu0 %v948_v40 }
 0x68f   :  { %1004 = vmatpush.msra.mxu1 %v983_v50 }
 0x6fd   :  { %v644_v51 = vpop.xlane.xlu0 %643 }
 0x6fe   :  { %v645_v52 = vmul.f32 %v644_v51, %v3015_v39  ;;  %v1012_v51 = vld [vmem:[#allocation2 + $0x220] sm:$0xff] }
 0x700   :  { %v646_v53 = vadd.f32 1e-05, %v645_v52 }
 0x702   :  { %2744 = vrsqrt.f32 %v646_v53  ;;  %vm653_vm15 = vweird.f32 %v646_v53 }
 0x708   :  { %v2745_v55 = vpop.eup %2744 }
 0x709   :  { %v648_v56 = vmul.f32 %v2745_v55, %v646_v53  ;;  %vm654_vm14 = vweird.f32 %v2745_v55 }
 0x70a   :  { %vm655_vm6 = vmor %vm653_vm15, %vm654_vm14 }
 0x70b   :  { %v649_v58 = vmul.f32 %v2745_v55, %v648_v56 }
 0x70d   :  { %v650_v59 = vmul.f32 0.5, %v649_v58 }
 0x70f   :  { %v651_v60 = vsub.f32 1.5, %v650_v59 }
 0x711   :  { %v652_v61 = vmul.f32 %v2745_v55, %v651_v60  ;;  %v941_v60 = vld [vmem:[#allocation2 + $0x1c8] sm:$0xff] }
 0x713   :  { %v656_v63 = vsel %vm655_vm6, %v2745_v55, %v652_v61  ;;  %v940_v55 = vld [vmem:[#allocation2 + $0x1c0] sm:$0xff] }
 0x714   :  { %v657_v0 = vmul.f32 %v656_v63, %v640_v43  ;;  %v1015_v43 = vld [vmem:[#allocation2 + $0x238] sm:$0xff]  ;;  %v2703_v63 = vld [vmem:[#allocation2 + $0x1f0] ss:$0 sm:$0xff] }
 0x716   :  { %v659_v2 = vmul.f32 %v2699_v62, %v657_v0  ;;  %v2704_v0 = vld [vmem:[#allocation2 + $0x218] ss:$0 sm:$0xff] }
 0x718   :  { %v3025_v3 = vadd.f32 %v2700_v1, %v659_v2 }
 0x71a   :  { %2592 = vmatmul.msk.f32.vlgmr.msra.gmra.mxu2 %vm193_vm5, %v3025_v3 }
 0x71b   :  { %1030 = vmatpush.msra.mxu2 %v1015_v43 }
 0x71d   :  { %1031 = vmatpush.msra.mxu2 %v1014_v46 }
 0x71f   :  { %1032 = vmatpush.msra.mxu2 %v1013_v49 }
 0x721   :  { %1033 = vmatpush.msra.mxu2 %v1012_v51 }
 0x722   :  { %2599 = vmatmul.msk.f32.vlgmr.msrb.gmra.mxu2 %vm124_vm3, %v34_v15 }
 0x72a   :  { %2600 = vmatmul.msk.f32.gmra.mxu2 %vm124_vm3, %v35_v18 }
 0x79d   :  { %v688_v17 = vpop.f32.mrf.mxu2 }
 0x79e   :  { %v689_v19 = vadd.f32 %v2701_v16, %v688_v17 }
 0x7a0   :  { %v692_v20 = vmul.f32 %v689_v19, %v689_v19  ;;  %v691_v28 = vmul.f32 0.5, %v689_v19 }
 0x7a2   :  { %v693_v22 = vmul.f32 %v692_v20, %v689_v19 }
 0x7a4   :  { %v694_v23 = vmul.f32 0.044715, %v693_v22 }
 0x7a5   :  { %v902_v53 = vpop.f32.mrf.mxu2 }
 0x7a6   :  { %v695_v24 = vadd.f32 %v694_v23, %v689_v19 }
 0x7a8   :  { %v696_v25 = vmul.f32 0.7978846, %v695_v24 }
 0x7aa   :  { %2746 = vtanh.f32 %v696_v25 }
 0x7ad   :  { %v905_v58 = vpop.f32.mrf.mxu2 }
 0x7b0   :  { %v2747_v27 = vpop.eup %2746 }
 0x7b1   :  { %v698_v29 = vadd.f32 1.0, %v2747_v27 }
 0x7b3   :  { %v699_v30 = vmul.f32 %v698_v29, %v691_v28  ;;  %v944_v28 = vld [vmem:[#allocation2 + $0x3c0] sm:$0xff] }
 0x7b5   :  { %2593 = vmatmul.msk.f32.vlgmr.msra.gmra.mxu3 %vm710_vm7, %v699_v30 }
 0x7bd   :  { %2602 = vmatmul.msk.f32.vlgmr.msrb.gmra.mxu3 %vm157_vm4, %v871_v37 }
 0x7c5   :  { %2603 = vmatmul.msk.f32.gmra.mxu3 %vm157_vm4, %v872_v38 }
 0x838   :  { %v3046_v52 = vpop.f32.mrf.mxu3 }
 0x840   :  { %v934_v54 = vpop.f32.mrf.mxu3 }
 0x841   :  { %v935_v56 = vadd.f32 %v934_v54, %v902_v53 }
 0x843   :  { %v3048_v57 = vadd.f32 %v940_v55, %v935_v56 }
 0x845   :  { %2604 = vmatmul.msk.f32.vlgmr.msrb.gmra.mxu0 %vm193_vm5, %v3048_v57  ;;  %2606 = vmatmul.msk.f32.vlgmr.msra.gmra.mxu1 %vm193_vm5, %v3048_v57 }
 0x846   :  { %2608 = vmatmul.msk.f32.vlgmr.msra.gmra.mxu2 %vm193_vm5, %v3048_v57 }
 0x848   :  { %v937_v59 = vpop.f32.mrf.mxu3 }
 0x849   :  { %v938_v61 = vadd.f32 %v937_v59, %v905_v58 }
 0x84b   :  { %v3056_v62 = vadd.f32 %v941_v60, %v938_v61 }
 0x84d   :  { %2607 = vmatmul.msk.f32.gmra.mxu1 %vm193_vm5, %v3056_v62  ;;  %2605 = vmatmul.msk.f32.gmra.mxu0 %vm193_vm5, %v3056_v62 }
 0x84e   :  { %2609 = vmatmul.msk.f32.gmra.mxu2 %vm193_vm5, %v3056_v62 }
 0x8c2   :  { %v977_v1 = vpop.f32.mrf.mxu0  ;;  %v1006_v2 = vpop.f32.mrf.mxu1 }
 0x8c3   :  { %v978_v4 = vadd.f32 %v2703_v63, %v977_v1  ;;  %v1007_v5 = vadd.f32 %v2704_v0, %v1006_v2 }
 0x8c5   :  { %1159 = vrot.lane.b32.xlu1 %v1007_v5, %s2894_s25  ;;  %1155 = vrot.lane.b32.xlu0 %v978_v4, %s2894_s25 }
 0x8c9   :  { %v1035_v6 = vpop.f32.mrf.mxu2 }
 0x8ca   :  { %v1009_v7 = vpop.f32.mrf.mxu1  ;;  %v980_v10 = vpop.f32.mrf.mxu0  ;;  %v1036_v12 = vadd.f32 %v2705_v9, %v1035_v6 }
 0x8cb   :  { %v1010_v8 = vadd.f32 %v2704_v0, %v1009_v7  ;;  %v981_v14 = vadd.f32 %v2703_v63, %v980_v10 }
 0x8cd   :  { %1161 = vrot.lane.b32.xlu2 %v1010_v8, %s2894_s25  ;;  %2610 = vmatpush.xpose.msk.msra.mxu3 %vm68_vm1, %v1010_v8 }
 0x8ce   :  { %1409 = vrot.lane.b32.xlu1 %v1007_v5, %s2893_s24  ;;  %1285 = vrot.lane.b32.xlu0 %v1007_v5, %s2895_s26 }
 0x8d1   :  { %v1038_v11 = vpop.f32.mrf.mxu2  ;;  %2611 = vmatpush.xpose.msk.msra.mxu3 %vm68_vm1, %v1007_v5 }
 0x8d2   :  { %v1039_v13 = vadd.f32 %v2705_v9, %v1038_v11 }
 0x8d4   :  { %1146 = vmatpush.msra.mxu0 %v1039_v13  ;;  %2612 = vmatmul.msk.f32.vlgmr.msra.gmra.mxu3 %vm68_vm1, %v978_v4  ;;  %v3072_v15 = vpack.i.bf16 %v1036_v12, %v1039_v13 }
 0x8d5   :  { %1157 = vrot.lane.b32.xlu2 %v981_v14, %s2894_s25 }
 0x8d6   :  { %1147 = vmatpush.msra.mxu0 %v1036_v12  ;;  %1283 = vrot.lane.b32.xlu1 %v981_v14, %s2895_s26 }
 0x8d7   :  { %1405 = vrot.lane.b32.xlu0 %v978_v4, %s2893_s24 }
 0x8dc   :  { %2613 = vmatmul.msk.f32.gmra.mxu3 %vm68_vm1, %v981_v14 }
 0x8dd   :  { %1287 = vrot.lane.b32.xlu2 %v1010_v8, %s2895_s26 }
 0x8e5   :  { %1411 = vrot.lane.b32.xlu2 %v1010_v8, %s2893_s24 }
 0x8ed   :  { %1281 = vrot.lane.b32.xlu2 %v978_v4, %s2895_s26 }
 0x8f5   :  { %1407 = vrot.lane.b32.xlu2 %v981_v14, %s2893_s24 }
 0x927   :  { %v1162_v16 = vpop.permute.xlu2 %1161 }
 0x928   :  { %2616 = vmatpush.xpose.msk.msrb.mxu1 %vm68_vm1, %v1162_v16 }
 0x92f   :  { %v1158_v17 = vpop.permute.xlu2 %1157 }
 0x937   :  { %v1160_v18 = vpop.permute.xlu1 %1159  ;;  %v1288_v19 = vpop.permute.xlu2 %1287 }
 0x938   :  { %v1156_v20 = vpop.permute.xlu0 %1155  ;;  %2617 = vmatpush.xpose.msk.msrb.mxu1 %vm68_vm1, %v1160_v18  ;;  %2622 = vmatpush.xpose.msk.msrb.mxu3 %vm68_vm1, %v1288_v19 }
 0x93b   :  { %2618 = vmatmul.msk.f32.vlgmr.msrb.gmra.mxu1 %vm68_vm1, %v1156_v20 }
 0x93f   :  { %v1412_v21 = vpop.permute.xlu2 %1411 }
 0x940   :  { %v1286_v22 = vpop.permute.xlu0 %1285  ;;  %2628 = vmatpush.xpose.msk.msra.mxu1 %vm68_vm1, %v1412_v21  ;;  %v1410_v23 = vpop.permute.xlu1 %1409 }
 0x941   :  { %2623 = vmatpush.xpose.msk.msrb.mxu3 %vm68_vm1, %v1286_v22 }
 0x943   :  { %2619 = vmatmul.msk.f32.gmra.mxu1 %vm68_vm1, %v1158_v17 }
 0x944   :  { %2629 = vmatpush.xpose.msk.msra.mxu1 %vm68_vm1, %v1410_v23 }
 0x947   :  { %v1282_v24 = vpop.permute.xlu2 %1281 }
 0x948   :  { %2624 = vmatmul.msk.f32.vlgmr.msrb.gmra.mxu3 %vm68_vm1, %v1282_v24  ;;  %v1284_v26 = vpop.permute.xlu1 %1283 }
 0x949   :  { %v1406_v25 = vpop.permute.xlu0 %1405 }
 0x94b   :  { %2630 = vmatmul.msk.f32.vlgmr.msra.gmra.mxu1 %vm68_vm1, %v1406_v25 }
 0x94f   :  { %v1408_v27 = vpop.permute.xlu2 %1407 }
 0x950   :  { %2625 = vmatmul.msk.f32.gmra.mxu3 %vm68_vm1, %v1284_v26 }
 0x953   :  { %2631 = vmatmul.msk.f32.gmra.mxu1 %vm68_vm1, %v1408_v27 }
 0x957   :  { %v1070_v29 = vpop.f32.mrf.mxu3 }
 0x958   :  { %v1071_v30 = vadd.f32 %v1070_v29, %v944_v28 }
 0x95a   :  { %v1076_v31 = vsel %vm594_vm12, %v1071_v30, -inf }
 0x95b   :  { %1077 = vmax.xlane.f32.xlu1 %v1076_v31 }
 0x95f   :  { %v1073_v35 = vpop.f32.mrf.mxu3 }
 0x960   :  { %v1074_v36 = vadd.f32 %v1073_v35, %v945_v34 }
 0x962   :  { %v1079_v43 = vsel %vm594_vm12, %v1074_v36, -inf }
 0x9b8   :  { %v1188_v32 = vpop.f32.mrf.mxu1 }
 0x9b9   :  { %v1189_v33 = vadd.f32 %v1188_v32, %v944_v28 }
 0x9bb   :  { %v1194_v37 = vsel %vm594_vm12, %v1189_v33, -inf }
 0x9bc   :  { %1195 = vmax.xlane.f32.xlu0 %v1194_v37 }
 0x9c0   :  { %v1191_v38 = vpop.f32.mrf.mxu1 }
 0x9c1   :  { %v1192_v41 = vadd.f32 %v1191_v38, %v945_v34 }
 0x9c3   :  { %v1197_v42 = vsel %vm594_vm12, %v1192_v41, -inf }
 0x9c4   :  { %1198 = vmax.xlane.f32.xlu2 %v1197_v42  ;;  %1080 = vmax.xlane.f32.xlu0 %v1079_v43 }
 0x9c8   :  { %v1438_v44 = vpop.f32.mrf.mxu1 }
 0x9c9   :  { %v1439_v45 = vadd.f32 %v1438_v44, %v944_v28 }
 0x9cb   :  { %v1314_v46 = vpop.f32.mrf.mxu3  ;;  %v1444_v47 = vsel %vm594_vm12, %v1439_v45, -inf }
 0x9cc   :  { %v1315_v48 = vadd.f32 %v1314_v46, %v944_v28  ;;  %1445 = vmax.xlane.f32.xlu1 %v1444_v47 }
 0x9ce   :  { %v1078_v49 = vpop.xlane.xlu1 %1077  ;;  %v1320_v40 = vsel %vm594_vm12, %v1315_v48, -inf }
 0x9cf   :  { %v1082_v50 = vsub.f32 %v1071_v30, %v1078_v49  ;;  %1321 = vmax.xlane.f32.xlu2 %v1320_v40 }
 0x9d0   :  { %v1441_v51 = vpop.f32.mrf.mxu1 }
 0x9d1   :  { %v1084_v53 = vmul.f32 1.442695, %v1082_v50  ;;  %v1442_v54 = vadd.f32 %v1441_v51, %v945_v34 }
 0x9d3   :  { %2748 = vpow2.f32 %v1084_v53  ;;  %v1317_v55 = vpop.f32.mrf.mxu3  ;;  %v1447_v56 = vsel %vm594_vm12, %v1442_v54, -inf }
 0x9d4   :  { %v1318_v58 = vadd.f32 %v1317_v55, %v945_v34  ;;  %1448 = vmax.xlane.f32.xlu0 %v1447_v56 }
 0x9d6   :  { %v1323_v59 = vsel %vm594_vm12, %v1318_v58, -inf }
 0x9d7   :  { %1324 = vmax.xlane.f32.xlu1 %v1323_v59 }
 0x9d9   :  { %v3102_v60 = vpop.eup %2748 }
 0x9da   :  { %v1088_v61 = vsel %vm594_vm12, %v3102_v60, 0.0 }
 0x9dc   :  { %1089 = vadd.xlane.f32.xlu0 %v1088_v61 }
 0xa2f   :  { %v1196_v63 = vpop.xlane.xlu0 %1195 }
 0xa30   :  { %v1200_v7 = vsub.f32 %v1189_v33, %v1196_v63 }
 0xa32   :  { %v1202_v8 = vmul.f32 1.442695, %v1200_v7 }
 0xa37   :  { %v1199_v0 = vpop.xlane.xlu2 %1198  ;;  %v1081_v1 = vpop.xlane.xlu0 %1080 }
 0xa38   :  { %v1201_v2 = vsub.f32 %v1192_v41, %v1199_v0  ;;  %v1083_v4 = vsub.f32 %v1074_v36, %v1081_v1 }
 0xa3a   :  { %v1204_v5 = vmul.f32 1.442695, %v1201_v2  ;;  %v1086_v6 = vmul.f32 1.442695, %v1083_v4 }
 0xa3c   :  { %2750 = vpow2.f32 %v1204_v5 }
 0xa3d   :  { %2752 = vpow2.f32 %v1086_v6 }
 0xa3e   :  { %2754 = vpow2.f32 %v1202_v8 }
 0xa3f   :  { %v1446_v9 = vpop.xlane.xlu1 %1445 }
 0xa40   :  { %v1450_v10 = vsub.f32 %v1439_v45, %v1446_v9 }
 0xa42   :  { %v3106_v11 = vpop.eup %2750  ;;  %v1452_v12 = vmul.f32 1.442695, %v1450_v10  ;;  %v1322_v13 = vpop.xlane.xlu2 %1321 }
 0xa43   :  { %v3108_v14 = vpop.eup %2752  ;;  %v1326_v16 = vsub.f32 %v1315_v48, %v1322_v13  ;;  %v1209_v17 = vsel %vm594_vm12, %v3106_v11, 0.0 }
 0xa44   :  { %2756 = vpow2.f32 %v1452_v12  ;;  %v1091_v18 = vsel %vm594_vm12, %v3108_v14, 0.0  ;;  %1210 = vadd.xlane.f32.xlu1 %v1209_v17  ;;  %v3114_v22 = vpop.eup %2754 }
 0xa45   :  { %1092 = vadd.xlane.f32.xlu2 %v1091_v18  ;;  %v1328_v19 = vmul.f32 1.442695, %v1326_v16  ;;  %v1206_v28 = vsel %vm594_vm12, %v3114_v22, 0.0 }
 0xa47   :  { %v1449_v20 = vpop.xlane.xlu0 %1448  ;;  %2758 = vpow2.f32 %v1328_v19 }
 0xa48   :  { %v1451_v21 = vsub.f32 %v1442_v54, %v1449_v20 }
 0xa4a   :  { %v3116_v23 = vpop.eup %2756  ;;  %v1454_v24 = vmul.f32 1.442695, %v1451_v21  ;;  %v1325_v25 = vpop.xlane.xlu1 %1324 }
 0xa4b   :  { %v1327_v26 = vsub.f32 %v1318_v58, %v1325_v25  ;;  %v1456_v27 = vsel %vm594_vm12, %v3116_v23, 0.0 }
 0xa4c   :  { %2760 = vpow2.f32 %v1454_v24  ;;  %1457 = vadd.xlane.f32.xlu0 %v1456_v27 }
 0xa4d   :  { %1207 = vadd.xlane.f32.xlu2 %v1206_v28  ;;  %v1330_v29 = vmul.f32 1.442695, %v1327_v26  ;;  %v3122_v31 = vpop.eup %2758 }
 0xa4e   :  { %v1332_v37 = vsel %vm594_vm12, %v3122_v31, 0.0 }
 0xa4f   :  { %v1090_v30 = vpop.xlane.xlu0 %1089 }
 0xa50   :  { %2762 = vrcp.f32 %v1090_v30  ;;  %v1105_v41 = vand.u32 2147483648, %v1090_v30  ;;  %v1103_v43 = vand.u32 2147483647, %v1090_v30  ;;  %vm1099_vm8 = vweird.f32 %v1090_v30 }
 0xa51   :  { %2764 = vpow2.f32 %v1330_v29 }
 0xa52   :  { %v3124_v32 = vpop.eup %2760  ;;  %v1106_v46 = vor.u32 1.1754944e-38, %v1105_v41  ;;  %vm1104_vm10 = vcmp.eq.f32.partialorder %v1103_v43, 8.507059e+37 }
 0xa53   :  { %v1459_v33 = vsel %vm594_vm12, %v3124_v32, 0.0 }
 0xa54   :  { %1460 = vadd.xlane.f32.xlu0 %v1459_v33 }
 0xa55   :  { %1333 = vadd.xlane.f32.xlu2 %v1332_v37 }
 0xa56   :  { %v2763_v34 = vpop.eup %2762 }
 0xa57   :  { %v1095_v35 = vmul.f32 %v2763_v34, %v1090_v30  ;;  %v3130_v36 = vpop.eup %2764  ;;  %vm1100_vm4 = vweird.f32 %v2763_v34 }
 0xa58   :  { %v1335_v44 = vsel %vm594_vm12, %v3130_v36, 0.0  ;;  %vm1101_vm9 = vmor %vm1099_vm8, %vm1100_vm4 }
 0xa59   :  { %v1096_v38 = vsub.f32 1.0, %v1095_v35 }
 0xa5b   :  { %v1097_v42 = vmul.f32 %v2763_v34, %v1096_v38 }
 0xa5d   :  { %v1098_v45 = vadd.f32 %v2763_v34, %v1097_v42  ;;  %1336 = vadd.xlane.f32.xlu2 %v1335_v44  ;;  %2681 = vrot.lane.b32.xlu1 %v3072_v15, %s2894_s25 }
 0xa5f   :  { %v1102_v47 = vsel %vm1101_vm9, %v2763_v34, %v1098_v45 }
 0xa60   :  { %v1107_v48 = vsel %vm1104_vm10, %v1106_v46, %v1102_v47 }
 0xa61   :  { %v1124_v49 = vmul.f32 %v3102_v60, %v1107_v48  ;;  %v1559_v48 = vld [vmem:[#allocation2 + $0x248] sm:$0xff] }
 0xa63   :  { %2614 = vmatmul.msk.f32.vlgmr.msra.gmra.mxu0 %vm594_vm12, %v1124_v49 }
 0xa68   :  { %2686 = vrot.lane.b32.xlu0 %v3072_v15, %s2893_s24 }
 0xa75   :  { %2691 = vrot.lane.b32.xlu2 %v3072_v15, %s2895_s26 }
 0xab7   :  { %v3142_v50 = vpop.xlane.xlu1 %1210 }
 0xab8   :  { %v1093_v40 = vpop.xlane.xlu2 %1092  ;;  %v1238_v37 = vand.u32 2147483648, %v3142_v50  ;;  %v1236_v45 = vand.u32 2147483647, %v3142_v50 }
 0xab9   :  { %2766 = vrcp.f32 %v1093_v40  ;;  %v1120_v60 = vand.u32 2147483648, %v1093_v40  ;;  %v1118_v61 = vand.u32 2147483647, %v1093_v40  ;;  %vm1114_vm13 = vweird.f32 %v1093_v40 }
 0xaba   :  { %2768 = vrcp.f32 %v3142_v50 }
 0xabb   :  { %v1121_v4 = vor.u32 1.1754944e-38, %v1120_v60  ;;  %vm1119_vm15 = vcmp.eq.f32.partialorder %v1118_v61, 8.507059e+37 }
 0xabf   :  { %v2767_v51 = vpop.eup %2766  ;;  %v3145_v55 = vpop.xlane.xlu0 %1457 }
 0xac0   :  { %v1110_v53 = vmul.f32 %v2767_v51, %v1093_v40  ;;  %v1208_v54 = vpop.xlane.xlu2 %1207  ;;  %v3147_v58 = vpop.eup %2768  ;;  %vm1115_vm11 = vweird.f32 %v2767_v51 }
 0xac1   :  { %2770 = vrcp.f32 %v1208_v54  ;;  %v1228_v0 = vmul.f32 %v3147_v58, %v3142_v50  ;;  %vm1116_vm14 = vmor %vm1114_vm13, %vm1115_vm11  ;;  %v1223_v13 = vand.u32 2147483648, %v1208_v54  ;;  %v1221_v17 = vand.u32 2147483647, %v1208_v54 }
 0xac2   :  { %v1111_v56 = vsub.f32 1.0, %v1110_v53  ;;  %2772 = vrcp.f32 %v3145_v55  ;;  %vm1217_vm4 = vweird.f32 %v1208_v54  ;;  %vm1233_vm10 = vweird.f32 %v3147_v58 }
 0xac3   :  { %v1229_v8 = vsub.f32 1.0, %v1228_v0  ;;  %v1224_v26 = vor.u32 1.1754944e-38, %v1223_v13  ;;  %vm1222_vm9 = vcmp.eq.f32.partialorder %v1221_v17, 8.507059e+37  ;;  %vm1232_vm13 = vweird.f32 %v3142_v50 }
 0xac4   :  { %v1112_v59 = vmul.f32 %v2767_v51, %v1111_v56  ;;  %v1239_v50 = vor.u32 1.1754944e-38, %v1238_v37 }
 0xac5   :  { %v1230_v21 = vmul.f32 %v3147_v58, %v1229_v8 }
 0xac6   :  { %v1113_v15 = vadd.f32 %v2767_v51, %v1112_v59  ;;  %v1473_v59 = vand.u32 2147483648, %v3145_v55 }
 0xac7   :  { %v2771_v63 = vpop.eup %2770  ;;  %v3154_v9 = vpop.xlane.xlu0 %1460  ;;  %v1231_v35 = vadd.f32 %v3147_v58, %v1230_v21 }
 0xac8   :  { %v1213_v1 = vmul.f32 %v2771_v63, %v1208_v54  ;;  %v1334_v2 = vpop.xlane.xlu2 %1333  ;;  %v1117_v6 = vsel %vm1116_vm14, %v2767_v51, %v1113_v15  ;;  %v3152_v7 = vpop.eup %2772  ;;  %vm1218_vm6 = vweird.f32 %v2771_v63 }
 0xac9   :  { %2774 = vrcp.f32 %v1334_v2  ;;  %v1122_v10 = vsel %vm1119_vm15, %v1121_v4, %v1117_v6  ;;  %v1463_v19 = vmul.f32 %v3152_v7, %v3145_v55  ;;  %vm1219_vm8 = vmor %vm1217_vm4, %vm1218_vm6  ;;  %v1349_v34 = vand.u32 2147483648, %v1334_v2 }
 0xaca   :  { %v1214_v5 = vsub.f32 1.0, %v1213_v1  ;;  %v1125_v16 = vmul.f32 %v3108_v14, %v1122_v10  ;;  %2776 = vrcp.f32 %v3154_v9  ;;  %v1347_v42 = vand.u32 2147483647, %v1334_v2  ;;  %vm3174_vm15 = vmor %vm1232_vm13, %vm1233_vm10 }
 0xacb   :  { %v1464_v29 = vsub.f32 1.0, %v1463_v19  ;;  %vm1343_vm14 = vweird.f32 %v1334_v2  ;;  %v1350_v40 = vor.u32 1.1754944e-38, %v1349_v34  ;;  %v1474_v19 = vor.u32 1.1754944e-38, %v1473_v59 }
 0xacc   :  { %v1215_v12 = vmul.f32 %v2771_v63, %v1214_v5  ;;  %2615 = vmatmul.msk.f32.gmra.mxu0 %vm594_vm12, %v1125_v16  ;;  %vm1348_vm4 = vcmp.eq.f32.partialorder %v1347_v42, 8.507059e+37 }
 0xacd   :  { %v1465_v46 = vmul.f32 %v3152_v7, %v1464_v29 }
 0xace   :  { %v1216_v18 = vadd.f32 %v2771_v63, %v1215_v12  ;;  %v1471_v12 = vand.u32 2147483647, %v3145_v55 }
 0xacf   :  { %v2775_v20 = vpop.eup %2774  ;;  %v2682_v24 = vpop.permute.xlu1 %2681  ;;  %v1466_v61 = vadd.f32 %v3152_v7, %v1465_v46  ;;  %v1561_v46 = vld [vmem:[#allocation2 + $0x258] sm:$0xff] }
 0xad0   :  { %v1220_v25 = vsel %vm1219_vm8, %v2771_v63, %v1216_v18  ;;  %v1339_v27 = vmul.f32 %v2775_v20, %v1334_v2  ;;  %v3162_v28 = vpop.xlane.xlu2 %1336  ;;  %v2683_v33 = vunpack.i.l.bf16 %v2682_v24  ;;  %v3168_v38 = vpop.eup %2776  ;;  %vm1344_vm11 = vweird.f32 %v2775_v20 }
 0xad1   :  { %2778 = vrcp.f32 %v3162_v28  ;;  %v1225_v14 = vsel %vm1222_vm9, %v1224_v26, %v1220_v25  ;;  %v2684_v43 = vunpack.i.h.bf16 %v2682_v24  ;;  %vm1345_vm6 = vmor %vm1343_vm14, %vm1344_vm11  ;;  %v1478_v51 = vmul.f32 %v3168_v38, %v3154_v9 }
 0xad2   :  { %v1340_v30 = vsub.f32 1.0, %v1339_v27  ;;  %1272 = vmatpush.msrb.mxu2 %v2683_v33  ;;  %v1242_v44 = vmul.f32 %v3114_v22, %v1225_v14  ;;  %v1235_v22 = vsel %vm3174_vm15, %v3147_v58, %v1231_v35  ;;  %vm1237_vm8 = vcmp.eq.f32.partialorder %v1236_v45, 8.507059e+37  ;;  %v1562_v45 = vld [vmem:[#allocation2 + $0x260] sm:$0xff] }
 0xad3   :  { %vm1468_vm9 = vweird.f32 %v3152_v7  ;;  %v1240_v1 = vsel %vm1237_vm8, %v1239_v50, %v1235_v22  ;;  %v1479_v2 = vsub.f32 1.0, %v1478_v51  ;;  %v1364_v58 = vand.u32 2147483648, %v3162_v28  ;;  %1583 = vmatpush.msra.mxu3 %v1562_v45  ;;  %v1649_v45 = vld [vmem:[#allocation2 + $0x288] sm:$0xff] }
 0xad4   :  { %v1341_v41 = vmul.f32 %v2775_v20, %v1340_v30  ;;  %1273 = vmatpush.msrb.mxu2 %v2684_v43  ;;  %v1362_v10 = vand.u32 2147483647, %v3162_v28  ;;  %vm1467_vm11 = vweird.f32 %v3145_v55  ;;  %v1243_v13 = vmul.f32 %v3106_v11, %v1240_v1 }
 0xad5   :  { %2620 = vmatmul.msk.f32.vlgmr.msrb.gmra.mxu2 %vm594_vm12, %v1242_v44  ;;  %vm3196_vm13 = vmor %vm1467_vm11, %vm1468_vm9  ;;  %vm1358_vm14 = vweird.f32 %v3162_v28  ;;  %v1480_v18 = vmul.f32 %v3168_v38, %v1479_v2  ;;  %v1365_v11 = vor.u32 1.1754944e-38, %v1364_v58  ;;  %vm1483_vm8 = vweird.f32 %v3168_v38  ;;  %1584 = vmatpush.msra.mxu3 %v1561_v46  ;;  %v2706_v2 = vld [vmem:[#allocation2 + $0x268] ss:$0 sm:$0xff]  ;;  %v1648_v46 = vld [vmem:[#allocation2 + $0x280] sm:$0xff] }
 0xad6   :  { %v1342_v47 = vadd.f32 %v2775_v20, %v1341_v41  ;;  %v1470_v55 = vsel %vm3196_vm13, %v3152_v7, %v1466_v61  ;;  %v1488_v7 = vand.u32 2147483648, %v3154_v9  ;;  %vm1482_vm9 = vweird.f32 %v3154_v9 }
 0xad7   :  { %v2779_v49 = vpop.eup %2778  ;;  %v1481_v25 = vadd.f32 %v3168_v38, %v1480_v18 }
 0xad8   :  { %v1346_v53 = vsel %vm1345_vm6, %v2775_v20, %v1342_v47  ;;  %v1354_v54 = vmul.f32 %v2779_v49, %v3162_v28  ;;  %v2692_v56 = vpop.permute.xlu2 %2691  ;;  %vm1359_vm10 = vweird.f32 %v2779_v49  ;;  %vm1363_vm6 = vcmp.eq.f32.partialorder %v1362_v10, 8.507059e+37  ;;  %v1560_v47 = vld [vmem:[#allocation2 + $0x250] sm:$0xff] }
 0xad9   :  { %v1351_v60 = vsel %vm1348_vm4, %v1350_v40, %v1346_v53  ;;  %v2693_v15 = vunpack.i.l.bf16 %v2692_v56  ;;  %v2694_v4 = vunpack.i.h.bf16 %v2692_v56  ;;  %vm1360_vm15 = vmor %vm1358_vm14, %vm1359_vm10  ;;  %vm1472_vm4 = vcmp.eq.f32.partialorder %v1471_v12, 8.507059e+37  ;;  %1585 = vmatpush.msra.mxu3 %v1560_v47 }
 0xada   :  { %v1355_v63 = vsub.f32 1.0, %v1354_v54  ;;  %v2687_v0 = vpop.permute.xlu0 %2686  ;;  %v1368_v8 = vmul.f32 %v3122_v31, %v1351_v60  ;;  %v1475_v24 = vsel %vm1472_vm4, %v1474_v19, %v1470_v55  ;;  %v1486_v28 = vand.u32 2147483647, %v3154_v9  ;;  %vm1484_vm10 = vmor %vm1482_vm9, %vm1483_vm8 }
 0xadb   :  { %v2688_v5 = vunpack.i.l.bf16 %v2687_v0  ;;  %1396 = vmatpush.msrb.mxu0 %v2693_v15  ;;  %v2689_v31 = vunpack.i.h.bf16 %v2687_v0  ;;  %v1492_v27 = vmul.f32 %v3116_v23, %v1475_v24  ;;  %v1485_v14 = vsel %vm1484_vm10, %v3168_v38, %v1481_v25  ;;  %1586 = vmatpush.msra.mxu3 %v1559_v48 }
 0xadc   :  { %v1356_v6 = vmul.f32 %v2779_v49, %v1355_v63  ;;  %v1489_v29 = vor.u32 1.1754944e-38, %v1488_v7  ;;  %vm1487_vm11 = vcmp.eq.f32.partialorder %v1486_v28, 8.507059e+37 }
 0xadd   :  { %1397 = vmatpush.msrb.mxu0 %v2694_v4  ;;  %1520 = vmatpush.msra.mxu2 %v2688_v5 }
 0xade   :  { %2626 = vmatmul.msk.f32.vlgmr.msrb.gmra.mxu0 %vm594_vm12, %v1368_v8  ;;  %v1357_v17 = vadd.f32 %v2779_v49, %v1356_v6  ;;  %2621 = vmatmul.msk.f32.gmra.mxu2 %vm594_vm12, %v1243_v13  ;;  %v1490_v30 = vsel %vm1487_vm11, %v1489_v29, %v1485_v14 }
 0xadf   :  { %1521 = vmatpush.msra.mxu2 %v2689_v31  ;;  %v1493_v33 = vmul.f32 %v3124_v32, %v1490_v30  ;;  %v2702_v32 = vld [vmem:[#allocation2 + $0x158] ss:$0 sm:$0xff] }
 0xae0   :  { %v1361_v20 = vsel %vm1360_vm15, %v2779_v49, %v1357_v17  ;;  %v732_v42 = vadd.f32 %v2702_v32, %v3046_v52 }
 0xae1   :  { %v1366_v21 = vsel %vm1363_vm6, %v1365_v11, %v1361_v20  ;;  %v2707_v11 = vld [vmem:[#allocation2 + $0x160] ss:$0 sm:$0xff]  ;;  %v2708_v20 = vld [vmem:[#allocation2 + $0x168] ss:$0 sm:$0xff] }
 0xae2   :  { %v1369_v26 = vmul.f32 %v3130_v36, %v1366_v21  ;;  %v1149_v36 = vpop.f32.mrf.mxu0  ;;  %v734_v43 = vadd.f32 %v732_v42, %v3025_v3 }
 0xae4   :  { %v737_v44 = vsel %vm193_vm5, %v734_v43, 0.0 }
 0xae6   :  { %2627 = vmatmul.msk.f32.gmra.mxu0 %vm594_vm12, %v1369_v26  ;;  %2632 = vmatmul.msk.f32.vlgmr.msra.gmra.mxu2 %vm594_vm12, %v1492_v27 }
 0xaee   :  { %2633 = vmatmul.msk.f32.gmra.mxu2 %vm594_vm12, %v1493_v33 }
 0xb49   :  { %v1152_v37 = vpop.f32.mrf.mxu0 }
 0xb58   :  { %v1275_v34 = vpop.f32.mrf.mxu2 }
 0xb59   :  { %1531 = vrot.lane.b32.xlu1 %v1275_v34, %s2890_s15 }
 0xb5b   :  { %v1399_v23 = vpop.f32.mrf.mxu0 }
 0xb61   :  { %v1278_v9 = vpop.f32.mrf.mxu2  ;;  %1539 = vrot.lane.b32.xlu1 %v1399_v23, %s2896_s27 }
 0xb63   :  { %v1402_v38 = vpop.f32.mrf.mxu0 }
 0xb69   :  { %v1523_v35 = vpop.f32.mrf.mxu2  ;;  %1533 = vrot.lane.b32.xlu1 %v1278_v9, %s2890_s15 }
 0xb6a   :  { %1547 = vrot.lane.b32.xlu0 %v1523_v35, %s2897_s28 }
 0xb71   :  { %v1526_v41 = vpop.f32.mrf.mxu2 }
 0xb72   :  { %1541 = vrot.lane.b32.xlu0 %v1402_v38, %s2896_s27  ;;  %1549 = vrot.lane.b32.xlu2 %v1526_v41, %s2897_s28 }
 0xb93   :  { %738 = vadd.xlane.f32.xlu1 %v737_v44  ;;  %v1650_v44 = vld [vmem:[#allocation2 + $0x290] sm:$0xff] }
 0xbcb   :  { %v1532_v49 = vpop.permute.xlu1 %1531 }
 0xbcc   :  { %v1553_v51 = vsel %vm68_vm1, %v1149_v36, %v1532_v49  ;;  %v1550_v56 = vpop.permute.xlu2 %1549 }
 0xbd3   :  { %v1540_v40 = vpop.permute.xlu1 %1539 }
 0xbd4   :  { %v1555_v22 = vsel %vm594_vm12, %v1553_v51, %v1540_v40 }
 0xbdb   :  { %v1534_v50 = vpop.permute.xlu1 %1533 }
 0xbdc   :  { %v1548_v52 = vpop.permute.xlu0 %1547  ;;  %v1554_v53 = vsel %vm68_vm1, %v1152_v37, %v1534_v50 }
 0xbdd   :  { %v1557_v3 = vsel %vm43_vm0, %v1555_v22, %v1548_v52 }
 0xbde   :  { %2634 = vmatmul.msk.f32.vlgmr.msra.gmra.mxu3 %vm193_vm5, %v1557_v3 }
 0xbe4   :  { %v1542_v54 = vpop.permute.xlu0 %1541 }
 0xbe5   :  { %v1556_v59 = vsel %vm594_vm12, %v1554_v53, %v1542_v54  ;;  %v2709_v53 = vld [vmem:[#allocation2 + $0x270] ss:$0 sm:$0xff] }
 0xbe6   :  { %v1558_v60 = vsel %vm43_vm0, %v1556_v59, %v1550_v56  ;;  %v2710_v59 = vld [vmem:[#allocation2 + $0x278] ss:$0 sm:$0xff] }
 0xbe7   :  { %2635 = vmatmul.msk.f32.gmra.mxu3 %vm193_vm5, %v1558_v60 }
 0xc06   :  { %v739_v15 = vpop.xlane.xlu1 %738 }
 0xc07   :  { %v740_v61 = vmul.f32 %v739_v15, %v3015_v39 }
 0xc09   :  { %v741_v63 = vsub.f32 %v734_v43, %v740_v61  ;;  %v1651_v43 = vld [vmem:[#allocation2 + $0x298] sm:$0xff]  ;;  %v1686_v61 = vld [vmem:[#allocation2 + $0x2c0] sm:$0xff] }
 0xc0a   :  { %1672 = vmatpush.msra.mxu0 %v1651_v43  ;;  %1704 = vmatpush.msrb.mxu1 %v1686_v61 }
 0xc0b   :  { %v742_v0 = vmul.f32 %v741_v63, %v741_v63 }
 0xc0c   :  { %1673 = vmatpush.msra.mxu0 %v1650_v44 }
 0xc0d   :  { %v743_v1 = vsel %vm193_vm5, %v742_v0, 0.0  ;;  %v1685_v0 = vld [vmem:[#allocation2 + $0x2b8] sm:$0xff] }
 0xc0e   :  { %744 = vadd.xlane.f32.xlu0 %v743_v1  ;;  %1674 = vmatpush.msra.mxu0 %v1649_v45  ;;  %v1714_v1 = vld [vmem:[#allocation2 + $0x2e0] sm:$0xff] }
 0xc0f   :  { %1705 = vmatpush.msrb.mxu1 %v1685_v0 }
 0xc10   :  { %1675 = vmatpush.msra.mxu0 %v1648_v46 }
 0xc61   :  { %v1588_v58 = vpop.f32.mrf.mxu3 }
 0xc62   :  { %v1589_v4 = vadd.f32 %v2706_v2, %v1588_v58  ;;  %v1713_v58 = vld [vmem:[#allocation2 + $0x2d8] sm:$0xff] }
 0xc64   :  { %v1594_v5 = vadd.f32 %v1589_v4, %v3048_v57  ;;  %v1683_v4 = vld [vmem:[#allocation2 + $0x2a8] sm:$0xff] }
 0xc66   :  { %v1598_v6 = vsel %vm193_vm5, %v1594_v5, 0.0 }
 0xc67   :  { %1599 = vadd.xlane.f32.xlu1 %v1598_v6 }
 0xc6a   :  { %v1591_v24 = vpop.f32.mrf.mxu3 }
 0xc6b   :  { %v1592_v7 = vadd.f32 %v2706_v2, %v1591_v24  ;;  %v1684_v2 = vld [vmem:[#allocation2 + $0x2b0] sm:$0xff] }
 0xc6c   :  { %1706 = vmatpush.msrb.mxu1 %v1684_v2 }
 0xc6d   :  { %v1595_v27 = vadd.f32 %v1592_v7, %v3056_v62 }
 0xc6e   :  { %1707 = vmatpush.msrb.mxu1 %v1683_v4 }
 0xc6f   :  { %v1601_v28 = vsel %vm193_vm5, %v1595_v27, 0.0 }
 0xc81   :  { %v745_v8 = vpop.xlane.xlu0 %744 }
 0xc82   :  { %v746_v10 = vmul.f32 %v745_v8, %v3015_v39 }
 0xc84   :  { %v747_v12 = vadd.f32 1e-05, %v746_v10 }
 0xc86   :  { %2780 = vrsqrt.f32 %v747_v12  ;;  %vm754_vm14 = vweird.f32 %v747_v12 }
 0xc8c   :  { %v2781_v13 = vpop.eup %2780 }
 0xc8d   :  { %v749_v16 = vmul.f32 %v2781_v13, %v747_v12  ;;  %vm755_vm13 = vweird.f32 %v2781_v13 }
 0xc8e   :  { %vm756_vm15 = vmor %vm754_vm14, %vm755_vm13 }
 0xc8f   :  { %v750_v31 = vmul.f32 %v2781_v13, %v749_v16 }
 0xc91   :  { %v751_v17 = vmul.f32 0.5, %v750_v31 }
 0xc93   :  { %v752_v55 = vsub.f32 1.5, %v751_v17 }
 0xc95   :  { %v753_v18 = vmul.f32 %v2781_v13, %v752_v55 }
 0xc97   :  { %v757_v19 = vsel %vm756_vm15, %v2781_v13, %v753_v18 }
 0xc98   :  { %v758_v57 = vmul.f32 %v757_v19, %v741_v63  ;;  %v1715_v63 = vld [vmem:[#allocation2 + $0x2e8] sm:$0xff] }
 0xc99   :  { %1730 = vmatpush.msrb.mxu2 %v1715_v63 }
 0xc9a   :  { %v760_v21 = vmul.f32 %v2707_v11, %v758_v57 }
 0xc9b   :  { %1731 = vmatpush.msrb.mxu2 %v1714_v1 }
 0xc9c   :  { %v762_v25 = vadd.f32 %v2708_v20, %v760_v21  ;;  %v2711_v21 = vld [vmem:[#allocation2 + $0x170] ss:$0 sm:$0xff] }
 0xc9d   :  { %1732 = vmatpush.msrb.mxu2 %v1713_v58 }
 0xc9e   :  { %v765_v26 = vsel %vm193_vm5, %v762_v25, 0.0 }
 0xc9f   :  { %766 = vadd.xlane.f32.xlu2 %v765_v26  ;;  %v2712_v26 = vld [vmem:[#allocation2 + $0x178] ss:$0 sm:$0xff] }
 0xca7   :  { %1602 = vadd.xlane.f32.xlu2 %v1601_v28 }
 0xcda   :  { %v1600_v14 = vpop.xlane.xlu1 %1599 }
 0xcdb   :  { %v1604_v29 = vmul.f32 %v1600_v14, %v3015_v39 }
 0xcdd   :  { %v1606_v30 = vsub.f32 %v1594_v5, %v1604_v29  ;;  %v1712_v5 = vld [vmem:[#allocation2 + $0x2d0] sm:$0xff] }
 0xcde   :  { %1733 = vmatpush.msrb.mxu2 %v1712_v5 }
 0xcdf   :  { %v1608_v33 = vmul.f32 %v1606_v30, %v1606_v30 }
 0xce1   :  { %v1610_v36 = vsel %vm193_vm5, %v1608_v33, 0.0 }
 0xce2   :  { %1611 = vadd.xlane.f32.xlu1 %v1610_v36 }
 0xd12   :  { %v767_v37 = vpop.xlane.xlu2 %766 }
 0xd13   :  { %v768_v34 = vmul.f32 %v767_v37, %v3015_v39 }
 0xd15   :  { %v3248_v23 = vsub.f32 %v762_v25, %v768_v34 }
 0xd17   :  { %v770_v9 = vmul.f32 %v3248_v23, %v3248_v23 }
 0xd19   :  { %v771_v62 = vsel %vm193_vm5, %v770_v9, 0.0 }
 0xd1a   :  { %772 = vadd.xlane.f32.xlu0 %v771_v62  ;;  %v1603_v35 = vpop.xlane.xlu2 %1602 }
 0xd1b   :  { %v1605_v38 = vmul.f32 %v1603_v35, %v3015_v39  ;;  %v2714_v35 = vld [vmem:[#allocation2 + $0x2c8] ss:$0 sm:$0xff] }
 0xd1d   :  { %v3254_v41 = vsub.f32 %v1595_v27, %v1605_v38 }
 0xd1f   :  { %v1609_v32 = vmul.f32 %v3254_v41, %v3254_v41 }
 0xd21   :  { %v1613_v42 = vsel %vm193_vm5, %v1609_v32, 0.0 }
 0xd22   :  { %1614 = vadd.xlane.f32.xlu2 %v1613_v42 }
 0xd55   :  { %v1612_v47 = vpop.xlane.xlu1 %1611 }
 0xd56   :  { %v1616_v48 = vmul.f32 %v1612_v47, %v3015_v39 }
 0xd58   :  { %v1618_v49 = vadd.f32 1e-05, %v1616_v48 }
 0xd5a   :  { %2782 = vrsqrt.f32 %v1618_v49  ;;  %vm1626_vm4 = vweird.f32 %v1618_v49 }
 0xd60   :  { %v2783_v40 = vpop.eup %2782 }
 0xd61   :  { %v1621_v51 = vmul.f32 %v2783_v40, %v1618_v49  ;;  %vm1627_vm6 = vweird.f32 %v2783_v40 }
 0xd62   :  { %vm1628_vm8 = vmor %vm1626_vm4, %vm1627_vm6 }
 0xd63   :  { %v1622_v22 = vmul.f32 %v2783_v40, %v1621_v51  ;;  %v946_v51 = vld [vmem:[#allocation2 + $0x3d0] sm:$0xff] }
 0xd65   :  { %v1623_v52 = vmul.f32 0.5, %v1622_v22 }
 0xd67   :  { %v1624_v3 = vsub.f32 1.5, %v1623_v52 }
 0xd69   :  { %v1625_v50 = vmul.f32 %v2783_v40, %v1624_v3 }
 0xd6b   :  { %v1629_v54 = vsel %vm1628_vm8, %v2783_v40, %v1625_v50 }
 0xd6c   :  { %v1640_v56 = vmul.f32 %v1629_v54, %v1606_v30  ;;  %v947_v54 = vld [vmem:[#allocation2 + $0x3d8] sm:$0xff] }
 0xd6e   :  { %v1643_v60 = vmul.f32 %v2709_v53, %v1640_v56 }
 0xd70   :  { %v3260_v15 = vadd.f32 %v2710_v59, %v1643_v60 }
 0xd72   :  { %2636 = vmatmul.msk.f32.vlgmr.msra.gmra.mxu0 %vm193_vm5, %v3260_v15 }
 0xd8d   :  { %v773_v6 = vpop.xlane.xlu0 %772 }
 0xd8e   :  { %v774_v8 = vmul.f32 %v773_v6, %v3015_v39 }
 0xd90   :  { %v775_v10 = vadd.f32 1e-05, %v774_v8 }
 0xd92   :  { %2784 = vrsqrt.f32 %v775_v10  ;;  %vm782_vm10 = vweird.f32 %v775_v10 }
 0xd95   :  { %v1615_v12 = vpop.xlane.xlu2 %1614 }
 0xd96   :  { %v1617_v13 = vmul.f32 %v1615_v12, %v3015_v39 }
 0xd98   :  { %v2785_v16 = vpop.eup %2784  ;;  %v1619_v31 = vadd.f32 1e-05, %v1617_v13 }
 0xd99   :  { %v777_v17 = vmul.f32 %v2785_v16, %v775_v10  ;;  %vm783_vm9 = vweird.f32 %v2785_v16 }
 0xd9a   :  { %2786 = vrsqrt.f32 %v1619_v31  ;;  %vm784_vm11 = vmor %vm782_vm10, %vm783_vm9  ;;  %vm1636_vm14 = vweird.f32 %v1619_v31 }
 0xd9b   :  { %v778_v55 = vmul.f32 %v2785_v16, %v777_v17 }
 0xd9d   :  { %v779_v18 = vmul.f32 0.5, %v778_v55 }
 0xd9f   :  { %v780_v11 = vsub.f32 1.5, %v779_v18 }
 0xda0   :  { %v2787_v19 = vpop.eup %2786 }
 0xda1   :  { %v781_v57 = vmul.f32 %v2785_v16, %v780_v11  ;;  %v1631_v20 = vmul.f32 %v2787_v19, %v1619_v31  ;;  %vm1637_vm13 = vweird.f32 %v2787_v19 }
 0xda2   :  { %vm1638_vm15 = vmor %vm1636_vm14, %vm1637_vm13 }
 0xda3   :  { %v785_v24 = vsel %vm784_vm11, %v2785_v16, %v781_v57  ;;  %v1632_v25 = vmul.f32 %v2787_v19, %v1631_v20 }
 0xda4   :  { %v786_v7 = vmul.f32 %v785_v24, %v3248_v23  ;;  %v2713_v23 = vld [vmem:[#allocation2 + $0x2a0] ss:$0 sm:$0xff] }
 0xda5   :  { %v1633_v27 = vmul.f32 0.5, %v1632_v25 }
 0xda6   :  { %v788_v28 = vmul.f32 %v2711_v21, %v786_v7 }
 0xda7   :  { %v1634_v14 = vsub.f32 1.5, %v1633_v27 }
 0xda8   :  { %v790_v29 = vadd.f32 %v2712_v26, %v788_v28 }
 0xda9   :  { %v1635_v30 = vmul.f32 %v2787_v19, %v1634_v14 }
 0xdaa   :  { %2638 = vmatmul.msk.f32.vlgmr.msrb.gmra.mxu1 %vm193_vm5, %v790_v29  ;;  %2639 = vmatmul.msk.f32.vlgmr.msrb.gmra.mxu2 %vm193_vm5, %v790_v29 }
 0xdab   :  { %v1639_v33 = vsel %vm1638_vm15, %v2787_v19, %v1635_v30 }
 0xdac   :  { %v1641_v36 = vmul.f32 %v1639_v33, %v3254_v41  ;;  %v2715_v41 = vld [vmem:[#allocation2 + $0x2f0] ss:$0 sm:$0xff] }
 0xdae   :  { %v1644_v37 = vmul.f32 %v2709_v53, %v1641_v36 }
 0xdb0   :  { %v3270_v34 = vadd.f32 %v2710_v59, %v1644_v37 }
 0xdb2   :  { %2637 = vmatmul.msk.f32.gmra.mxu0 %vm193_vm5, %v3270_v34 }
 0xdef   :  { %v1677_v9 = vpop.f32.mrf.mxu0 }
 0xdf0   :  { %v1678_v62 = vadd.f32 %v2713_v23, %v1677_v9 }
 0xdf2   :  { %1849 = vrot.lane.b32.xlu1 %v1678_v62, %s2894_s25 }
 0xdfa   :  { %2084 = vrot.lane.b32.xlu1 %v1678_v62, %s2893_s24 }
 0xe27   :  { %v1709_v38 = vpop.f32.mrf.mxu1 }
 0xe28   :  { %v1710_v32 = vadd.f32 %v2714_v35, %v1709_v38 }
 0xe2a   :  { %1853 = vrot.lane.b32.xlu0 %v1710_v32, %s2894_s25  ;;  %2640 = vmatpush.xpose.msk.msra.mxu1 %vm68_vm1, %v1710_v32 }
 0xe2d   :  { %v1735_v42 = vpop.f32.mrf.mxu2  ;;  %2641 = vmatmul.msk.f32.vlgmr.msra.gmra.mxu1 %vm68_vm1, %v1678_v62 }
 0xe2e   :  { %v3279_v43 = vadd.f32 %v2715_v41, %v1735_v42 }
 0xe2f   :  { %v1680_v44 = vpop.f32.mrf.mxu0 }
 0xe30   :  { %v1681_v45 = vadd.f32 %v2713_v23, %v1680_v44  ;;  %1841 = vmatpush.msra.mxu2 %v3279_v43 }
 0xe32   :  { %1971 = vrot.lane.b32.xlu0 %v1710_v32, %s2895_s26  ;;  %1851 = vrot.lane.b32.xlu2 %v1681_v45, %s2894_s25 }
 0xe35   :  { %2642 = vmatmul.msk.f32.gmra.mxu1 %vm68_vm1, %v1681_v45 }
 0xe3a   :  { %2088 = vrot.lane.b32.xlu0 %v1710_v32, %s2893_s24  ;;  %1967 = vrot.lane.b32.xlu2 %v1678_v62, %s2895_s26 }
 0xe42   :  { %1969 = vrot.lane.b32.xlu0 %v1681_v45, %s2895_s26  ;;  %2086 = vrot.lane.b32.xlu2 %v1681_v45, %s2893_s24 }
 0xe64   :  { %v1850_v48 = vpop.permute.xlu1 %1849 }
 0xe6c   :  { %v2085_v53 = vpop.permute.xlu1 %2084 }
 0xe8c   :  { %v1852_v47 = vpop.permute.xlu2 %1851 }
 0xe94   :  { %v1968_v40 = vpop.permute.xlu2 %1967 }
 0xe9c   :  { %v1854_v46 = vpop.permute.xlu0 %1853  ;;  %v2087_v63 = vpop.permute.xlu2 %2086 }
 0xe9d   :  { %2645 = vmatpush.xpose.msk.msrb.mxu3 %vm68_vm1, %v1854_v46 }
 0xea0   :  { %2646 = vmatmul.msk.f32.vlgmr.msrb.gmra.mxu3 %vm68_vm1, %v1850_v48 }
 0xea4   :  { %v1972_v49 = vpop.permute.xlu0 %1971 }
 0xea5   :  { %2650 = vmatpush.xpose.msk.msrb.mxu1 %vm68_vm1, %v1972_v49 }
 0xea8   :  { %2647 = vmatmul.msk.f32.gmra.mxu3 %vm68_vm1, %v1852_v47  ;;  %2651 = vmatmul.msk.f32.vlgmr.msrb.gmra.mxu1 %vm68_vm1, %v1968_v40 }
 0xeaa   :  { %v1764_v22 = vpop.f32.mrf.mxu1 }
 0xeab   :  { %v1765_v52 = vadd.f32 %v1764_v22, %v946_v51 }
 0xeac   :  { %v2089_v3 = vpop.permute.xlu0 %2088 }
 0xead   :  { %2655 = vmatpush.xpose.msk.msra.mxu3 %vm68_vm1, %v2089_v3  ;;  %v1770_v50 = vsel %vm68_vm1, %v1765_v52, -inf }
 0xeae   :  { %1771 = vmax.xlane.f32.xlu1 %v1770_v50 }
 0xeb0   :  { %2656 = vmatmul.msk.f32.vlgmr.msra.gmra.mxu3 %vm68_vm1, %v2085_v53 }
 0xeb2   :  { %v1767_v56 = vpop.f32.mrf.mxu1 }
 0xeb3   :  { %v1768_v59 = vadd.f32 %v1767_v56, %v947_v54 }
 0xeb4   :  { %v1970_v60 = vpop.permute.xlu0 %1969 }
 0xeb5   :  { %2652 = vmatmul.msk.f32.gmra.mxu1 %vm68_vm1, %v1970_v60  ;;  %v1773_v61 = vsel %vm68_vm1, %v1768_v59, -inf }
 0xeb6   :  { %1774 = vmax.xlane.f32.xlu2 %v1773_v61 }
 0xeb8   :  { %2657 = vmatmul.msk.f32.gmra.mxu3 %vm68_vm1, %v2087_v63 }
 0xf21   :  { %v1772_v4 = vpop.xlane.xlu1 %1771 }
 0xf22   :  { %v1776_v10 = vsub.f32 %v1765_v52, %v1772_v4 }
 0xf23   :  { %v1878_v0 = vpop.f32.mrf.mxu3 }
 0xf24   :  { %v1879_v1 = vadd.f32 %v1878_v0, %v946_v51  ;;  %v1778_v16 = vmul.f32 1.442695, %v1776_v10 }
 0xf25   :  { %v1996_v58 = vpop.f32.mrf.mxu1 }
 0xf26   :  { %v1884_v2 = vsel %vm68_vm1, %v1879_v1, -inf  ;;  %v1997_v5 = vadd.f32 %v1996_v58, %v946_v51  ;;  %2788 = vpow2.f32 %v1778_v16 }
 0xf27   :  { %1885 = vmax.xlane.f32.xlu0 %v1884_v2 }
 0xf28   :  { %v2002_v12 = vsel %vm68_vm1, %v1997_v5, -inf }
 0xf29   :  { %v1775_v31 = vpop.xlane.xlu2 %1774 }
 0xf2a   :  { %v1777_v19 = vsub.f32 %v1768_v59, %v1775_v31 }
 0xf2b   :  { %v1881_v6 = vpop.f32.mrf.mxu3 }
 0xf2c   :  { %v1882_v8 = vadd.f32 %v1881_v6, %v947_v54  ;;  %v1780_v21 = vmul.f32 1.442695, %v1777_v19  ;;  %v3305_v24 = vpop.eup %2788 }
 0xf2d   :  { %v1782_v27 = vsel %vm68_vm1, %v3305_v24, 0.0 }
 0xf2e   :  { %v1887_v13 = vsel %vm68_vm1, %v1882_v8, -inf  ;;  %2790 = vpow2.f32 %v1780_v21 }
 0xf2f   :  { %2003 = vmax.xlane.f32.xlu0 %v2002_v12  ;;  %1888 = vmax.xlane.f32.xlu1 %v1887_v13 }
 0xf32   :  { %v1999_v17 = vpop.f32.mrf.mxu1 }
 0xf33   :  { %v2000_v55 = vadd.f32 %v1999_v17, %v947_v54  ;;  %v2113_v18 = vpop.f32.mrf.mxu3 }
 0xf34   :  { %v2114_v11 = vadd.f32 %v2113_v18, %v946_v51  ;;  %v3310_v28 = vpop.eup %2790 }
 0xf35   :  { %v2005_v57 = vsel %vm68_vm1, %v2000_v55, -inf  ;;  %v1785_v14 = vsel %vm68_vm1, %v3310_v28, 0.0 }
 0xf36   :  { %v2119_v20 = vsel %vm68_vm1, %v2114_v11, -inf }
 0xf37   :  { %2120 = vmax.xlane.f32.xlu2 %v2119_v20  ;;  %2006 = vmax.xlane.f32.xlu1 %v2005_v57 }
 0xf3b   :  { %v2116_v25 = vpop.f32.mrf.mxu3 }
 0xf3c   :  { %v2117_v7 = vadd.f32 %v2116_v25, %v947_v54 }
 0xf3e   :  { %v2122_v26 = vsel %vm68_vm1, %v2117_v7, -inf }
 0xf3f   :  { %2123 = vmax.xlane.f32.xlu0 %v2122_v26  ;;  %1783 = vadd.xlane.f32.xlu2 %v1782_v27 }
 0xf47   :  { %1786 = vadd.xlane.f32.xlu0 %v1785_v14 }
 0xf9a   :  { %v1886_v29 = vpop.xlane.xlu0 %1885 }
 0xf9b   :  { %v1890_v37 = vsub.f32 %v1879_v1, %v1886_v29 }
 0xf9d   :  { %v1892_v9 = vmul.f32 1.442695, %v1890_v37 }
 0xfa2   :  { %v2004_v30 = vpop.xlane.xlu0 %2003  ;;  %v1889_v33 = vpop.xlane.xlu1 %1888 }
 0xfa3   :  { %v2008_v36 = vsub.f32 %v1997_v5, %v2004_v30  ;;  %v1891_v45 = vsub.f32 %v1882_v8, %v1889_v33 }
 0xfa5   :  { %v2010_v23 = vmul.f32 1.442695, %v2008_v36  ;;  %v1894_v47 = vmul.f32 1.442695, %v1891_v45 }
 0xfa7   :  { %2792 = vpow2.f32 %v2010_v23 }
 0xfa8   :  { %2794 = vpow2.f32 %v1892_v9 }
 0xfaa   :  { %v2121_v62 = vpop.xlane.xlu2 %2120  ;;  %v2007_v35 = vpop.xlane.xlu1 %2006 }
 0xfab   :  { %v2125_v38 = vsub.f32 %v2114_v11, %v2121_v62  ;;  %v2009_v32 = vsub.f32 %v2000_v55, %v2007_v35 }
 0xfad   :  { %v3314_v41 = vpop.eup %2792  ;;  %v2127_v42 = vmul.f32 1.442695, %v2125_v38  ;;  %v2012_v44 = vmul.f32 1.442695, %v2009_v32 }
 0xfae   :  { %v2014_v46 = vsel %vm68_vm1, %v3314_v41, 0.0  ;;  %v3318_v40 = vpop.eup %2794 }
 0xfaf   :  { %2796 = vpow2.f32 %v2127_v42  ;;  %2015 = vadd.xlane.f32.xlu1 %v2014_v46  ;;  %v1896_v53 = vsel %vm68_vm1, %v3318_v40, 0.0 }
 0xfb0   :  { %2798 = vpow2.f32 %v2012_v44 }
 0xfb2   :  { %v2124_v48 = vpop.xlane.xlu0 %2123  ;;  %v1784_v49 = vpop.xlane.xlu2 %1783 }
 0xfb3   :  { %v2126_v51 = vsub.f32 %v2117_v7, %v2124_v48  ;;  %2800 = vrcp.f32 %v1784_v49  ;;  %v1799_v1 = vand.u32 2147483648, %v1784_v49  ;;  %v1797_v58 = vand.u32 2147483647, %v1784_v49 }
 0xfb4   :  { %2802 = vpow2.f32 %v1894_v47  ;;  %vm1793_vm4 = vweird.f32 %v1784_v49 }
 0xfb5   :  { %v3320_v22 = vpop.eup %2796  ;;  %v2129_v52 = vmul.f32 1.442695, %v2126_v51  ;;  %v1800_v10 = vor.u32 1.1754944e-38, %v1799_v1  ;;  %vm1798_vm9 = vcmp.eq.f32.partialorder %v1797_v58, 8.507059e+37 }
 0xfb6   :  { %v3322_v3 = vpop.eup %2798  ;;  %v2131_v50 = vsel %vm68_vm1, %v3320_v22, 0.0 }
 0xfb7   :  { %2804 = vpow2.f32 %v2129_v52  ;;  %2132 = vadd.xlane.f32.xlu0 %v2131_v50  ;;  %1897 = vadd.xlane.f32.xlu1 %v1896_v53  ;;  %v2017_v54 = vsel %vm68_vm1, %v3322_v3, 0.0 }
 0xfb8   :  { %2018 = vadd.xlane.f32.xlu2 %v2017_v54 }
 0xfb9   :  { %v2801_v56 = vpop.eup %2800 }
 0xfba   :  { %v1789_v59 = vmul.f32 %v2801_v56, %v1784_v49  ;;  %v1787_v60 = vpop.xlane.xlu0 %1786  ;;  %v3330_v61 = vpop.eup %2802  ;;  %vm1794_vm6 = vweird.f32 %v2801_v56 }
 0xfbb   :  { %2806 = vrcp.f32 %v1787_v60  ;;  %v1899_v5 = vsel %vm68_vm1, %v3330_v61, 0.0  ;;  %vm1795_vm8 = vmor %vm1793_vm4, %vm1794_vm6  ;;  %v1814_v55 = vand.u32 2147483648, %v1787_v60  ;;  %v1812_v11 = vand.u32 2147483647, %v1787_v60 }
 0xfbc   :  { %v1790_v63 = vsub.f32 1.0, %v1789_v59  ;;  %vm1808_vm11 = vweird.f32 %v1787_v60 }
 0xfbd   :  { %v3332_v0 = vpop.eup %2804  ;;  %v1815_v57 = vor.u32 1.1754944e-38, %v1814_v55  ;;  %vm1813_vm14 = vcmp.eq.f32.partialorder %v1812_v11, 8.507059e+37 }
 0xfbe   :  { %v1791_v2 = vmul.f32 %v2801_v56, %v1790_v63  ;;  %v2134_v4 = vsel %vm68_vm1, %v3332_v0, 0.0 }
 0xfbf   :  { %2135 = vadd.xlane.f32.xlu0 %v2134_v4 }
 0xfc0   :  { %v1792_v6 = vadd.f32 %v2801_v56, %v1791_v2  ;;  %1900 = vadd.xlane.f32.xlu2 %v1899_v5 }
 0xfc1   :  { %v2807_v8 = vpop.eup %2806 }
 0xfc2   :  { %v1796_v12 = vsel %vm1795_vm8, %v2801_v56, %v1792_v6  ;;  %v1804_v13 = vmul.f32 %v2807_v8, %v1787_v60  ;;  %vm1809_vm10 = vweird.f32 %v2807_v8 }
 0xfc3   :  { %v1801_v16 = vsel %vm1798_vm9, %v1800_v10, %v1796_v12  ;;  %vm1810_vm13 = vmor %vm1808_vm11, %vm1809_vm10 }
 0xfc4   :  { %v1805_v31 = vsub.f32 1.0, %v1804_v13  ;;  %v1818_v17 = vmul.f32 %v3305_v24, %v1801_v16 }
 0xfc6   :  { %v1806_v18 = vmul.f32 %v2807_v8, %v1805_v31  ;;  %2643 = vmatmul.msk.f32.vlgmr.msra.gmra.mxu2 %vm68_vm1, %v1818_v17 }
 0xfc8   :  { %v1807_v19 = vadd.f32 %v2807_v8, %v1806_v18 }
 0xfca   :  { %v1811_v20 = vsel %vm1810_vm13, %v2807_v8, %v1807_v19 }
 0xfcb   :  { %v1816_v21 = vsel %vm1813_vm14, %v1815_v57, %v1811_v20 }
 0xfcc   :  { %v1819_v25 = vmul.f32 %v3310_v28, %v1816_v21 }
 0xfce   :  { %2644 = vmatmul.msk.f32.gmra.mxu2 %vm68_vm1, %v1819_v25 }
 0xfd0   :  { %1935 = vrot.lane.b32.xlu1 %v3279_v43, %s2894_s25 }
 0xfd3   :  { %2169 = vrot.lane.b32.xlu0 %v3279_v43, %s2893_s24 }
 0xfd8   :  { %2052 = vrot.lane.b32.xlu2 %v3279_v43, %s2895_s26 }
0x1022   :  { %v2016_v24 = vpop.xlane.xlu1 %2015 }
0x1023   :  { %2808 = vrcp.f32 %v2016_v24  ;;  %v2031_v37 = vand.u32 2147483648, %v2016_v24  ;;  %vm2025_vm6 = vweird.f32 %v2016_v24  ;;  %v2029_v9 = vand.u32 2147483647, %v2016_v24 }
0x1025   :  { %v2032_v42 = vor.u32 1.1754944e-38, %v2031_v37  ;;  %vm2030_vm8 = vcmp.eq.f32.partialorder %v2029_v9, 8.507059e+37 }
0x1029   :  { %v2809_v7 = vpop.eup %2808 }
0x102a   :  { %v2021_v26 = vmul.f32 %v2809_v7, %v2016_v24  ;;  %v1898_v27 = vpop.xlane.xlu1 %1897  ;;  %v3348_v30 = vpop.xlane.xlu0 %2132  ;;  %vm2026_vm15 = vweird.f32 %v2809_v7 }
0x102b   :  { %v2019_v14 = vpop.xlane.xlu2 %2018  ;;  %vm2027_vm4 = vmor %vm2025_vm6, %vm2026_vm15  ;;  %v1913_v51 = vand.u32 2147483648, %v1898_v27  ;;  %vm1907_vm11 = vweird.f32 %v1898_v27  ;;  %v1911_v54 = vand.u32 2147483647, %v1898_v27 }
0x102c   :  { %v2022_v29 = vsub.f32 1.0, %v2021_v26  ;;  %2810 = vrcp.f32 %v2019_v14  ;;  %v2046_v50 = vand.u32 2147483648, %v2019_v14  ;;  %vm2040_vm13 = vweird.f32 %v2019_v14 }
0x102d   :  { %2812 = vrcp.f32 %v1898_v27  ;;  %v2044_v1 = vand.u32 2147483647, %v2019_v14  ;;  %v1914_v5 = vor.u32 1.1754944e-38, %v1913_v51  ;;  %vm1912_vm6 = vcmp.eq.f32.partialorder %v1911_v54, 8.507059e+37  ;;  %v2232_v51 = vld [vmem:[#allocation2 + $0x300] sm:$0xff] }
0x102e   :  { %v2023_v28 = vmul.f32 %v2809_v7, %v2022_v29  ;;  %2814 = vrcp.f32 %v3348_v30  ;;  %v2047_v8 = vor.u32 1.1754944e-38, %v2046_v50 }
0x1030   :  { %v2024_v33 = vadd.f32 %v2809_v7, %v2023_v28 }
0x1032   :  { %v2811_v36 = vpop.eup %2810  ;;  %v2028_v38 = vsel %vm2027_vm4, %v2809_v7, %v2024_v33  ;;  %v3354_v48 = vpop.xlane.xlu0 %2135  ;;  %vm2045_vm4 = vcmp.eq.f32.partialorder %v2044_v1, 8.507059e+37 }
0x1033   :  { %v2813_v23 = vpop.eup %2812  ;;  %v2036_v43 = vmul.f32 %v2811_v36, %v2019_v14  ;;  %v3351_v62 = vpop.xlane.xlu2 %1900  ;;  %v2033_v46 = vsel %vm2030_vm8, %v2032_v42, %v2028_v38  ;;  %vm2041_vm10 = vweird.f32 %v2811_v36  ;;  %v2146_v14 = vand.u32 2147483647, %v3348_v30 }
0x1034   :  { %v1903_v35 = vmul.f32 %v2813_v23, %v1898_v27  ;;  %2816 = vrcp.f32 %v3351_v62  ;;  %vm1908_vm9 = vweird.f32 %v2813_v23  ;;  %v3356_v49 = vpop.eup %2814  ;;  %v2050_v63 = vmul.f32 %v3314_v41, %v2033_v46  ;;  %vm2042_vm15 = vmor %vm2040_vm13, %vm2041_vm10 }
0x1035   :  { %v2037_v32 = vsub.f32 1.0, %v2036_v43  ;;  %vm3358_vm14 = vmor %vm1907_vm11, %vm1908_vm9  ;;  %2818 = vrcp.f32 %v3354_v48  ;;  %v2138_v2 = vmul.f32 %v3356_v49, %v3348_v30  ;;  %v1928_v17 = vand.u32 2147483648, %v3351_v62 }
0x1036   :  { %v1904_v44 = vsub.f32 1.0, %v1903_v35  ;;  %vm1922_vm9 = vweird.f32 %v3351_v62  ;;  %v1926_v19 = vand.u32 2147483647, %v3351_v62  ;;  %vm2143_vm13 = vweird.f32 %v3356_v49 }
0x1037   :  { %v2038_v45 = vmul.f32 %v2811_v36, %v2037_v32  ;;  %v2139_v12 = vsub.f32 1.0, %v2138_v2  ;;  %v1929_v24 = vor.u32 1.1754944e-38, %v1928_v17  ;;  %v2148_v27 = vand.u32 2147483648, %v3348_v30 }
0x1038   :  { %v1905_v47 = vmul.f32 %v2813_v23, %v1904_v44  ;;  %vm1927_vm11 = vcmp.eq.f32.partialorder %v1926_v19, 8.507059e+37  ;;  %v2163_v9 = vand.u32 2147483648, %v3354_v48 }
0x1039   :  { %v2039_v52 = vadd.f32 %v2811_v36, %v2038_v45  ;;  %v2140_v20 = vmul.f32 %v3356_v49, %v2139_v12 }
0x103a   :  { %v1906_v53 = vadd.f32 %v2813_v23, %v1905_v47  ;;  %v2817_v56 = vpop.eup %2816 }
0x103b   :  { %v2053_v60 = vpop.permute.xlu2 %2052  ;;  %v1918_v4 = vmul.f32 %v2817_v56, %v3351_v62  ;;  %v2043_v6 = vsel %vm2042_vm15, %v2811_v36, %v2039_v52  ;;  %vm1923_vm8 = vweird.f32 %v2817_v56  ;;  %v2819_v31 = vpop.eup %2818  ;;  %v2141_v26 = vadd.f32 %v3356_v49, %v2140_v20  ;;  %v2231_v52 = vld [vmem:[#allocation2 + $0x2f8] sm:$0xff] }
0x103c   :  { %v1910_v58 = vsel %vm3358_vm14, %v2813_v23, %v1906_v53  ;;  %2076 = vmatpush.msrb.mxu2 %v2053_v60  ;;  %v2048_v16 = vsel %vm2045_vm4, %v2047_v8, %v2043_v6  ;;  %vm1924_vm10 = vmor %vm1922_vm9, %vm1923_vm8  ;;  %v2153_v21 = vmul.f32 %v2819_v31, %v3354_v48  ;;  %vm2142_vm14 = vweird.f32 %v3348_v30  ;;  %v2716_v6 = vld [vmem:[#allocation2 + $0x318] ss:$0 sm:$0xff] }
0x103d   :  { %2653 = vmatmul.msk.f32.vlgmr.msrb.gmra.mxu2 %vm68_vm1, %v2050_v63  ;;  %v1919_v10 = vsub.f32 1.0, %v1918_v4  ;;  %v1915_v41 = vsel %vm1912_vm6, %v1914_v5, %v1910_v58  ;;  %v2051_v57 = vmul.f32 %v3322_v3, %v2048_v16  ;;  %vm2144_vm15 = vmor %vm2142_vm14, %vm2143_vm13  ;;  %v2149_v36 = vor.u32 1.1754944e-38, %v2148_v27 }
0x103e   :  { %v1932_v18 = vmul.f32 %v3318_v40, %v1915_v41  ;;  %v2154_v3 = vsub.f32 1.0, %v2153_v21  ;;  %v2145_v28 = vsel %vm2144_vm15, %v3356_v49, %v2141_v26  ;;  %vm2147_vm6 = vcmp.eq.f32.partialorder %v2146_v14, 8.507059e+37  ;;  %v2233_v49 = vld [vmem:[#allocation2 + $0x308] sm:$0xff]  ;;  %v2320_v26 = vld [vmem:[#allocation2 + $0x330] sm:$0xff] }
0x103f   :  { %v1920_v13 = vmul.f32 %v2817_v56, %v1919_v10  ;;  %v2150_v37 = vsel %vm2147_vm6, %v2149_v36, %v2145_v28  ;;  %vm2158_vm4 = vweird.f32 %v2819_v31  ;;  %vm2157_vm8 = vweird.f32 %v3354_v48 }
0x1040   :  { %v2155_v33 = vmul.f32 %v2819_v31, %v2154_v3  ;;  %v2167_v43 = vmul.f32 %v3320_v22, %v2150_v37  ;;  %v2161_v30 = vand.u32 2147483647, %v3354_v48  ;;  %vm2159_vm9 = vmor %vm2157_vm8, %vm2158_vm4  ;;  %v2164_v62 = vor.u32 1.1754944e-38, %v2163_v9  ;;  %v2234_v48 = vld [vmem:[#allocation2 + $0x310] sm:$0xff] }
0x1041   :  { %v1921_v11 = vadd.f32 %v2817_v56, %v1920_v13  ;;  %2255 = vmatpush.msra.mxu1 %v2234_v48 }
0x1042   :  { %v1936_v55 = vpop.permute.xlu1 %1935  ;;  %v2156_v23 = vadd.f32 %v2819_v31, %v2155_v33 }
0x1043   :  { %1959 = vmatpush.msrb.mxu0 %v1936_v55  ;;  %v1925_v25 = vsel %vm1924_vm10, %v2817_v56, %v1921_v11  ;;  %vm2162_vm10 = vcmp.eq.f32.partialorder %v2161_v30, 8.507059e+37  ;;  %2256 = vmatpush.msra.mxu1 %v2233_v49 }
0x1044   :  { %2648 = vmatmul.msk.f32.vlgmr.msrb.gmra.mxu0 %vm68_vm1, %v1932_v18  ;;  %v1930_v40 = vsel %vm1927_vm11, %v1929_v24, %v1925_v25 }
0x1045   :  { %2654 = vmatmul.msk.f32.gmra.mxu2 %vm68_vm1, %v2051_v57  ;;  %v2170_v7 = vpop.permute.xlu0 %2169  ;;  %v1933_v29 = vmul.f32 %v3330_v61, %v1930_v40  ;;  %v2160_v61 = vsel %vm2159_vm9, %v2819_v31, %v2156_v23  ;;  %2257 = vmatpush.msra.mxu1 %v2232_v51  ;;  %v2321_v40 = vld [vmem:[#allocation2 + $0x338] sm:$0xff] }
0x1046   :  { %2193 = vmatpush.msra.mxu0 %v2170_v7  ;;  %v2165_v35 = vsel %vm2162_vm10, %v2164_v62, %v2160_v61  ;;  %v2322_v7 = vld [vmem:[#allocation2 + $0x340] sm:$0xff] }
0x1047   :  { %v2168_v38 = vmul.f32 %v3332_v0, %v2165_v35  ;;  %2258 = vmatpush.msra.mxu1 %v2231_v52  ;;  %v2717_v35 = vld [vmem:[#allocation2 + $0x320] ss:$0 sm:$0xff] }
0x1049   :  { %v1843_v32 = vpop.f32.mrf.mxu2 }
0x104c   :  { %2649 = vmatmul.msk.f32.gmra.mxu0 %vm68_vm1, %v1933_v29 }
0x1051   :  { %v1846_v42 = vpop.f32.mrf.mxu2 }
0x1054   :  { %2658 = vmatmul.msk.f32.vlgmr.msra.gmra.mxu0 %vm68_vm1, %v2167_v43 }
0x105c   :  { %2659 = vmatmul.msk.f32.gmra.mxu0 %vm68_vm1, %v2168_v38 }
0x10c0   :  { %v2078_v44 = vpop.f32.mrf.mxu2 }
0x10c1   :  { %2211 = vrot.lane.b32.xlu2 %v2078_v44, %s2896_s27  ;;  %v1961_v45 = vpop.f32.mrf.mxu0  ;;  %v2718_v44 = vld [vmem:[#allocation2 + $0x328] ss:$0 sm:$0xff] }
0x10c2   :  { %2203 = vrot.lane.b32.xlu1 %v1961_v45, %s2890_s15 }
0x10c8   :  { %v2081_v22 = vpop.f32.mrf.mxu2 }
0x10c9   :  { %2213 = vrot.lane.b32.xlu2 %v2081_v22, %s2896_s27  ;;  %v1964_v46 = vpop.f32.mrf.mxu0 }
0x10ca   :  { %2205 = vrot.lane.b32.xlu1 %v1964_v46, %s2890_s15 }
0x10d1   :  { %v2195_v47 = vpop.f32.mrf.mxu0 }
0x10d2   :  { %2219 = vrot.lane.b32.xlu0 %v2195_v47, %s2897_s28 }
0x10d9   :  { %v2198_v0 = vpop.f32.mrf.mxu0 }
0x10da   :  { %2221 = vrot.lane.b32.xlu0 %v2198_v0, %s2897_s28 }
0x111b   :  { %v2212_v53 = vpop.permute.xlu2 %2211 }
0x1123   :  { %v2214_v2 = vpop.permute.xlu2 %2213 }
0x1134   :  { %v2204_v50 = vpop.permute.xlu1 %2203 }
0x1135   :  { %v2225_v54 = vsel %vm68_vm1, %v1843_v32, %v2204_v50  ;;  %v2380_v50 = vld [vmem:[#allocation2 + $0x390] sm:$0xff] }
0x1136   :  { %v2227_v56 = vsel %vm594_vm12, %v2225_v54, %v2212_v53  ;;  %2397 = vmatpush.msrb.mxu3 %v2380_v50  ;;  %v2379_v53 = vld [vmem:[#allocation2 + $0x388] sm:$0xff]  ;;  %v2378_v54 = vld [vmem:[#allocation2 + $0x380] sm:$0xff] }
0x1138   :  { %2398 = vmatpush.msrb.mxu3 %v2379_v53  ;;  %v2721_v53 = vld [vmem:[#allocation2 + $0x3a0] ss:$0 sm:$0xff] }
0x113a   :  { %2399 = vmatpush.msrb.mxu3 %v2378_v54 }
0x113c   :  { %v2206_v63 = vpop.permute.xlu1 %2205 }
0x113d   :  { %v2226_v1 = vsel %vm68_vm1, %v1846_v42, %v2206_v63  ;;  %v2374_v63 = vld [vmem:[#allocation2 + $0x360] sm:$0xff] }
0x113e   :  { %v2228_v4 = vsel %vm594_vm12, %v2226_v1, %v2214_v2  ;;  %v2373_v1 = vld [vmem:[#allocation2 + $0x358] sm:$0xff]  ;;  %v2719_v2 = vld [vmem:[#allocation2 + $0x350] ss:$0 sm:$0xff] }
0x1144   :  { %v2220_v59 = vpop.permute.xlu0 %2219 }
0x1145   :  { %v2229_v60 = vsel %vm43_vm0, %v2227_v56, %v2220_v59  ;;  %v2377_v56 = vld [vmem:[#allocation2 + $0x378] sm:$0xff]  ;;  %v2376_v59 = vld [vmem:[#allocation2 + $0x370] sm:$0xff] }
0x1146   :  { %2660 = vmatmul.msk.f32.vlgmr.msra.gmra.mxu1 %vm193_vm5, %v2229_v60  ;;  %2400 = vmatpush.msrb.mxu3 %v2377_v56  ;;  %v2375_v60 = vld [vmem:[#allocation2 + $0x368] sm:$0xff] }
0x1148   :  { %2401 = vmatpush.msrb.mxu3 %v2376_v59 }
0x114a   :  { %2402 = vmatpush.msrb.mxu3 %v2375_v60  ;;  %v2722_v60 = vld [vmem:[#allocation2 + $0x3a8] ss:$0 sm:$0xff] }
0x114c   :  { %v2222_v58 = vpop.permute.xlu0 %2221  ;;  %2403 = vmatpush.msrb.mxu3 %v2374_v63 }
0x114d   :  { %v2230_v5 = vsel %vm43_vm0, %v2228_v4, %v2222_v58 }
0x114e   :  { %2661 = vmatmul.msk.f32.gmra.mxu1 %vm193_vm5, %v2230_v5  ;;  %2404 = vmatpush.msrb.mxu3 %v2373_v1 }
0x11c3   :  { %v2260_v8 = vpop.f32.mrf.mxu1 }
0x11c4   :  { %v2261_v10 = vadd.f32 %v2716_v6, %v2260_v8 }
0x11c6   :  { %v2266_v41 = vadd.f32 %v2261_v10, %v3260_v15 }
0x11c8   :  { %v2270_v12 = vsel %vm193_vm5, %v2266_v41, 0.0 }
0x11c9   :  { %2271 = vadd.xlane.f32.xlu1 %v2270_v12 }
0x11cb   :  { %v2263_v13 = vpop.f32.mrf.mxu1 }
0x11cc   :  { %v2264_v16 = vadd.f32 %v2716_v6, %v2263_v13 }
0x11ce   :  { %v2267_v31 = vadd.f32 %v2264_v16, %v3270_v34  ;;  %v2323_v34 = vld [vmem:[#allocation2 + $0x348] sm:$0xff] }
0x11cf   :  { %2344 = vmatpush.msra.mxu2 %v2323_v34  ;;  %v2720_v34 = vld [vmem:[#allocation2 + $0x398] ss:$0 sm:$0xff] }
0x11d0   :  { %v2273_v17 = vsel %vm193_vm5, %v2267_v31, 0.0 }
0x11d1   :  { %2274 = vadd.xlane.f32.xlu2 %v2273_v17  ;;  %2345 = vmatpush.msra.mxu2 %v2322_v7 }
0x11d3   :  { %2346 = vmatpush.msra.mxu2 %v2321_v40 }
0x11d5   :  { %2347 = vmatpush.msra.mxu2 %v2320_v26 }
0x123c   :  { %v2272_v55 = vpop.xlane.xlu1 %2271 }
0x123d   :  { %v2276_v18 = vmul.f32 %v2272_v55, %v3015_v39 }
0x123f   :  { %v2278_v11 = vsub.f32 %v2266_v41, %v2276_v18 }
0x1241   :  { %v2280_v19 = vmul.f32 %v2278_v11, %v2278_v11 }
0x1243   :  { %v2282_v57 = vsel %vm193_vm5, %v2280_v19, 0.0 }
0x1244   :  { %2283 = vadd.xlane.f32.xlu0 %v2282_v57  ;;  %v2275_v20 = vpop.xlane.xlu2 %2274 }
0x1245   :  { %v2277_v15 = vmul.f32 %v2275_v20, %v3015_v39 }
0x1247   :  { %v2279_v21 = vsub.f32 %v2267_v31, %v2277_v15 }
0x1249   :  { %v2281_v25 = vmul.f32 %v2279_v21, %v2279_v21 }
0x124b   :  { %v2285_v24 = vsel %vm193_vm5, %v2281_v25, 0.0 }
0x124c   :  { %2286 = vadd.xlane.f32.xlu1 %v2285_v24 }
0x12b7   :  { %v2284_v3 = vpop.xlane.xlu0 %2283 }
0x12b8   :  { %v2288_v27 = vmul.f32 %v2284_v3, %v3015_v39 }
0x12ba   :  { %v2290_v14 = vadd.f32 1e-05, %v2288_v27 }
0x12bc   :  { %2820 = vrsqrt.f32 %v2290_v14  ;;  %vm2298_vm1 = vweird.f32 %v2290_v14 }
0x12bf   :  { %v2287_v29 = vpop.xlane.xlu1 %2286 }
0x12c0   :  { %v2289_v28 = vmul.f32 %v2287_v29, %v3015_v39 }
0x12c2   :  { %v2821_v33 = vpop.eup %2820  ;;  %v2291_v36 = vadd.f32 1e-05, %v2289_v28 }
0x12c3   :  { %v2293_v37 = vmul.f32 %v2821_v33, %v2290_v14  ;;  %vm2299_vm0 = vweird.f32 %v2821_v33 }
0x12c4   :  { %2822 = vrsqrt.f32 %v2291_v36  ;;  %vm2300_vm12 = vmor %vm2298_vm1, %vm2299_vm0  ;;  %vm2308_vm13 = vweird.f32 %v2291_v36 }
0x12c5   :  { %v2294_v23 = vmul.f32 %v2821_v33, %v2293_v37 }
0x12c7   :  { %v2295_v9 = vmul.f32 0.5, %v2294_v23 }
0x12c9   :  { %v2296_v43 = vsub.f32 1.5, %v2295_v9 }
0x12ca   :  { %v2823_v30 = vpop.eup %2822 }
0x12cb   :  { %v2297_v61 = vmul.f32 %v2821_v33, %v2296_v43  ;;  %v2303_v62 = vmul.f32 %v2823_v30, %v2291_v36  ;;  %vm2309_vm11 = vweird.f32 %v2823_v30 }
0x12cc   :  { %vm2310_vm14 = vmor %vm2308_vm13, %vm2309_vm11 }
0x12cd   :  { %v2301_v38 = vsel %vm2300_vm12, %v2821_v33, %v2297_v61  ;;  %v2304_v32 = vmul.f32 %v2823_v30, %v2303_v62 }
0x12ce   :  { %v2312_v42 = vmul.f32 %v2301_v38, %v2278_v11 }
0x12cf   :  { %v2305_v45 = vmul.f32 0.5, %v2304_v32 }
0x12d0   :  { %v2315_v22 = vmul.f32 %v2717_v35, %v2312_v42 }
0x12d1   :  { %v2306_v46 = vsub.f32 1.5, %v2305_v45 }
0x12d2   :  { %v2318_v47 = vadd.f32 %v2718_v44, %v2315_v22 }
0x12d3   :  { %v2307_v0 = vmul.f32 %v2823_v30, %v2306_v46 }
0x12d4   :  { %2662 = vmatmul.msk.f32.vlgmr.msra.gmra.mxu2 %vm193_vm5, %v2318_v47 }
0x12d5   :  { %v2311_v48 = vsel %vm2310_vm14, %v2823_v30, %v2307_v0 }
0x12d6   :  { %v2313_v49 = vmul.f32 %v2311_v48, %v2279_v21 }
0x12d8   :  { %v2316_v51 = vmul.f32 %v2717_v35, %v2313_v49 }
0x12da   :  { %v2319_v52 = vadd.f32 %v2718_v44, %v2316_v51 }
0x12dc   :  { %2663 = vmatmul.msk.f32.gmra.mxu2 %vm193_vm5, %v2319_v52 }
0x1357   :  { %v2349_v58 = vpop.f32.mrf.mxu2 }
0x1358   :  { %v2350_v4 = vadd.f32 %v2719_v2, %v2349_v58 }
0x135a   :  { %v2357_v5 = vmul.f32 %v2350_v4, %v2350_v4  ;;  %v2355_v19 = vmul.f32 0.5, %v2350_v4 }
0x135c   :  { %v2359_v6 = vmul.f32 %v2357_v5, %v2350_v4 }
0x135e   :  { %v2361_v8 = vmul.f32 0.044715, %v2359_v6 }
0x135f   :  { %v2352_v10 = vpop.f32.mrf.mxu2 }
0x1360   :  { %v2363_v41 = vadd.f32 %v2361_v8, %v2350_v4  ;;  %v2353_v12 = vadd.f32 %v2719_v2, %v2352_v10 }
0x1362   :  { %v2365_v13 = vmul.f32 0.7978846, %v2363_v41  ;;  %v2358_v16 = vmul.f32 %v2353_v12, %v2353_v12  ;;  %v2356_v21 = vmul.f32 0.5, %v2353_v12 }
0x1364   :  { %2824 = vtanh.f32 %v2365_v13  ;;  %v2360_v31 = vmul.f32 %v2358_v16, %v2353_v12 }
0x1366   :  { %v2362_v17 = vmul.f32 0.044715, %v2360_v31 }
0x1368   :  { %v2364_v55 = vadd.f32 %v2362_v17, %v2353_v12 }
0x136a   :  { %v2825_v18 = vpop.eup %2824  ;;  %v2366_v11 = vmul.f32 0.7978846, %v2364_v55 }
0x136b   :  { %v2369_v57 = vadd.f32 1.0, %v2825_v18 }
0x136c   :  { %2826 = vtanh.f32 %v2366_v11 }
0x136d   :  { %v2371_v20 = vmul.f32 %v2369_v57, %v2355_v19 }
0x136f   :  { %2664 = vmatmul.msk.f32.vlgmr.msrb.gmra.mxu3 %vm710_vm7, %v2371_v20 }
0x1372   :  { %v2827_v15 = vpop.eup %2826 }
0x1373   :  { %v2370_v25 = vadd.f32 1.0, %v2827_v15 }
0x1375   :  { %v2372_v24 = vmul.f32 %v2370_v25, %v2356_v21  ;;  %v2525_v25 = vld [vmem:[#allocation2 + $0x3f8] sm:$0xff] }
0x1376   :  { %2543 = vmatpush.msrb.mxu0 %v2525_v25 }
0x1377   :  { %2665 = vmatmul.msk.f32.gmra.mxu3 %vm710_vm7, %v2372_v24  ;;  %v2524_v24 = vld [vmem:[#allocation2 + $0x3f0] sm:$0xff] }
0x1378   :  { %2544 = vmatpush.msrb.mxu0 %v2524_v24 }
0x13f2   :  { %v2406_v7 = vpop.f32.mrf.mxu3 }
0x13f3   :  { %v2407_v40 = vadd.f32 %v2720_v34, %v2406_v7  ;;  %v2523_v7 = vld [vmem:[#allocation2 + $0x3e8] sm:$0xff] }
0x13f4   :  { %2545 = vmatpush.msrb.mxu0 %v2523_v7 }
0x13f5   :  { %v2412_v26 = vadd.f32 %v2407_v40, %v2318_v47  ;;  %v2522_v40 = vld [vmem:[#allocation2 + $0x3e0] sm:$0xff] }
0x13f6   :  { %2546 = vmatpush.msrb.mxu0 %v2522_v40 }
0x13f7   :  { %v2416_v3 = vsel %vm193_vm5, %v2412_v26, 0.0 }
0x13f8   :  { %2417 = vadd.xlane.f32.xlu2 %v2416_v3 }
0x13fa   :  { %v2409_v27 = vpop.f32.mrf.mxu3 }
0x13fb   :  { %v2410_v14 = vadd.f32 %v2720_v34, %v2409_v27 }
0x13fd   :  { %v2413_v29 = vadd.f32 %v2410_v14, %v2319_v52 }
0x13ff   :  { %v2419_v28 = vsel %vm193_vm5, %v2413_v29, 0.0 }
0x1400   :  { %2420 = vadd.xlane.f32.xlu0 %v2419_v28 }
0x146b   :  { %v2418_v33 = vpop.xlane.xlu2 %2417 }
0x146c   :  { %v2422_v36 = vmul.f32 %v2418_v33, %v3015_v39 }
0x146e   :  { %v2424_v37 = vsub.f32 %v2412_v26, %v2422_v36 }
0x1470   :  { %v2426_v23 = vmul.f32 %v2424_v37, %v2424_v37 }
0x1472   :  { %v2428_v9 = vsel %vm193_vm5, %v2426_v23, 0.0 }
0x1473   :  { %v2421_v43 = vpop.xlane.xlu0 %2420  ;;  %2429 = vadd.xlane.f32.xlu1 %v2428_v9 }
0x1474   :  { %v2423_v30 = vmul.f32 %v2421_v43, %v3015_v39 }
0x1476   :  { %v2425_v61 = vsub.f32 %v2413_v29, %v2423_v30 }
0x1478   :  { %v2427_v62 = vmul.f32 %v2425_v61, %v2425_v61 }
0x147a   :  { %v2431_v35 = vsel %vm193_vm5, %v2427_v62, 0.0 }
0x147b   :  { %2432 = vadd.xlane.f32.xlu2 %v2431_v35 }
0x14e6   :  { %v2430_v38 = vpop.xlane.xlu1 %2429 }
0x14e7   :  { %v2434_v32 = vmul.f32 %v2430_v38, %v3015_v39 }
0x14e9   :  { %v2436_v42 = vadd.f32 1e-05, %v2434_v32  ;;  %v2724_v32 = vld [vmem:[#allocation2 + $0x3b8] ss:$0 sm:$0xff] }
0x14eb   :  { %2828 = vrsqrt.f32 %v2436_v42  ;;  %vm2444_vm15 = vweird.f32 %v2436_v42 }
0x14ee   :  { %v2433_v44 = vpop.xlane.xlu2 %2432 }
0x14ef   :  { %v2435_v45 = vmul.f32 %v2433_v44, %v3015_v39 }
0x14f1   :  { %v2829_v22 = vpop.eup %2828  ;;  %v2437_v46 = vadd.f32 1e-05, %v2435_v45 }
0x14f2   :  { %v2439_v47 = vmul.f32 %v2829_v22, %v2436_v42  ;;  %vm2445_vm7 = vweird.f32 %v2829_v22 }
0x14f3   :  { %2830 = vrsqrt.f32 %v2437_v46  ;;  %vm2446_vm6 = vmor %vm2444_vm15, %vm2445_vm7  ;;  %vm2454_vm8 = vweird.f32 %v2437_v46 }
0x14f4   :  { %v2440_v0 = vmul.f32 %v2829_v22, %v2439_v47 }
0x14f6   :  { %v2441_v48 = vmul.f32 0.5, %v2440_v0 }
0x14f8   :  { %v2442_v49 = vsub.f32 1.5, %v2441_v48 }
0x14f9   :  { %v2831_v51 = vpop.eup %2830 }
0x14fa   :  { %v2443_v52 = vmul.f32 %v2829_v22, %v2442_v49  ;;  %v2449_v50 = vmul.f32 %v2831_v51, %v2437_v46  ;;  %vm2455_vm4 = vweird.f32 %v2831_v51  ;;  %v2725_v49 = vld [vmem:[#allocation2 + $0x400] ss:$0 sm:$0xff] }
0x14fb   :  { %vm2456_vm9 = vmor %vm2454_vm8, %vm2455_vm4 }
0x14fc   :  { %v2450_v54 = vmul.f32 %v2831_v51, %v2449_v50  ;;  %v2447_v56 = vsel %vm2446_vm6, %v2829_v22, %v2443_v52 }
0x14fd   :  { %v2458_v59 = vmul.f32 %v2447_v56, %v2424_v37 }
0x14fe   :  { %v2451_v63 = vmul.f32 0.5, %v2450_v54 }
0x14ff   :  { %v2461_v1 = vmul.f32 %v2721_v53, %v2458_v59 }
0x1500   :  { %v2452_v2 = vsub.f32 1.5, %v2451_v63 }
0x1501   :  { %v2464_v58 = vadd.f32 %v2722_v60, %v2461_v1 }
0x1502   :  { %v2453_v4 = vmul.f32 %v2831_v51, %v2452_v2 }
0x1503   :  { %v2468_v5 = vsel %vm193_vm5, %v2464_v58, 0.0 }
0x1504   :  { %2469 = vadd.xlane.f32.xlu0 %v2468_v5  ;;  %v2457_v6 = vsel %vm2456_vm9, %v2831_v51, %v2453_v4 }
0x1505   :  { %v2459_v8 = vmul.f32 %v2457_v6, %v2425_v61  ;;  %v2723_v61 = vld [vmem:[#allocation2 + $0x3b0] ss:$0 sm:$0xff] }
0x1507   :  { %v2462_v10 = vmul.f32 %v2721_v53, %v2459_v8 }
0x1509   :  { %v2465_v41 = vadd.f32 %v2722_v60, %v2462_v10 }
0x150b   :  { %v2471_v12 = vsel %vm193_vm5, %v2465_v41, 0.0 }
0x150c   :  { %2472 = vadd.xlane.f32.xlu1 %v2471_v12 }
0x1577   :  { %v2470_v13 = vpop.xlane.xlu0 %2469 }
0x1578   :  { %v2474_v16 = vmul.f32 %v2470_v13, %v3015_v39 }
0x157a   :  { %v2476_v31 = vsub.f32 %v2464_v58, %v2474_v16 }
0x157c   :  { %v2478_v17 = vmul.f32 %v2476_v31, %v2476_v31 }
0x157e   :  { %v2480_v55 = vsel %vm193_vm5, %v2478_v17, 0.0 }
0x157f   :  { %2481 = vadd.xlane.f32.xlu2 %v2480_v55  ;;  %v2473_v18 = vpop.xlane.xlu1 %2472 }
0x1580   :  { %v2475_v11 = vmul.f32 %v2473_v18, %v3015_v39 }
0x1582   :  { %v2477_v19 = vsub.f32 %v2465_v41, %v2475_v11 }
0x1584   :  { %v2479_v57 = vmul.f32 %v2477_v19, %v2477_v19 }
0x1586   :  { %v2483_v20 = vsel %vm193_vm5, %v2479_v57, 0.0 }
0x1587   :  { %2484 = vadd.xlane.f32.xlu0 %v2483_v20 }
0x15f2   :  { %v2482_v15 = vpop.xlane.xlu2 %2481 }
0x15f3   :  { %v2486_v21 = vmul.f32 %v2482_v15, %v3015_v39 }
0x15f5   :  { %v2488_v34 = vadd.f32 1e-05, %v2486_v21 }
0x15f7   :  { %2832 = vrsqrt.f32 %v2488_v34  ;;  %vm2496_vm0 = vweird.f32 %v2488_v34 }
0x15fa   :  { %v2485_v26 = vpop.xlane.xlu0 %2484 }
0x15fb   :  { %v2487_v3 = vmul.f32 %v2485_v26, %v3015_v39 }
0x15fd   :  { %v2833_v27 = vpop.eup %2832  ;;  %v2489_v14 = vadd.f32 1e-05, %v2487_v3 }
0x15fe   :  { %v2491_v29 = vmul.f32 %v2833_v27, %v2488_v34  ;;  %vm2497_vm10 = vweird.f32 %v2833_v27 }
0x15ff   :  { %2834 = vrsqrt.f32 %v2489_v14  ;;  %vm2498_vm1 = vmor %vm2496_vm0, %vm2497_vm10  ;;  %vm2506_vm11 = vweird.f32 %v2489_v14 }
0x1600   :  { %v2492_v28 = vmul.f32 %v2833_v27, %v2491_v29 }
0x1602   :  { %v2493_v33 = vmul.f32 0.5, %v2492_v28 }
0x1604   :  { %v2494_v36 = vsub.f32 1.5, %v2493_v33 }
0x1605   :  { %v2835_v37 = vpop.eup %2834 }
0x1606   :  { %v2495_v23 = vmul.f32 %v2833_v27, %v2494_v36  ;;  %v2501_v9 = vmul.f32 %v2835_v37, %v2489_v14  ;;  %vm2507_vm12 = vweird.f32 %v2835_v37 }
0x1607   :  { %vm2508_vm13 = vmor %vm2506_vm11, %vm2507_vm12 }
0x1608   :  { %v2499_v43 = vsel %vm2498_vm1, %v2833_v27, %v2495_v23  ;;  %v2502_v30 = vmul.f32 %v2835_v37, %v2501_v9 }
0x1609   :  { %v2510_v62 = vmul.f32 %v2499_v43, %v2476_v31 }
0x160a   :  { %v2503_v35 = vmul.f32 0.5, %v2502_v30 }
0x160b   :  { %v2513_v39 = vmul.f32 %v2723_v61, %v2510_v62 }
0x160c   :  { %v2504_v38 = vsub.f32 1.5, %v2503_v35 }
0x160d   :  { %v2516_v22 = vadd.f32 %v2724_v32, %v2513_v39 }
0x160e   :  { %v2505_v42 = vmul.f32 %v2835_v37, %v2504_v38 }
0x160f   :  { %v2519_v0 = vrot.slane %v2516_v22, 4 }
0x1610   :  { %v2509_v44 = vsel %vm2508_vm13, %v2835_v37, %v2505_v42 }
0x1611   :  { %v2511_v45 = vmul.f32 %v2509_v44, %v2477_v19 }
0x1613   :  { %v2514_v46 = vmul.f32 %v2723_v61, %v2511_v45 }
0x1615   :  { %v2517_v47 = vadd.f32 %v2724_v32, %v2514_v46 }
0x1617   :  { %v2521_v48 = vsel %vm133_vm2, %v2519_v0, %v2517_v47 }
0x1618   :  { %2666 = vmatmul.msk.f32.vlgmr.msrb.gmra.mxu0 %vm193_vm5, %v2521_v48 }
0x1695   :  { %v2548_v51 = vpop.f32.mrf.mxu0 }
0x1696   :  { %v2549_v52 = vadd.f32 %v2725_v49, %v2548_v51 }
0x1698   :  { %2551 = vst.msk [vmem:[#allocation5] sm:$0xff] %vm124_vm3, %v2549_v52 }
0x1699   :  { %2562 = dma.vmem_to_hbm [thread:$0]  %s2558_s9, 128, %s2560_s12, [#allocation4]  }
0x169a   :  { %2886 = dma.done.wait [#allocation4], 128  }
0x169b   :  { %2887 = vsyncadd [#allocation4], 4294967168 }
0x169c   :  { %2567 = vsyncpa [#allocation3], 1 }
0x169d   :  { %2568 = vsyncpa [#allocation4], 1 }

</bundles_post_ra>
